<compile_context>
chip_gen: v6e
topology: v6e:2x2x1
jax: 0.10.0
libtpu: 0.0.40
codegen_flags: <defaults>
</compile_context>

<pallas_src>
from functools import partial

import jax
import jax.numpy as jnp
from jax.experimental import pallas as pl
from jax.experimental.pallas import tpu as pltpu

LANE = 128        # channel padding target -> lane-dense loads/stores
C1, C2 = 16, 32   # real channel counts of the torch module


# ---------------------------------------------------------------------------
# Kernel 1: fused 5x5 same-conv + bias + ReLU + 2x2 maxpool (one image / step)
# ---------------------------------------------------------------------------
def _conv_relu_pool_kernel(xw_ref, w_ref, b_ref, o_ref, *, H2, W2, KH):
    """
    xw_ref: (4*(H2+2)*W2, KH*Cin) bf16  parity-reordered width-im2col input
            rows ordered (row_parity p, col_parity dx, q=row//2, w2=col//2)
    w_ref : (KH, KH*Cin, Cp)      bf16  Cp = Cout zero-padded to 128
    b_ref : (1, Cp)               f32
    o_ref : (H2*W2, Cp)           bf16  pooled output, (h2, w2) row-major
    """
    M = H2 * W2
    pooled = None
    for dy in range(2):                      # pool-window corner: row offset
        for dx in range(2):                  # pool-window corner: col offset
            acc = None
            for kh in range(KH):             # kernel-row reduction, in VMEM
                p = (dy + kh) % 2
                q0 = (dy + kh) // 2
                start = ((p * 2 + dx) * (H2 + 2) + q0) * W2
                patch = xw_ref[pl.ds(start, M), :]          # contiguous (M, KH*Cin)
                d = jnp.dot(patch, w_ref[kh],
                            preferred_element_type=jnp.float32)
                acc = d if acc is None else acc + d
            pooled = acc if pooled is None else jnp.maximum(pooled, acc)
    # bias + ReLU after the max (both monotone -> identical to relu-then-pool)
    y = jnp.maximum(pooled + b_ref[...], 0.0)
    o_ref[...] = y.astype(o_ref.dtype)


def conv5x5_relu_pool(x_nhwc, w_k, bias_p):
    """x:[N,H,W,Cin] -> pooled activations [N, (H//2)*(W//2), 128] bf16."""
    N, H, W, Cin = x_nhwc.shape
    KH = KW = 5
    H2, W2 = H // 2, W // 2
    Hp = H + KH - 1                     # padded height (pad=2 on both sides)
    Cp = w_k.shape[-1]

    # --- XLA prep on tiny tensors: pad, width-only (5x) im2col, parity order ---
    xp = jnp.pad(x_nhwc, ((0, 0), (2, 2), (2, 2), (0, 0)))
    xw = jnp.stack([xp[:, :, kw:kw + W, :] for kw in range(KW)], axis=3)
    # (n, hp, w, kw, ci) -> (n, p, dx, q, w2, kw, ci) -> flat rows
    xw = xw.reshape(N, Hp // 2, 2, W2, 2, KW, Cin)
    xw = jnp.transpose(xw, (0, 2, 4, 1, 3, 5, 6))
    R = 4 * (Hp // 2) * W2
    xw = xw.reshape(N, R, KW * Cin).astype(jnp.bfloat16)

    kernel = partial(_conv_relu_pool_kernel, H2=H2, W2=W2, KH=KH)
    return pl.pallas_call(
        kernel,
        out_shape=jax.ShapeDtypeStruct((N, H2 * W2, Cp), jnp.bfloat16),
        grid_spec=pltpu.PrefetchScalarGridSpec(
            num_scalar_prefetch=0,
            grid=(N,),                                   # >=2 -> both TCs on v7x
            in_specs=[
                pl.BlockSpec((None, R, KW * Cin), lambda n: (n, 0, 0)),
                pl.BlockSpec((KH, KW * Cin, Cp), lambda n: (0, 0, 0)),
                pl.BlockSpec((1, Cp), lambda n: (0, 0)),
            ],
            out_specs=pl.BlockSpec((None, H2 * W2, Cp), lambda n: (n, 0, 0)),
        ),
        compiler_params=pltpu.CompilerParams(
            dimension_semantics=("parallel",),
            vmem_limit_bytes=32 * 1024 * 1024,
        ),
    )(xw, w_k, bias_p)


# ---------------------------------------------------------------------------
# Kernel 2: tiled Linear (x @ w + b), K-reduction with f32 VMEM accumulator
# ---------------------------------------------------------------------------
def _linear_kernel(x_ref, w_ref, b_ref, o_ref, acc_ref):
    k = pl.program_id(1)

    @pl.when(k == 0)
    def _():
        acc_ref[...] = jnp.zeros_like(acc_ref)

    acc_ref[...] += jnp.dot(x_ref[...], w_ref[...],
                            preferred_element_type=jnp.float32)

    @pl.when(k == pl.num_programs(1) - 1)
    def _():
        o_ref[...] = (acc_ref[...] + b_ref[...]).astype(o_ref.dtype)


def linear_bias(x, w, b, *, tn=128, tk=512):
    """y = x @ w + b.  x:[M,K] bf16, w:[K,N] bf16, b:[1,N] f32 -> [M,N] f32."""
    M, K = x.shape
    Kw, N = w.shape
    assert K == Kw
    if N % tn != 0:
        tn = N
    if K % tk != 0:
        tk = 256 if K % 256 == 0 else K
    grid = (N // tn, K // tk)
    return pl.pallas_call(
        _linear_kernel,
        out_shape=jax.ShapeDtypeStruct((M, N), jnp.float32),
        grid_spec=pltpu.PrefetchScalarGridSpec(
            num_scalar_prefetch=0,
            grid=grid,
            in_specs=[
                pl.BlockSpec((M, tk), lambda j, k: (0, k)),
                pl.BlockSpec((tk, tn), lambda j, k: (k, j)),
                pl.BlockSpec((1, tn), lambda j, k: (0, j)),
            ],
            out_specs=pl.BlockSpec((M, tn), lambda j, k: (0, j)),
            scratch_shapes=[pltpu.VMEM((M, tn), jnp.float32)],
        ),
        compiler_params=pltpu.CompilerParams(
            dimension_semantics=("parallel", "arbitrary"),
            vmem_limit_bytes=32 * 1024 * 1024,
        ),
    )(x, w, b)


# ---------------------------------------------------------------------------
# Parameters (torch layouts) and one-time packing into kernel layouts
# ---------------------------------------------------------------------------
def init_params(key, input_dim):
    k1, k2, k3, k4, k5, k6 = jax.random.split(key, 6)
    cnn_out = C2 * (input_dim // 4) * (input_dim // 4)
    return {
        "conv1_w": 0.10 * jax.random.normal(k1, (C1, 1, 5, 5), jnp.float32),
        "conv1_b": 0.10 * jax.random.normal(k2, (C1,), jnp.float32),
        "conv2_w": 0.05 * jax.random.normal(k3, (C2, C1, 5, 5), jnp.float32),
        "conv2_b": 0.05 * jax.random.normal(k4, (C2,), jnp.float32),
        # torch nn.Linear weight is [out_features, in_features]
        "lin_w": 0.02 * jax.random.normal(k5, (input_dim * input_dim, cnn_out), jnp.float32),
        "lin_b": 0.02 * jax.random.normal(k6, (input_dim * input_dim,), jnp.float32),
    }


def _pack_conv(w_oihw, bias):
    cout, cin, kh, kw = w_oihw.shape
    wk = jnp.transpose(w_oihw, (2, 3, 1, 0)).reshape(kh, kw * cin, cout)
    wk = jnp.pad(wk, ((0, 0), (0, 0), (0, LANE - cout))).astype(jnp.bfloat16)
    bp = jnp.pad(bias, (0, LANE - cout)).reshape(1, LANE).astype(jnp.float32)
    return wk, bp


def prepare_params(params, input_dim):
    """One-time packing: folds all transposes, channel padding and the NCHW
    flatten permutation into the weights so the forward pass has none."""
    d4 = input_dim // 4
    w1, b1 = _pack_conv(params["conv1_w"], params["conv1_b"])
    w2, b2 = _pack_conv(params["conv2_w"], params["conv2_b"])
    out_f = params["lin_w"].shape[0]
    # torch in_features are ordered (c, h, w); re-order rows to (h, w, c) and
    # zero-pad c: C2 -> 128 so the conv2 output flattens straight into it.
    wl = params["lin_w"].T.reshape(C2, d4 * d4, out_f)    # (c, s, out)
    wl = jnp.transpose(wl, (1, 0, 2))                     # (s, c, out)
    wl = jnp.pad(wl, ((0, 0), (0, LANE - C2), (0, 0)))
    wl = wl.reshape(d4 * d4 * LANE, out_f).astype(jnp.bfloat16)
    bl = params["lin_b"].reshape(1, out_f).astype(jnp.float32)
    return {"w1": w1, "b1": b1, "w2": w2, "b2": b2, "wl": wl, "bl": bl}


# ---------------------------------------------------------------------------
# Forward pass
# ---------------------------------------------------------------------------
def cnn_forward(p, x_nchw):
    N, Cin, H, W = x_nchw.shape
    x = x_nchw.reshape(N, H, W, Cin)                 # NCHW->NHWC is a pure reshape (Cin==1)

    y = conv5x5_relu_pool(x, p["w1"], p["b1"])       # [N, (H/2)(W/2), 128] bf16
    y = y.reshape(N, H // 2, W // 2, LANE)[..., :C1]  # keep the 16 real channels
    y = conv5x5_relu_pool(y, p["w2"], p["b2"])       # [N, (H/4)(W/4), 128] bf16

    act = y.reshape(N, (H // 4) * (W // 4) * LANE)   # (h, w, c) flatten incl. zero pad
    return linear_bias(act, p["wl"], p["bl"])        # [N, H*W] f32


if __name__ == "__main__":
    input_dim = 16
    batch = 2

    key = jax.random.PRNGKey(0)
    k_params, k_x = jax.random.split(key)
    raw_params = init_params(k_params, input_dim)
    params = prepare_params(raw_params, input_dim)
    x = jax.random.normal(k_x, (batch, 1, input_dim, input_dim), jnp.float32)

    out = jax.jit(cnn_forward)(params, x)
    out = jax.block_until_ready(out)
    assert out.shape == (batch, input_dim * input_dim), out.shape
    assert out.dtype == jnp.float32
    print("KERNEL_OK")
</pallas_src>

<mosaic_0001>
module attributes {stable_mosaic.version = 11 : i64} {
  func.func @_conv_relu_pool_kernel(%arg0: i32, %arg1: memref<1x320x5xbf16, #tpu.memory_space<vmem>>, %arg2: memref<5x5x128xbf16, #tpu.memory_space<vmem>>, %arg3: memref<1x128xf32, #tpu.memory_space<vmem>>, %arg4: memref<1x64x128xbf16, #tpu.memory_space<vmem>>) attributes {dimension_semantics = [#tpu.dimension_semantics<parallel>], iteration_bounds = array<i64: 2>, scalar_prefetch = 0 : i64, scratch_operands = 0 : i64, tpu.core_type = #tpu.core_type<tc>, window_params = [{transform_indices = @transform_0, window_bounds = array<i64: 1, 320, 5>}, {pipeline_mode = #tpu.pipeline_mode<synchronous>, transform_indices = @transform_1, window_bounds = array<i64: 5, 5, 128>}, {pipeline_mode = #tpu.pipeline_mode<synchronous>, transform_indices = @transform_2, window_bounds = array<i64: 1, 128>}, {transform_indices = @transform_3, window_bounds = array<i64: 1, 64, 128>}]} {
    %c0 = arith.constant 0 : index
    %c0_0 = arith.constant 0 : index
    %c0_1 = arith.constant 0 : index
    %0 = vector.load %arg1[%c0, %c0_0, %c0_1] : memref<1x320x5xbf16, #tpu.memory_space<vmem>>, vector<1x64x5xbf16>
    %1 = vector.shape_cast %0 : vector<1x64x5xbf16> to vector<64x5xbf16>
    %c0_2 = arith.constant 0 : index
    %c0_3 = arith.constant 0 : index
    %c0_4 = arith.constant 0 : index
    %2 = vector.load %arg2[%c0_2, %c0_3, %c0_4] : memref<5x5x128xbf16, #tpu.memory_space<vmem>>, vector<1x5x128xbf16>
    %3 = vector.shape_cast %2 : vector<1x5x128xbf16> to vector<5x128xbf16>
    %cst = arith.constant dense<0.000000e+00> : vector<64x128xf32>
    %4 = tpu.matmul %1, %3, %cst {dimension_numbers = #tpu.dot_dimension_numbers<[1], [0], [0], [1], [0, 0, 1, 1], [], []>} : vector<64x5xbf16>, vector<5x128xbf16>, vector<64x128xf32> -> vector<64x128xf32>
    %c0_5 = arith.constant 0 : index
    %c160 = arith.constant 160 : index
    %c0_6 = arith.constant 0 : index
    %5 = vector.load %arg1[%c0_5, %c160, %c0_6] : memref<1x320x5xbf16, #tpu.memory_space<vmem>>, vector<1x64x5xbf16>
    %6 = vector.shape_cast %5 : vector<1x64x5xbf16> to vector<64x5xbf16>
    %c1 = arith.constant 1 : index
    %c0_7 = arith.constant 0 : index
    %c0_8 = arith.constant 0 : index
    %7 = vector.load %arg2[%c1, %c0_7, %c0_8] : memref<5x5x128xbf16, #tpu.memory_space<vmem>>, vector<1x5x128xbf16>
    %8 = vector.shape_cast %7 : vector<1x5x128xbf16> to vector<5x128xbf16>
    %cst_9 = arith.constant dense<0.000000e+00> : vector<64x128xf32>
    %9 = tpu.matmul %6, %8, %cst_9 {dimension_numbers = #tpu.dot_dimension_numbers<[1], [0], [0], [1], [0, 0, 1, 1], [], []>} : vector<64x5xbf16>, vector<5x128xbf16>, vector<64x128xf32> -> vector<64x128xf32>
    %10 = arith.addf %4, %9 : vector<64x128xf32>
    %c0_10 = arith.constant 0 : index
    %c8 = arith.constant 8 : index
    %c0_11 = arith.constant 0 : index
    %11 = vector.load %arg1[%c0_10, %c8, %c0_11] : memref<1x320x5xbf16, #tpu.memory_space<vmem>>, vector<1x64x5xbf16>
    %12 = vector.shape_cast %11 : vector<1x64x5xbf16> to vector<64x5xbf16>
    %c2 = arith.constant 2 : index
    %c0_12 = arith.constant 0 : index
    %c0_13 = arith.constant 0 : index
    %13 = vector.load %arg2[%c2, %c0_12, %c0_13] : memref<5x5x128xbf16, #tpu.memory_space<vmem>>, vector<1x5x128xbf16>
    %14 = vector.shape_cast %13 : vector<1x5x128xbf16> to vector<5x128xbf16>
    %cst_14 = arith.constant dense<0.000000e+00> : vector<64x128xf32>
    %15 = tpu.matmul %12, %14, %cst_14 {dimension_numbers = #tpu.dot_dimension_numbers<[1], [0], [0], [1], [0, 0, 1, 1], [], []>} : vector<64x5xbf16>, vector<5x128xbf16>, vector<64x128xf32> -> vector<64x128xf32>
    %16 = arith.addf %10, %15 : vector<64x128xf32>
    %c0_15 = arith.constant 0 : index
    %c168 = arith.constant 168 : index
    %c0_16 = arith.constant 0 : index
    %17 = vector.load %arg1[%c0_15, %c168, %c0_16] : memref<1x320x5xbf16, #tpu.memory_space<vmem>>, vector<1x64x5xbf16>
    %18 = vector.shape_cast %17 : vector<1x64x5xbf16> to vector<64x5xbf16>
    %c3 = arith.constant 3 : index
    %c0_17 = arith.constant 0 : index
    %c0_18 = arith.constant 0 : index
    %19 = vector.load %arg2[%c3, %c0_17, %c0_18] : memref<5x5x128xbf16, #tpu.memory_space<vmem>>, vector<1x5x128xbf16>
    %20 = vector.shape_cast %19 : vector<1x5x128xbf16> to vector<5x128xbf16>
    %cst_19 = arith.constant dense<0.000000e+00> : vector<64x128xf32>
    %21 = tpu.matmul %18, %20, %cst_19 {dimension_numbers = #tpu.dot_dimension_numbers<[1], [0], [0], [1], [0, 0, 1, 1], [], []>} : vector<64x5xbf16>, vector<5x128xbf16>, vector<64x128xf32> -> vector<64x128xf32>
    %22 = arith.addf %16, %21 : vector<64x128xf32>
    %c0_20 = arith.constant 0 : index
    %c16 = arith.constant 16 : index
    %c0_21 = arith.constant 0 : index
    %23 = vector.load %arg1[%c0_20, %c16, %c0_21] : memref<1x320x5xbf16, #tpu.memory_space<vmem>>, vector<1x64x5xbf16>
    %24 = vector.shape_cast %23 : vector<1x64x5xbf16> to vector<64x5xbf16>
    %c4 = arith.constant 4 : index
    %c0_22 = arith.constant 0 : index
    %c0_23 = arith.constant 0 : index
    %25 = vector.load %arg2[%c4, %c0_22, %c0_23] : memref<5x5x128xbf16, #tpu.memory_space<vmem>>, vector<1x5x128xbf16>
    %26 = vector.shape_cast %25 : vector<1x5x128xbf16> to vector<5x128xbf16>
    %cst_24 = arith.constant dense<0.000000e+00> : vector<64x128xf32>
    %27 = tpu.matmul %24, %26, %cst_24 {dimension_numbers = #tpu.dot_dimension_numbers<[1], [0], [0], [1], [0, 0, 1, 1], [], []>} : vector<64x5xbf16>, vector<5x128xbf16>, vector<64x128xf32> -> vector<64x128xf32>
    %28 = arith.addf %22, %27 : vector<64x128xf32>
    %c0_25 = arith.constant 0 : index
    %c80 = arith.constant 80 : index
    %c0_26 = arith.constant 0 : index
    %29 = vector.load %arg1[%c0_25, %c80, %c0_26] : memref<1x320x5xbf16, #tpu.memory_space<vmem>>, vector<1x64x5xbf16>
    %30 = vector.shape_cast %29 : vector<1x64x5xbf16> to vector<64x5xbf16>
    %c0_27 = arith.constant 0 : index
    %c0_28 = arith.constant 0 : index
    %c0_29 = arith.constant 0 : index
    %31 = vector.load %arg2[%c0_27, %c0_28, %c0_29] : memref<5x5x128xbf16, #tpu.memory_space<vmem>>, vector<1x5x128xbf16>
    %32 = vector.shape_cast %31 : vector<1x5x128xbf16> to vector<5x128xbf16>
    %cst_30 = arith.constant dense<0.000000e+00> : vector<64x128xf32>
    %33 = tpu.matmul %30, %32, %cst_30 {dimension_numbers = #tpu.dot_dimension_numbers<[1], [0], [0], [1], [0, 0, 1, 1], [], []>} : vector<64x5xbf16>, vector<5x128xbf16>, vector<64x128xf32> -> vector<64x128xf32>
    %c0_31 = arith.constant 0 : index
    %c240 = arith.constant 240 : index
    %c0_32 = arith.constant 0 : index
    %34 = vector.load %arg1[%c0_31, %c240, %c0_32] : memref<1x320x5xbf16, #tpu.memory_space<vmem>>, vector<1x64x5xbf16>
    %35 = vector.shape_cast %34 : vector<1x64x5xbf16> to vector<64x5xbf16>
    %c1_33 = arith.constant 1 : index
    %c0_34 = arith.constant 0 : index
    %c0_35 = arith.constant 0 : index
    %36 = vector.load %arg2[%c1_33, %c0_34, %c0_35] : memref<5x5x128xbf16, #tpu.memory_space<vmem>>, vector<1x5x128xbf16>
    %37 = vector.shape_cast %36 : vector<1x5x128xbf16> to vector<5x128xbf16>
    %cst_36 = arith.constant dense<0.000000e+00> : vector<64x128xf32>
    %38 = tpu.matmul %35, %37, %cst_36 {dimension_numbers = #tpu.dot_dimension_numbers<[1], [0], [0], [1], [0, 0, 1, 1], [], []>} : vector<64x5xbf16>, vector<5x128xbf16>, vector<64x128xf32> -> vector<64x128xf32>
    %39 = arith.addf %33, %38 : vector<64x128xf32>
    %c0_37 = arith.constant 0 : index
    %c88 = arith.constant 88 : index
    %c0_38 = arith.constant 0 : index
    %40 = vector.load %arg1[%c0_37, %c88, %c0_38] : memref<1x320x5xbf16, #tpu.memory_space<vmem>>, vector<1x64x5xbf16>
    %41 = vector.shape_cast %40 : vector<1x64x5xbf16> to vector<64x5xbf16>
    %c2_39 = arith.constant 2 : index
    %c0_40 = arith.constant 0 : index
    %c0_41 = arith.constant 0 : index
    %42 = vector.load %arg2[%c2_39, %c0_40, %c0_41] : memref<5x5x128xbf16, #tpu.memory_space<vmem>>, vector<1x5x128xbf16>
    %43 = vector.shape_cast %42 : vector<1x5x128xbf16> to vector<5x128xbf16>
    %cst_42 = arith.constant dense<0.000000e+00> : vector<64x128xf32>
    %44 = tpu.matmul %41, %43, %cst_42 {dimension_numbers = #tpu.dot_dimension_numbers<[1], [0], [0], [1], [0, 0, 1, 1], [], []>} : vector<64x5xbf16>, vector<5x128xbf16>, vector<64x128xf32> -> vector<64x128xf32>
    %45 = arith.addf %39, %44 : vector<64x128xf32>
    %c0_43 = arith.constant 0 : index
    %c248 = arith.constant 248 : index
    %c0_44 = arith.constant 0 : index
    %46 = vector.load %arg1[%c0_43, %c248, %c0_44] : memref<1x320x5xbf16, #tpu.memory_space<vmem>>, vector<1x64x5xbf16>
    %47 = vector.shape_cast %46 : vector<1x64x5xbf16> to vector<64x5xbf16>
    %c3_45 = arith.constant 3 : index
    %c0_46 = arith.constant 0 : index
    %c0_47 = arith.constant 0 : index
    %48 = vector.load %arg2[%c3_45, %c0_46, %c0_47] : memref<5x5x128xbf16, #tpu.memory_space<vmem>>, vector<1x5x128xbf16>
    %49 = vector.shape_cast %48 : vector<1x5x128xbf16> to vector<5x128xbf16>
    %cst_48 = arith.constant dense<0.000000e+00> : vector<64x128xf32>
    %50 = tpu.matmul %47, %49, %cst_48 {dimension_numbers = #tpu.dot_dimension_numbers<[1], [0], [0], [1], [0, 0, 1, 1], [], []>} : vector<64x5xbf16>, vector<5x128xbf16>, vector<64x128xf32> -> vector<64x128xf32>
    %51 = arith.addf %45, %50 : vector<64x128xf32>
    %c0_49 = arith.constant 0 : index
    %c96 = arith.constant 96 : index
    %c0_50 = arith.constant 0 : index
    %52 = vector.load %arg1[%c0_49, %c96, %c0_50] : memref<1x320x5xbf16, #tpu.memory_space<vmem>>, vector<1x64x5xbf16>
    %53 = vector.shape_cast %52 : vector<1x64x5xbf16> to vector<64x5xbf16>
    %c4_51 = arith.constant 4 : index
    %c0_52 = arith.constant 0 : index
    %c0_53 = arith.constant 0 : index
    %54 = vector.load %arg2[%c4_51, %c0_52, %c0_53] : memref<5x5x128xbf16, #tpu.memory_space<vmem>>, vector<1x5x128xbf16>
    %55 = vector.shape_cast %54 : vector<1x5x128xbf16> to vector<5x128xbf16>
    %cst_54 = arith.constant dense<0.000000e+00> : vector<64x128xf32>
    %56 = tpu.matmul %53, %55, %cst_54 {dimension_numbers = #tpu.dot_dimension_numbers<[1], [0], [0], [1], [0, 0, 1, 1], [], []>} : vector<64x5xbf16>, vector<5x128xbf16>, vector<64x128xf32> -> vector<64x128xf32>
    %57 = arith.addf %51, %56 : vector<64x128xf32>
    %58 = arith.maximumf %28, %57 : vector<64x128xf32>
    %c0_55 = arith.constant 0 : index
    %c160_56 = arith.constant 160 : index
    %c0_57 = arith.constant 0 : index
    %59 = vector.load %arg1[%c0_55, %c160_56, %c0_57] : memref<1x320x5xbf16, #tpu.memory_space<vmem>>, vector<1x64x5xbf16>
    %60 = vector.shape_cast %59 : vector<1x64x5xbf16> to vector<64x5xbf16>
    %c0_58 = arith.constant 0 : index
    %c0_59 = arith.constant 0 : index
    %c0_60 = arith.constant 0 : index
    %61 = vector.load %arg2[%c0_58, %c0_59, %c0_60] : memref<5x5x128xbf16, #tpu.memory_space<vmem>>, vector<1x5x128xbf16>
    %62 = vector.shape_cast %61 : vector<1x5x128xbf16> to vector<5x128xbf16>
    %cst_61 = arith.constant dense<0.000000e+00> : vector<64x128xf32>
    %63 = tpu.matmul %60, %62, %cst_61 {dimension_numbers = #tpu.dot_dimension_numbers<[1], [0], [0], [1], [0, 0, 1, 1], [], []>} : vector<64x5xbf16>, vector<5x128xbf16>, vector<64x128xf32> -> vector<64x128xf32>
    %c0_62 = arith.constant 0 : index
    %c8_63 = arith.constant 8 : index
    %c0_64 = arith.constant 0 : index
    %64 = vector.load %arg1[%c0_62, %c8_63, %c0_64] : memref<1x320x5xbf16, #tpu.memory_space<vmem>>, vector<1x64x5xbf16>
    %65 = vector.shape_cast %64 : vector<1x64x5xbf16> to vector<64x5xbf16>
    %c1_65 = arith.constant 1 : index
    %c0_66 = arith.constant 0 : index
    %c0_67 = arith.constant 0 : index
    %66 = vector.load %arg2[%c1_65, %c0_66, %c0_67] : memref<5x5x128xbf16, #tpu.memory_space<vmem>>, vector<1x5x128xbf16>
    %67 = vector.shape_cast %66 : vector<1x5x128xbf16> to vector<5x128xbf16>
    %cst_68 = arith.constant dense<0.000000e+00> : vector<64x128xf32>
    %68 = tpu.matmul %65, %67, %cst_68 {dimension_numbers = #tpu.dot_dimension_numbers<[1], [0], [0], [1], [0, 0, 1, 1], [], []>} : vector<64x5xbf16>, vector<5x128xbf16>, vector<64x128xf32> -> vector<64x128xf32>
    %69 = arith.addf %63, %68 : vector<64x128xf32>
    %c0_69 = arith.constant 0 : index
    %c168_70 = arith.constant 168 : index
    %c0_71 = arith.constant 0 : index
    %70 = vector.load %arg1[%c0_69, %c168_70, %c0_71] : memref<1x320x5xbf16, #tpu.memory_space<vmem>>, vector<1x64x5xbf16>
    %71 = vector.shape_cast %70 : vector<1x64x5xbf16> to vector<64x5xbf16>
    %c2_72 = arith.constant 2 : index
    %c0_73 = arith.constant 0 : index
    %c0_74 = arith.constant 0 : index
    %72 = vector.load %arg2[%c2_72, %c0_73, %c0_74] : memref<5x5x128xbf16, #tpu.memory_space<vmem>>, vector<1x5x128xbf16>
    %73 = vector.shape_cast %72 : vector<1x5x128xbf16> to vector<5x128xbf16>
    %cst_75 = arith.constant dense<0.000000e+00> : vector<64x128xf32>
    %74 = tpu.matmul %71, %73, %cst_75 {dimension_numbers = #tpu.dot_dimension_numbers<[1], [0], [0], [1], [0, 0, 1, 1], [], []>} : vector<64x5xbf16>, vector<5x128xbf16>, vector<64x128xf32> -> vector<64x128xf32>
    %75 = arith.addf %69, %74 : vector<64x128xf32>
    %c0_76 = arith.constant 0 : index
    %c16_77 = arith.constant 16 : index
    %c0_78 = arith.constant 0 : index
    %76 = vector.load %arg1[%c0_76, %c16_77, %c0_78] : memref<1x320x5xbf16, #tpu.memory_space<vmem>>, vector<1x64x5xbf16>
    %77 = vector.shape_cast %76 : vector<1x64x5xbf16> to vector<64x5xbf16>
    %c3_79 = arith.constant 3 : index
    %c0_80 = arith.constant 0 : index
    %c0_81 = arith.constant 0 : index
    %78 = vector.load %arg2[%c3_79, %c0_80, %c0_81] : memref<5x5x128xbf16, #tpu.memory_space<vmem>>, vector<1x5x128xbf16>
    %79 = vector.shape_cast %78 : vector<1x5x128xbf16> to vector<5x128xbf16>
    %cst_82 = arith.constant dense<0.000000e+00> : vector<64x128xf32>
    %80 = tpu.matmul %77, %79, %cst_82 {dimension_numbers = #tpu.dot_dimension_numbers<[1], [0], [0], [1], [0, 0, 1, 1], [], []>} : vector<64x5xbf16>, vector<5x128xbf16>, vector<64x128xf32> -> vector<64x128xf32>
    %81 = arith.addf %75, %80 : vector<64x128xf32>
    %c0_83 = arith.constant 0 : index
    %c176 = arith.constant 176 : index
    %c0_84 = arith.constant 0 : index
    %82 = vector.load %arg1[%c0_83, %c176, %c0_84] : memref<1x320x5xbf16, #tpu.memory_space<vmem>>, vector<1x64x5xbf16>
    %83 = vector.shape_cast %82 : vector<1x64x5xbf16> to vector<64x5xbf16>
    %c4_85 = arith.constant 4 : index
    %c0_86 = arith.constant 0 : index
    %c0_87 = arith.constant 0 : index
    %84 = vector.load %arg2[%c4_85, %c0_86, %c0_87] : memref<5x5x128xbf16, #tpu.memory_space<vmem>>, vector<1x5x128xbf16>
    %85 = vector.shape_cast %84 : vector<1x5x128xbf16> to vector<5x128xbf16>
    %cst_88 = arith.constant dense<0.000000e+00> : vector<64x128xf32>
    %86 = tpu.matmul %83, %85, %cst_88 {dimension_numbers = #tpu.dot_dimension_numbers<[1], [0], [0], [1], [0, 0, 1, 1], [], []>} : vector<64x5xbf16>, vector<5x128xbf16>, vector<64x128xf32> -> vector<64x128xf32>
    %87 = arith.addf %81, %86 : vector<64x128xf32>
    %88 = arith.maximumf %58, %87 : vector<64x128xf32>
    %c0_89 = arith.constant 0 : index
    %c240_90 = arith.constant 240 : index
    %c0_91 = arith.constant 0 : index
    %89 = vector.load %arg1[%c0_89, %c240_90, %c0_91] : memref<1x320x5xbf16, #tpu.memory_space<vmem>>, vector<1x64x5xbf16>
    %90 = vector.shape_cast %89 : vector<1x64x5xbf16> to vector<64x5xbf16>
    %c0_92 = arith.constant 0 : index
    %c0_93 = arith.constant 0 : index
    %c0_94 = arith.constant 0 : index
    %91 = vector.load %arg2[%c0_92, %c0_93, %c0_94] : memref<5x5x128xbf16, #tpu.memory_space<vmem>>, vector<1x5x128xbf16>
    %92 = vector.shape_cast %91 : vector<1x5x128xbf16> to vector<5x128xbf16>
    %cst_95 = arith.constant dense<0.000000e+00> : vector<64x128xf32>
    %93 = tpu.matmul %90, %92, %cst_95 {dimension_numbers = #tpu.dot_dimension_numbers<[1], [0], [0], [1], [0, 0, 1, 1], [], []>} : vector<64x5xbf16>, vector<5x128xbf16>, vector<64x128xf32> -> vector<64x128xf32>
    %c0_96 = arith.constant 0 : index
    %c88_97 = arith.constant 88 : index
    %c0_98 = arith.constant 0 : index
    %94 = vector.load %arg1[%c0_96, %c88_97, %c0_98] : memref<1x320x5xbf16, #tpu.memory_space<vmem>>, vector<1x64x5xbf16>
    %95 = vector.shape_cast %94 : vector<1x64x5xbf16> to vector<64x5xbf16>
    %c1_99 = arith.constant 1 : index
    %c0_100 = arith.constant 0 : index
    %c0_101 = arith.constant 0 : index
    %96 = vector.load %arg2[%c1_99, %c0_100, %c0_101] : memref<5x5x128xbf16, #tpu.memory_space<vmem>>, vector<1x5x128xbf16>
    %97 = vector.shape_cast %96 : vector<1x5x128xbf16> to vector<5x128xbf16>
    %cst_102 = arith.constant dense<0.000000e+00> : vector<64x128xf32>
    %98 = tpu.matmul %95, %97, %cst_102 {dimension_numbers = #tpu.dot_dimension_numbers<[1], [0], [0], [1], [0, 0, 1, 1], [], []>} : vector<64x5xbf16>, vector<5x128xbf16>, vector<64x128xf32> -> vector<64x128xf32>
    %99 = arith.addf %93, %98 : vector<64x128xf32>
    %c0_103 = arith.constant 0 : index
    %c248_104 = arith.constant 248 : index
    %c0_105 = arith.constant 0 : index
    %100 = vector.load %arg1[%c0_103, %c248_104, %c0_105] : memref<1x320x5xbf16, #tpu.memory_space<vmem>>, vector<1x64x5xbf16>
    %101 = vector.shape_cast %100 : vector<1x64x5xbf16> to vector<64x5xbf16>
    %c2_106 = arith.constant 2 : index
    %c0_107 = arith.constant 0 : index
    %c0_108 = arith.constant 0 : index
    %102 = vector.load %arg2[%c2_106, %c0_107, %c0_108] : memref<5x5x128xbf16, #tpu.memory_space<vmem>>, vector<1x5x128xbf16>
    %103 = vector.shape_cast %102 : vector<1x5x128xbf16> to vector<5x128xbf16>
    %cst_109 = arith.constant dense<0.000000e+00> : vector<64x128xf32>
    %104 = tpu.matmul %101, %103, %cst_109 {dimension_numbers = #tpu.dot_dimension_numbers<[1], [0], [0], [1], [0, 0, 1, 1], [], []>} : vector<64x5xbf16>, vector<5x128xbf16>, vector<64x128xf32> -> vector<64x128xf32>
    %105 = arith.addf %99, %104 : vector<64x128xf32>
    %c0_110 = arith.constant 0 : index
    %c96_111 = arith.constant 96 : index
    %c0_112 = arith.constant 0 : index
    %106 = vector.load %arg1[%c0_110, %c96_111, %c0_112] : memref<1x320x5xbf16, #tpu.memory_space<vmem>>, vector<1x64x5xbf16>
    %107 = vector.shape_cast %106 : vector<1x64x5xbf16> to vector<64x5xbf16>
    %c3_113 = arith.constant 3 : index
    %c0_114 = arith.constant 0 : index
    %c0_115 = arith.constant 0 : index
    %108 = vector.load %arg2[%c3_113, %c0_114, %c0_115] : memref<5x5x128xbf16, #tpu.memory_space<vmem>>, vector<1x5x128xbf16>
    %109 = vector.shape_cast %108 : vector<1x5x128xbf16> to vector<5x128xbf16>
    %cst_116 = arith.constant dense<0.000000e+00> : vector<64x128xf32>
    %110 = tpu.matmul %107, %109, %cst_116 {dimension_numbers = #tpu.dot_dimension_numbers<[1], [0], [0], [1], [0, 0, 1, 1], [], []>} : vector<64x5xbf16>, vector<5x128xbf16>, vector<64x128xf32> -> vector<64x128xf32>
    %111 = arith.addf %105, %110 : vector<64x128xf32>
    %c0_117 = arith.constant 0 : index
    %c256 = arith.constant 256 : index
    %c0_118 = arith.constant 0 : index
    %112 = vector.load %arg1[%c0_117, %c256, %c0_118] : memref<1x320x5xbf16, #tpu.memory_space<vmem>>, vector<1x64x5xbf16>
    %113 = vector.shape_cast %112 : vector<1x64x5xbf16> to vector<64x5xbf16>
    %c4_119 = arith.constant 4 : index
    %c0_120 = arith.constant 0 : index
    %c0_121 = arith.constant 0 : index
    %114 = vector.load %arg2[%c4_119, %c0_120, %c0_121] : memref<5x5x128xbf16, #tpu.memory_space<vmem>>, vector<1x5x128xbf16>
    %115 = vector.shape_cast %114 : vector<1x5x128xbf16> to vector<5x128xbf16>
    %cst_122 = arith.constant dense<0.000000e+00> : vector<64x128xf32>
    %116 = tpu.matmul %113, %115, %cst_122 {dimension_numbers = #tpu.dot_dimension_numbers<[1], [0], [0], [1], [0, 0, 1, 1], [], []>} : vector<64x5xbf16>, vector<5x128xbf16>, vector<64x128xf32> -> vector<64x128xf32>
    %117 = arith.addf %111, %116 : vector<64x128xf32>
    %118 = arith.maximumf %88, %117 : vector<64x128xf32>
    %c0_123 = arith.constant 0 : index
    %c0_124 = arith.constant 0 : index
    %119 = vector.load %arg3[%c0_123, %c0_124] : memref<1x128xf32, #tpu.memory_space<vmem>>, vector<1x128xf32>
    %120 = vector.broadcast %119 : vector<1x128xf32> to vector<64x128xf32>
    %121 = arith.addf %118, %120 : vector<64x128xf32>
    %cst_125 = arith.constant 0.000000e+00 : f32
    %122 = vector.broadcast %cst_125 : f32 to vector<64x128xf32>
    %123 = arith.maximumf %121, %122 : vector<64x128xf32>
    %124 = arith.truncf %123 : vector<64x128xf32> to vector<64x128xbf16>
    %c0_126 = arith.constant 0 : index
    %c0_127 = arith.constant 0 : index
    %c0_128 = arith.constant 0 : index
    %125 = vector.load %arg4[%c0_126, %c0_127, %c0_128] : memref<1x64x128xbf16, #tpu.memory_space<vmem>>, vector<1x64x128xbf16>
    %126 = vector.shape_cast %125 : vector<1x64x128xbf16> to vector<64x128xbf16>
    %127 = vector.shape_cast %124 : vector<64x128xbf16> to vector<1x64x128xbf16>
    tpu.vector_store %arg4[%c0_126, %c0_127, %c0_128], %127 {strides = array<i32>} : memref<1x64x128xbf16, #tpu.memory_space<vmem>>, vector<1x64x128xbf16>,
    return
  }
  func.func @transform_0(%arg0: i32) -> (i32, i32, i32) {
    %c0_i32 = arith.constant 0 : i32
    %c0_i32_0 = arith.constant 0 : i32
    %c0_i32_1 = arith.constant 0 : i32
    return %arg0, %c0_i32, %c0_i32_0 : i32, i32, i32
  }
  func.func @transform_1(%arg0: i32) -> (i32, i32, i32) {
    %c0_i32 = arith.constant 0 : i32
    %c0_i32_0 = arith.constant 0 : i32
    %c0_i32_1 = arith.constant 0 : i32
    %c0_i32_2 = arith.constant 0 : i32
    return %c0_i32, %c0_i32_0, %c0_i32_1 : i32, i32, i32
  }
  func.func @transform_2(%arg0: i32) -> (i32, i32) {
    %c0_i32 = arith.constant 0 : i32
    %c0_i32_0 = arith.constant 0 : i32
    %c0_i32_1 = arith.constant 0 : i32
    return %c0_i32, %c0_i32_0 : i32, i32
  }
  func.func @transform_3(%arg0: i32) -> (i32, i32, i32) {
    %c0_i32 = arith.constant 0 : i32
    %c0_i32_0 = arith.constant 0 : i32
    %c0_i32_1 = arith.constant 0 : i32
    return %arg0, %c0_i32, %c0_i32_0 : i32, i32, i32
  }
}

module attributes {stable_mosaic.version = 11 : i64} {
  func.func @_conv_relu_pool_kernel(%arg0: i32, %arg1: memref<1x96x80xbf16, #tpu.memory_space<vmem>>, %arg2: memref<5x80x128xbf16, #tpu.memory_space<vmem>>, %arg3: memref<1x128xf32, #tpu.memory_space<vmem>>, %arg4: memref<1x16x128xbf16, #tpu.memory_space<vmem>>) attributes {dimension_semantics = [#tpu.dimension_semantics<parallel>], iteration_bounds = array<i64: 2>, scalar_prefetch = 0 : i64, scratch_operands = 0 : i64, tpu.core_type = #tpu.core_type<tc>, window_params = [{transform_indices = @transform_0, window_bounds = array<i64: 1, 96, 80>}, {pipeline_mode = #tpu.pipeline_mode<synchronous>, transform_indices = @transform_1, window_bounds = array<i64: 5, 80, 128>}, {pipeline_mode = #tpu.pipeline_mode<synchronous>, transform_indices = @transform_2, window_bounds = array<i64: 1, 128>}, {transform_indices = @transform_3, window_bounds = array<i64: 1, 16, 128>}]} {
    %c0 = arith.constant 0 : index
    %c0_0 = arith.constant 0 : index
    %c0_1 = arith.constant 0 : index
    %0 = vector.load %arg1[%c0, %c0_0, %c0_1] : memref<1x96x80xbf16, #tpu.memory_space<vmem>>, vector<1x16x80xbf16>
    %1 = vector.shape_cast %0 : vector<1x16x80xbf16> to vector<16x80xbf16>
    %c0_2 = arith.constant 0 : index
    %c0_3 = arith.constant 0 : index
    %c0_4 = arith.constant 0 : index
    %2 = vector.load %arg2[%c0_2, %c0_3, %c0_4] : memref<5x80x128xbf16, #tpu.memory_space<vmem>>, vector<1x80x128xbf16>
    %3 = vector.shape_cast %2 : vector<1x80x128xbf16> to vector<80x128xbf16>
    %cst = arith.constant dense<0.000000e+00> : vector<16x128xf32>
    %4 = tpu.matmul %1, %3, %cst {dimension_numbers = #tpu.dot_dimension_numbers<[1], [0], [0], [1], [0, 0, 1, 1], [], []>} : vector<16x80xbf16>, vector<80x128xbf16>, vector<16x128xf32> -> vector<16x128xf32>
    %c0_5 = arith.constant 0 : index
    %c48 = arith.constant 48 : index
    %c0_6 = arith.constant 0 : index
    %5 = vector.load %arg1[%c0_5, %c48, %c0_6] : memref<1x96x80xbf16, #tpu.memory_space<vmem>>, vector<1x16x80xbf16>
    %6 = vector.shape_cast %5 : vector<1x16x80xbf16> to vector<16x80xbf16>
    %c1 = arith.constant 1 : index
    %c0_7 = arith.constant 0 : index
    %c0_8 = arith.constant 0 : index
    %7 = vector.load %arg2[%c1, %c0_7, %c0_8] : memref<5x80x128xbf16, #tpu.memory_space<vmem>>, vector<1x80x128xbf16>
    %8 = vector.shape_cast %7 : vector<1x80x128xbf16> to vector<80x128xbf16>
    %cst_9 = arith.constant dense<0.000000e+00> : vector<16x128xf32>
    %9 = tpu.matmul %6, %8, %cst_9 {dimension_numbers = #tpu.dot_dimension_numbers<[1], [0], [0], [1], [0, 0, 1, 1], [], []>} : vector<16x80xbf16>, vector<80x128xbf16>, vector<16x128xf32> -> vector<16x128xf32>
    %10 = arith.addf %4, %9 : vector<16x128xf32>
    %c0_10 = arith.constant 0 : index
    %c4 = arith.constant 4 : index
    %c0_11 = arith.constant 0 : index
    %11 = vector.load %arg1[%c0_10, %c4, %c0_11] : memref<1x96x80xbf16, #tpu.memory_space<vmem>>, vector<1x16x80xbf16>
    %12 = vector.shape_cast %11 : vector<1x16x80xbf16> to vector<16x80xbf16>
    %c2 = arith.constant 2 : index
    %c0_12 = arith.constant 0 : index
    %c0_13 = arith.constant 0 : index
    %13 = vector.load %arg2[%c2, %c0_12, %c0_13] : memref<5x80x128xbf16, #tpu.memory_space<vmem>>, vector<1x80x128xbf16>
    %14 = vector.shape_cast %13 : vector<1x80x128xbf16> to vector<80x128xbf16>
    %cst_14 = arith.constant dense<0.000000e+00> : vector<16x128xf32>
    %15 = tpu.matmul %12, %14, %cst_14 {dimension_numbers = #tpu.dot_dimension_numbers<[1], [0], [0], [1], [0, 0, 1, 1], [], []>} : vector<16x80xbf16>, vector<80x128xbf16>, vector<16x128xf32> -> vector<16x128xf32>
    %16 = arith.addf %10, %15 : vector<16x128xf32>
    %c0_15 = arith.constant 0 : index
    %c52 = arith.constant 52 : index
    %c0_16 = arith.constant 0 : index
    %17 = vector.load %arg1[%c0_15, %c52, %c0_16] : memref<1x96x80xbf16, #tpu.memory_space<vmem>>, vector<1x16x80xbf16>
    %18 = vector.shape_cast %17 : vector<1x16x80xbf16> to vector<16x80xbf16>
    %c3 = arith.constant 3 : index
    %c0_17 = arith.constant 0 : index
    %c0_18 = arith.constant 0 : index
    %19 = vector.load %arg2[%c3, %c0_17, %c0_18] : memref<5x80x128xbf16, #tpu.memory_space<vmem>>, vector<1x80x128xbf16>
    %20 = vector.shape_cast %19 : vector<1x80x128xbf16> to vector<80x128xbf16>
    %cst_19 = arith.constant dense<0.000000e+00> : vector<16x128xf32>
    %21 = tpu.matmul %18, %20, %cst_19 {dimension_numbers = #tpu.dot_dimension_numbers<[1], [0], [0], [1], [0, 0, 1, 1], [], []>} : vector<16x80xbf16>, vector<80x128xbf16>, vector<16x128xf32> -> vector<16x128xf32>
    %22 = arith.addf %16, %21 : vector<16x128xf32>
    %c0_20 = arith.constant 0 : index
    %c8 = arith.constant 8 : index
    %c0_21 = arith.constant 0 : index
    %23 = vector.load %arg1[%c0_20, %c8, %c0_21] : memref<1x96x80xbf16, #tpu.memory_space<vmem>>, vector<1x16x80xbf16>
    %24 = vector.shape_cast %23 : vector<1x16x80xbf16> to vector<16x80xbf16>
    %c4_22 = arith.constant 4 : index
    %c0_23 = arith.constant 0 : index
    %c0_24 = arith.constant 0 : index
    %25 = vector.load %arg2[%c4_22, %c0_23, %c0_24] : memref<5x80x128xbf16, #tpu.memory_space<vmem>>, vector<1x80x128xbf16>
    %26 = vector.shape_cast %25 : vector<1x80x128xbf16> to vector<80x128xbf16>
    %cst_25 = arith.constant dense<0.000000e+00> : vector<16x128xf32>
    %27 = tpu.matmul %24, %26, %cst_25 {dimension_numbers = #tpu.dot_dimension_numbers<[1], [0], [0], [1], [0, 0, 1, 1], [], []>} : vector<16x80xbf16>, vector<80x128xbf16>, vector<16x128xf32> -> vector<16x128xf32>
    %28 = arith.addf %22, %27 : vector<16x128xf32>
    %c0_26 = arith.constant 0 : index
    %c24 = arith.constant 24 : index
    %c0_27 = arith.constant 0 : index
    %29 = vector.load %arg1[%c0_26, %c24, %c0_27] : memref<1x96x80xbf16, #tpu.memory_space<vmem>>, vector<1x16x80xbf16>
    %30 = vector.shape_cast %29 : vector<1x16x80xbf16> to vector<16x80xbf16>
    %c0_28 = arith.constant 0 : index
    %c0_29 = arith.constant 0 : index
    %c0_30 = arith.constant 0 : index
    %31 = vector.load %arg2[%c0_28, %c0_29, %c0_30] : memref<5x80x128xbf16, #tpu.memory_space<vmem>>, vector<1x80x128xbf16>
    %32 = vector.shape_cast %31 : vector<1x80x128xbf16> to vector<80x128xbf16>
    %cst_31 = arith.constant dense<0.000000e+00> : vector<16x128xf32>
    %33 = tpu.matmul %30, %32, %cst_31 {dimension_numbers = #tpu.dot_dimension_numbers<[1], [0], [0], [1], [0, 0, 1, 1], [], []>} : vector<16x80xbf16>, vector<80x128xbf16>, vector<16x128xf32> -> vector<16x128xf32>
    %c0_32 = arith.constant 0 : index
    %c72 = arith.constant 72 : index
    %c0_33 = arith.constant 0 : index
    %34 = vector.load %arg1[%c0_32, %c72, %c0_33] : memref<1x96x80xbf16, #tpu.memory_space<vmem>>, vector<1x16x80xbf16>
    %35 = vector.shape_cast %34 : vector<1x16x80xbf16> to vector<16x80xbf16>
    %c1_34 = arith.constant 1 : index
    %c0_35 = arith.constant 0 : index
    %c0_36 = arith.constant 0 : index
    %36 = vector.load %arg2[%c1_34, %c0_35, %c0_36] : memref<5x80x128xbf16, #tpu.memory_space<vmem>>, vector<1x80x128xbf16>
    %37 = vector.shape_cast %36 : vector<1x80x128xbf16> to vector<80x128xbf16>
    %cst_37 = arith.constant dense<0.000000e+00> : vector<16x128xf32>
    %38 = tpu.matmul %35, %37, %cst_37 {dimension_numbers = #tpu.dot_dimension_numbers<[1], [0], [0], [1], [0, 0, 1, 1], [], []>} : vector<16x80xbf16>, vector<80x128xbf16>, vector<16x128xf32> -> vector<16x128xf32>
    %39 = arith.addf %33, %38 : vector<16x128xf32>
    %c0_38 = arith.constant 0 : index
    %c28 = arith.constant 28 : index
    %c0_39 = arith.constant 0 : index
    %40 = vector.load %arg1[%c0_38, %c28, %c0_39] : memref<1x96x80xbf16, #tpu.memory_space<vmem>>, vector<1x16x80xbf16>
    %41 = vector.shape_cast %40 : vector<1x16x80xbf16> to vector<16x80xbf16>
    %c2_40 = arith.constant 2 : index
    %c0_41 = arith.constant 0 : index
    %c0_42 = arith.constant 0 : index
    %42 = vector.load %arg2[%c2_40, %c0_41, %c0_42] : memref<5x80x128xbf16, #tpu.memory_space<vmem>>, vector<1x80x128xbf16>
    %43 = vector.shape_cast %42 : vector<1x80x128xbf16> to vector<80x128xbf16>
    %cst_43 = arith.constant dense<0.000000e+00> : vector<16x128xf32>
    %44 = tpu.matmul %41, %43, %cst_43 {dimension_numbers = #tpu.dot_dimension_numbers<[1], [0], [0], [1], [0, 0, 1, 1], [], []>} : vector<16x80xbf16>, vector<80x128xbf16>, vector<16x128xf32> -> vector<16x128xf32>
    %45 = arith.addf %39, %44 : vector<16x128xf32>
    %c0_44 = arith.constant 0 : index
    %c76 = arith.constant 76 : index
    %c0_45 = arith.constant 0 : index
    %46 = vector.load %arg1[%c0_44, %c76, %c0_45] : memref<1x96x80xbf16, #tpu.memory_space<vmem>>, vector<1x16x80xbf16>
    %47 = vector.shape_cast %46 : vector<1x16x80xbf16> to vector<16x80xbf16>
    %c3_46 = arith.constant 3 : index
    %c0_47 = arith.constant 0 : index
    %c0_48 = arith.constant 0 : index
    %48 = vector.load %arg2[%c3_46, %c0_47, %c0_48] : memref<5x80x128xbf16, #tpu.memory_space<vmem>>, vector<1x80x128xbf16>
    %49 = vector.shape_cast %48 : vector<1x80x128xbf16> to vector<80x128xbf16>
    %cst_49 = arith.constant dense<0.000000e+00> : vector<16x128xf32>
    %50 = tpu.matmul %47, %49, %cst_49 {dimension_numbers = #tpu.dot_dimension_numbers<[1], [0], [0], [1], [0, 0, 1, 1], [], []>} : vector<16x80xbf16>, vector<80x128xbf16>, vector<16x128xf32> -> vector<16x128xf32>
    %51 = arith.addf %45, %50 : vector<16x128xf32>
    %c0_50 = arith.constant 0 : index
    %c32 = arith.constant 32 : index
    %c0_51 = arith.constant 0 : index
    %52 = vector.load %arg1[%c0_50, %c32, %c0_51] : memref<1x96x80xbf16, #tpu.memory_space<vmem>>, vector<1x16x80xbf16>
    %53 = vector.shape_cast %52 : vector<1x16x80xbf16> to vector<16x80xbf16>
    %c4_52 = arith.constant 4 : index
    %c0_53 = arith.constant 0 : index
    %c0_54 = arith.constant 0 : index
    %54 = vector.load %arg2[%c4_52, %c0_53, %c0_54] : memref<5x80x128xbf16, #tpu.memory_space<vmem>>, vector<1x80x128xbf16>
    %55 = vector.shape_cast %54 : vector<1x80x128xbf16> to vector<80x128xbf16>
    %cst_55 = arith.constant dense<0.000000e+00> : vector<16x128xf32>
    %56 = tpu.matmul %53, %55, %cst_55 {dimension_numbers = #tpu.dot_dimension_numbers<[1], [0], [0], [1], [0, 0, 1, 1], [], []>} : vector<16x80xbf16>, vector<80x128xbf16>, vector<16x128xf32> -> vector<16x128xf32>
    %57 = arith.addf %51, %56 : vector<16x128xf32>
    %58 = arith.maximumf %28, %57 : vector<16x128xf32>
    %c0_56 = arith.constant 0 : index
    %c48_57 = arith.constant 48 : index
    %c0_58 = arith.constant 0 : index
    %59 = vector.load %arg1[%c0_56, %c48_57, %c0_58] : memref<1x96x80xbf16, #tpu.memory_space<vmem>>, vector<1x16x80xbf16>
    %60 = vector.shape_cast %59 : vector<1x16x80xbf16> to vector<16x80xbf16>
    %c0_59 = arith.constant 0 : index
    %c0_60 = arith.constant 0 : index
    %c0_61 = arith.constant 0 : index
    %61 = vector.load %arg2[%c0_59, %c0_60, %c0_61] : memref<5x80x128xbf16, #tpu.memory_space<vmem>>, vector<1x80x128xbf16>
    %62 = vector.shape_cast %61 : vector<1x80x128xbf16> to vector<80x128xbf16>
    %cst_62 = arith.constant dense<0.000000e+00> : vector<16x128xf32>
    %63 = tpu.matmul %60, %62, %cst_62 {dimension_numbers = #tpu.dot_dimension_numbers<[1], [0], [0], [1], [0, 0, 1, 1], [], []>} : vector<16x80xbf16>, vector<80x128xbf16>, vector<16x128xf32> -> vector<16x128xf32>
    %c0_63 = arith.constant 0 : index
    %c4_64 = arith.constant 4 : index
    %c0_65 = arith.constant 0 : index
    %64 = vector.load %arg1[%c0_63, %c4_64, %c0_65] : memref<1x96x80xbf16, #tpu.memory_space<vmem>>, vector<1x16x80xbf16>
    %65 = vector.shape_cast %64 : vector<1x16x80xbf16> to vector<16x80xbf16>
    %c1_66 = arith.constant 1 : index
    %c0_67 = arith.constant 0 : index
    %c0_68 = arith.constant 0 : index
    %66 = vector.load %arg2[%c1_66, %c0_67, %c0_68] : memref<5x80x128xbf16, #tpu.memory_space<vmem>>, vector<1x80x128xbf16>
    %67 = vector.shape_cast %66 : vector<1x80x128xbf16> to vector<80x128xbf16>
    %cst_69 = arith.constant dense<0.000000e+00> : vector<16x128xf32>
    %68 = tpu.matmul %65, %67, %cst_69 {dimension_numbers = #tpu.dot_dimension_numbers<[1], [0], [0], [1], [0, 0, 1, 1], [], []>} : vector<16x80xbf16>, vector<80x128xbf16>, vector<16x128xf32> -> vector<16x128xf32>
    %69 = arith.addf %63, %68 : vector<16x128xf32>
    %c0_70 = arith.constant 0 : index
    %c52_71 = arith.constant 52 : index
    %c0_72 = arith.constant 0 : index
    %70 = vector.load %arg1[%c0_70, %c52_71, %c0_72] : memref<1x96x80xbf16, #tpu.memory_space<vmem>>, vector<1x16x80xbf16>
    %71 = vector.shape_cast %70 : vector<1x16x80xbf16> to vector<16x80xbf16>
    %c2_73 = arith.constant 2 : index
    %c0_74 = arith.constant 0 : index
    %c0_75 = arith.constant 0 : index
    %72 = vector.load %arg2[%c2_73, %c0_74, %c0_75] : memref<5x80x128xbf16, #tpu.memory_space<vmem>>, vector<1x80x128xbf16>
    %73 = vector.shape_cast %72 : vector<1x80x128xbf16> to vector<80x128xbf16>
    %cst_76 = arith.constant dense<0.000000e+00> : vector<16x128xf32>
    %74 = tpu.matmul %71, %73, %cst_76 {dimension_numbers = #tpu.dot_dimension_numbers<[1], [0], [0], [1], [0, 0, 1, 1], [], []>} : vector<16x80xbf16>, vector<80x128xbf16>, vector<16x128xf32> -> vector<16x128xf32>
    %75 = arith.addf %69, %74 : vector<16x128xf32>
    %c0_77 = arith.constant 0 : index
    %c8_78 = arith.constant 8 : index
    %c0_79 = arith.constant 0 : index
    %76 = vector.load %arg1[%c0_77, %c8_78, %c0_79] : memref<1x96x80xbf16, #tpu.memory_space<vmem>>, vector<1x16x80xbf16>
    %77 = vector.shape_cast %76 : vector<1x16x80xbf16> to vector<16x80xbf16>
    %c3_80 = arith.constant 3 : index
    %c0_81 = arith.constant 0 : index
    %c0_82 = arith.constant 0 : index
    %78 = vector.load %arg2[%c3_80, %c0_81, %c0_82] : memref<5x80x128xbf16, #tpu.memory_space<vmem>>, vector<1x80x128xbf16>
    %79 = vector.shape_cast %78 : vector<1x80x128xbf16> to vector<80x128xbf16>
    %cst_83 = arith.constant dense<0.000000e+00> : vector<16x128xf32>
    %80 = tpu.matmul %77, %79, %cst_83 {dimension_numbers = #tpu.dot_dimension_numbers<[1], [0], [0], [1], [0, 0, 1, 1], [], []>} : vector<16x80xbf16>, vector<80x128xbf16>, vector<16x128xf32> -> vector<16x128xf32>
    %81 = arith.addf %75, %80 : vector<16x128xf32>
    %c0_84 = arith.constant 0 : index
    %c56 = arith.constant 56 : index
    %c0_85 = arith.constant 0 : index
    %82 = vector.load %arg1[%c0_84, %c56, %c0_85] : memref<1x96x80xbf16, #tpu.memory_space<vmem>>, vector<1x16x80xbf16>
    %83 = vector.shape_cast %82 : vector<1x16x80xbf16> to vector<16x80xbf16>
    %c4_86 = arith.constant 4 : index
    %c0_87 = arith.constant 0 : index
    %c0_88 = arith.constant 0 : index
    %84 = vector.load %arg2[%c4_86, %c0_87, %c0_88] : memref<5x80x128xbf16, #tpu.memory_space<vmem>>, vector<1x80x128xbf16>
    %85 = vector.shape_cast %84 : vector<1x80x128xbf16> to vector<80x128xbf16>
    %cst_89 = arith.constant dense<0.000000e+00> : vector<16x128xf32>
    %86 = tpu.matmul %83, %85, %cst_89 {dimension_numbers = #tpu.dot_dimension_numbers<[1], [0], [0], [1], [0, 0, 1, 1], [], []>} : vector<16x80xbf16>, vector<80x128xbf16>, vector<16x128xf32> -> vector<16x128xf32>
    %87 = arith.addf %81, %86 : vector<16x128xf32>
    %88 = arith.maximumf %58, %87 : vector<16x128xf32>
    %c0_90 = arith.constant 0 : index
    %c72_91 = arith.constant 72 : index
    %c0_92 = arith.constant 0 : index
    %89 = vector.load %arg1[%c0_90, %c72_91, %c0_92] : memref<1x96x80xbf16, #tpu.memory_space<vmem>>, vector<1x16x80xbf16>
    %90 = vector.shape_cast %89 : vector<1x16x80xbf16> to vector<16x80xbf16>
    %c0_93 = arith.constant 0 : index
    %c0_94 = arith.constant 0 : index
    %c0_95 = arith.constant 0 : index
    %91 = vector.load %arg2[%c0_93, %c0_94, %c0_95] : memref<5x80x128xbf16, #tpu.memory_space<vmem>>, vector<1x80x128xbf16>
    %92 = vector.shape_cast %91 : vector<1x80x128xbf16> to vector<80x128xbf16>
    %cst_96 = arith.constant dense<0.000000e+00> : vector<16x128xf32>
    %93 = tpu.matmul %90, %92, %cst_96 {dimension_numbers = #tpu.dot_dimension_numbers<[1], [0], [0], [1], [0, 0, 1, 1], [], []>} : vector<16x80xbf16>, vector<80x128xbf16>, vector<16x128xf32> -> vector<16x128xf32>
    %c0_97 = arith.constant 0 : index
    %c28_98 = arith.constant 28 : index
    %c0_99 = arith.constant 0 : index
    %94 = vector.load %arg1[%c0_97, %c28_98, %c0_99] : memref<1x96x80xbf16, #tpu.memory_space<vmem>>, vector<1x16x80xbf16>
    %95 = vector.shape_cast %94 : vector<1x16x80xbf16> to vector<16x80xbf16>
    %c1_100 = arith.constant 1 : index
    %c0_101 = arith.constant 0 : index
    %c0_102 = arith.constant 0 : index
    %96 = vector.load %arg2[%c1_100, %c0_101, %c0_102] : memref<5x80x128xbf16, #tpu.memory_space<vmem>>, vector<1x80x128xbf16>
    %97 = vector.shape_cast %96 : vector<1x80x128xbf16> to vector<80x128xbf16>
    %cst_103 = arith.constant dense<0.000000e+00> : vector<16x128xf32>
    %98 = tpu.matmul %95, %97, %cst_103 {dimension_numbers = #tpu.dot_dimension_numbers<[1], [0], [0], [1], [0, 0, 1, 1], [], []>} : vector<16x80xbf16>, vector<80x128xbf16>, vector<16x128xf32> -> vector<16x128xf32>
    %99 = arith.addf %93, %98 : vector<16x128xf32>
    %c0_104 = arith.constant 0 : index
    %c76_105 = arith.constant 76 : index
    %c0_106 = arith.constant 0 : index
    %100 = vector.load %arg1[%c0_104, %c76_105, %c0_106] : memref<1x96x80xbf16, #tpu.memory_space<vmem>>, vector<1x16x80xbf16>
    %101 = vector.shape_cast %100 : vector<1x16x80xbf16> to vector<16x80xbf16>
    %c2_107 = arith.constant 2 : index
    %c0_108 = arith.constant 0 : index
    %c0_109 = arith.constant 0 : index
    %102 = vector.load %arg2[%c2_107, %c0_108, %c0_109] : memref<5x80x128xbf16, #tpu.memory_space<vmem>>, vector<1x80x128xbf16>
    %103 = vector.shape_cast %102 : vector<1x80x128xbf16> to vector<80x128xbf16>
    %cst_110 = arith.constant dense<0.000000e+00> : vector<16x128xf32>
    %104 = tpu.matmul %101, %103, %cst_110 {dimension_numbers = #tpu.dot_dimension_numbers<[1], [0], [0], [1], [0, 0, 1, 1], [], []>} : vector<16x80xbf16>, vector<80x128xbf16>, vector<16x128xf32> -> vector<16x128xf32>
    %105 = arith.addf %99, %104 : vector<16x128xf32>
    %c0_111 = arith.constant 0 : index
    %c32_112 = arith.constant 32 : index
    %c0_113 = arith.constant 0 : index
    %106 = vector.load %arg1[%c0_111, %c32_112, %c0_113] : memref<1x96x80xbf16, #tpu.memory_space<vmem>>, vector<1x16x80xbf16>
    %107 = vector.shape_cast %106 : vector<1x16x80xbf16> to vector<16x80xbf16>
    %c3_114 = arith.constant 3 : index
    %c0_115 = arith.constant 0 : index
    %c0_116 = arith.constant 0 : index
    %108 = vector.load %arg2[%c3_114, %c0_115, %c0_116] : memref<5x80x128xbf16, #tpu.memory_space<vmem>>, vector<1x80x128xbf16>
    %109 = vector.shape_cast %108 : vector<1x80x128xbf16> to vector<80x128xbf16>
    %cst_117 = arith.constant dense<0.000000e+00> : vector<16x128xf32>
    %110 = tpu.matmul %107, %109, %cst_117 {dimension_numbers = #tpu.dot_dimension_numbers<[1], [0], [0], [1], [0, 0, 1, 1], [], []>} : vector<16x80xbf16>, vector<80x128xbf16>, vector<16x128xf32> -> vector<16x128xf32>
    %111 = arith.addf %105, %110 : vector<16x128xf32>
    %c0_118 = arith.constant 0 : index
    %c80 = arith.constant 80 : index
    %c0_119 = arith.constant 0 : index
    %112 = vector.load %arg1[%c0_118, %c80, %c0_119] : memref<1x96x80xbf16, #tpu.memory_space<vmem>>, vector<1x16x80xbf16>
    %113 = vector.shape_cast %112 : vector<1x16x80xbf16> to vector<16x80xbf16>
    %c4_120 = arith.constant 4 : index
    %c0_121 = arith.constant 0 : index
    %c0_122 = arith.constant 0 : index
    %114 = vector.load %arg2[%c4_120, %c0_121, %c0_122] : memref<5x80x128xbf16, #tpu.memory_space<vmem>>, vector<1x80x128xbf16>
    %115 = vector.shape_cast %114 : vector<1x80x128xbf16> to vector<80x128xbf16>
    %cst_123 = arith.constant dense<0.000000e+00> : vector<16x128xf32>
    %116 = tpu.matmul %113, %115, %cst_123 {dimension_numbers = #tpu.dot_dimension_numbers<[1], [0], [0], [1], [0, 0, 1, 1], [], []>} : vector<16x80xbf16>, vector<80x128xbf16>, vector<16x128xf32> -> vector<16x128xf32>
    %117 = arith.addf %111, %116 : vector<16x128xf32>
    %118 = arith.maximumf %88, %117 : vector<16x128xf32>
    %c0_124 = arith.constant 0 : index
    %c0_125 = arith.constant 0 : index
    %119 = vector.load %arg3[%c0_124, %c0_125] : memref<1x128xf32, #tpu.memory_space<vmem>>, vector<1x128xf32>
    %120 = vector.broadcast %119 : vector<1x128xf32> to vector<16x128xf32>
    %121 = arith.addf %118, %120 : vector<16x128xf32>
    %cst_126 = arith.constant 0.000000e+00 : f32
    %122 = vector.broadcast %cst_126 : f32 to vector<16x128xf32>
    %123 = arith.maximumf %121, %122 : vector<16x128xf32>
    %124 = arith.truncf %123 : vector<16x128xf32> to vector<16x128xbf16>
    %c0_127 = arith.constant 0 : index
    %c0_128 = arith.constant 0 : index
    %c0_129 = arith.constant 0 : index
    %125 = vector.load %arg4[%c0_127, %c0_128, %c0_129] : memref<1x16x128xbf16, #tpu.memory_space<vmem>>, vector<1x16x128xbf16>
    %126 = vector.shape_cast %125 : vector<1x16x128xbf16> to vector<16x128xbf16>
    %127 = vector.shape_cast %124 : vector<16x128xbf16> to vector<1x16x128xbf16>
    tpu.vector_store %arg4[%c0_127, %c0_128, %c0_129], %127 {strides = array<i32>} : memref<1x16x128xbf16, #tpu.memory_space<vmem>>, vector<1x16x128xbf16>,
    return
  }
  func.func @transform_0(%arg0: i32) -> (i32, i32, i32) {
    %c0_i32 = arith.constant 0 : i32
    %c0_i32_0 = arith.constant 0 : i32
    %c0_i32_1 = arith.constant 0 : i32
    return %arg0, %c0_i32, %c0_i32_0 : i32, i32, i32
  }
  func.func @transform_1(%arg0: i32) -> (i32, i32, i32) {
    %c0_i32 = arith.constant 0 : i32
    %c0_i32_0 = arith.constant 0 : i32
    %c0_i32_1 = arith.constant 0 : i32
    %c0_i32_2 = arith.constant 0 : i32
    return %c0_i32, %c0_i32_0, %c0_i32_1 : i32, i32, i32
  }
  func.func @transform_2(%arg0: i32) -> (i32, i32) {
    %c0_i32 = arith.constant 0 : i32
    %c0_i32_0 = arith.constant 0 : i32
    %c0_i32_1 = arith.constant 0 : i32
    return %c0_i32, %c0_i32_0 : i32, i32
  }
  func.func @transform_3(%arg0: i32) -> (i32, i32, i32) {
    %c0_i32 = arith.constant 0 : i32
    %c0_i32_0 = arith.constant 0 : i32
    %c0_i32_1 = arith.constant 0 : i32
    return %arg0, %c0_i32, %c0_i32_0 : i32, i32, i32
  }
}

module attributes {stable_mosaic.version = 11 : i64} {
  func.func @_linear_kernel(%arg0: i32, %arg1: i32, %arg2: memref<2x512xbf16, #tpu.memory_space<vmem>>, %arg3: memref<512x128xbf16, #tpu.memory_space<vmem>>, %arg4: memref<1x128xf32, #tpu.memory_space<vmem>>, %arg5: memref<2x128xf32, #tpu.memory_space<vmem>>, %arg6: memref<2x128xf32, #tpu.memory_space<vmem>>) attributes {dimension_semantics = [#tpu.dimension_semantics<parallel>, #tpu.dimension_semantics<arbitrary>], iteration_bounds = array<i64: 2, 4>, scalar_prefetch = 0 : i64, scratch_operands = 1 : i64, tpu.core_type = #tpu.core_type<tc>, window_params = [{transform_indices = @transform_0, window_bounds = array<i64: 2, 512>}, {transform_indices = @transform_1, window_bounds = array<i64: 512, 128>}, {transform_indices = @transform_2, window_bounds = array<i64: 1, 128>}, {transform_indices = @transform_3, window_bounds = array<i64: 2, 128>}]} {
    %c0_i32 = arith.constant 0 : i32
    %0 = arith.cmpi eq, %arg1, %c0_i32 : i32
    %1 = arith.extui %0 : i1 to i32
    %c0_i32_0 = arith.constant 0 : i32
    %2 = arith.cmpi ne, %1, %c0_i32_0 : i32
    scf.if %2 {
      %cst_9 = arith.constant 0.000000e+00 : f32
      %12 = vector.broadcast %cst_9 : f32 to vector<2x128xf32>
      %c0_10 = arith.constant 0 : index
      %c0_11 = arith.constant 0 : index
      %13 = vector.load %arg6[%c0_10, %c0_11] : memref<2x128xf32, #tpu.memory_space<vmem>>, vector<2x128xf32>
      tpu.vector_store %arg6[%c0_10, %c0_11], %12 {strides = array<i32>} : memref<2x128xf32, #tpu.memory_space<vmem>>, vector<2x128xf32>,
    } else {
    }
    %c0 = arith.constant 0 : index
    %c0_1 = arith.constant 0 : index
    %3 = vector.load %arg6[%c0, %c0_1] : memref<2x128xf32, #tpu.memory_space<vmem>>, vector<2x128xf32>
    %c0_2 = arith.constant 0 : index
    %c0_3 = arith.constant 0 : index
    %4 = vector.load %arg2[%c0_2, %c0_3] : memref<2x512xbf16, #tpu.memory_space<vmem>>, vector<2x512xbf16>
    %c0_4 = arith.constant 0 : index
    %c0_5 = arith.constant 0 : index
    %5 = vector.load %arg3[%c0_4, %c0_5] : memref<512x128xbf16, #tpu.memory_space<vmem>>, vector<512x128xbf16>
    %cst = arith.constant dense<0.000000e+00> : vector<2x128xf32>
    %6 = tpu.matmul %4, %5, %cst {dimension_numbers = #tpu.dot_dimension_numbers<[1], [0], [0], [1], [0, 0, 1, 1], [], []>} : vector<2x512xbf16>, vector<512x128xbf16>, vector<2x128xf32> -> vector<2x128xf32>
    %7 = arith.addf %3, %6 : vector<2x128xf32>
    %c0_6 = arith.constant 0 : index
    %c0_7 = arith.constant 0 : index
    %8 = vector.load %arg6[%c0_6, %c0_7] : memref<2x128xf32, #tpu.memory_space<vmem>>, vector<2x128xf32>
    tpu.vector_store %arg6[%c0_6, %c0_7], %7 {strides = array<i32>} : memref<2x128xf32, #tpu.memory_space<vmem>>, vector<2x128xf32>,
    %c3_i32 = arith.constant 3 : i32
    %9 = arith.cmpi eq, %arg1, %c3_i32 : i32
    %10 = arith.extui %9 : i1 to i32
    %c0_i32_8 = arith.constant 0 : i32
    %11 = arith.cmpi ne, %10, %c0_i32_8 : i32
    scf.if %11 {
      %c0_9 = arith.constant 0 : index
      %c0_10 = arith.constant 0 : index
      %12 = vector.load %arg6[%c0_9, %c0_10] : memref<2x128xf32, #tpu.memory_space<vmem>>, vector<2x128xf32>
      %c0_11 = arith.constant 0 : index
      %c0_12 = arith.constant 0 : index
      %13 = vector.load %arg4[%c0_11, %c0_12] : memref<1x128xf32, #tpu.memory_space<vmem>>, vector<1x128xf32>
      %14 = vector.broadcast %13 : vector<1x128xf32> to vector<2x128xf32>
      %15 = arith.addf %12, %14 : vector<2x128xf32>
      %c0_13 = arith.constant 0 : index
      %c0_14 = arith.constant 0 : index
      %16 = vector.load %arg5[%c0_13, %c0_14] : memref<2x128xf32, #tpu.memory_space<vmem>>, vector<2x128xf32>
      tpu.vector_store %arg5[%c0_13, %c0_14], %15 {strides = array<i32>} : memref<2x128xf32, #tpu.memory_space<vmem>>, vector<2x128xf32>,
    } else {
    }
    return
  }
  func.func @transform_0(%arg0: i32, %arg1: i32) -> (i32, i32) {
    %c0_i32 = arith.constant 0 : i32
    %c0_i32_0 = arith.constant 0 : i32
    return %c0_i32, %arg1 : i32, i32
  }
  func.func @transform_1(%arg0: i32, %arg1: i32) -> (i32, i32) {
    %c0_i32 = arith.constant 0 : i32
    return %arg1, %arg0 : i32, i32
  }
  func.func @transform_2(%arg0: i32, %arg1: i32) -> (i32, i32) {
    %c0_i32 = arith.constant 0 : i32
    %c0_i32_0 = arith.constant 0 : i32
    return %c0_i32, %arg0 : i32, i32
  }
  func.func @transform_3(%arg0: i32, %arg1: i32) -> (i32, i32) {
    %c0_i32 = arith.constant 0 : i32
    %c0_i32_0 = arith.constant 0 : i32
    return %c0_i32, %arg0 : i32, i32
  }
}

</mosaic_0001>

<bundles_post_ra>
// kernel: cnn_forward.3
= control target key start
LH: loop header
LB: loop body
LE: loop exit
PB: predicated region body
PF: predicated region fallthrough
CT: control target
= control target key end

     0   :  { %s2789_s12 = smov 0   ;;  %s3283_s0 = inlined_call_operand.vmem [shape: bf16[2,320,5], index: 0, kind: input, shape index: {}]   ;;  %s3284_s1 = inlined_call_operand.vmem [shape: bf16[5,5,128], index: 1, kind: input, shape index: {}]   ;;  %s3285_s2 = inlined_call_operand.vmem [shape: f32[1,128], index: 2, kind: input, shape index: {}]   ;;  %s3286_s3 = inlined_call_operand.vmem [shape: bf16[2,64,128], index: 3, kind: output, shape index: {}]  }
   0x1 LB: > { %s2219_s13 = sadd.s32 4294967295, %s2766_s12   ;;  %p2223_p0 = scmp.ge.s32.totalorder %s2766_s12, 1  ;;  %s2766_s12 = sphi %s2789_s12, %s13_s12  }
   0x2   : > { %p137_p1 = scmp.lt.s32.totalorder %s2766_s12, 3 }
   0x4   : > { %p138_p2 = pnand %p2223_p0, %p137_p1 }
   0x6   : > { %141 = sbr.rel (%p138_p2) target bundleno = 385 (0x181), region = 32 }
   0xb   : > { %v2227_v0 = vld [vmem:[%s3284_s1 + $0x4] sm:$0x7]  ;;  %vm224_vm0 = vcmask 1041408   ;;  %vm225_vm1 = vcmask 1042432   ;;  %p161_p3 = scmp.lt.s32.totalorder %s2219_s13, 1  ;;  %v2768_v1 = vmov 65535  }
   0xc   : > { %v226_v2 = vsel %vm224_vm0, 4294967295, %v2768_v1  ;;  %v180_v3 = vld [vmem:[%s3284_s1] sm:$0x7]  ;;  %v2244_v4 = vld [vmem:[%s3284_s1 + $0x8] sm:$0x7]  ;;  %vm211_vm2 = vcmask 39936  }
   0xd   : > { %v227_v5 = vsel %vm225_vm1, %v226_v2, 0  ;;  %s3359_s13 = smov (!%p161_p3, %s2219_s13), 1  ;;  %v2253_v6 = vld [vmem:[%s3284_s1 + $0xc] sm:$0x7]  ;;  %v2262_v11 = vld [vmem:[%s3284_s1 + $0x10] sm:$0x7] }
   0xe   : > { %v2811_v7 = vand.u32 %v2227_v0, %v227_v5  ;;  %v2813_v8 = vand.u32 %v227_v5, %v180_v3  ;;  %v2815_v9 = vand.u32 %v2244_v4, %v227_v5  ;;  %v2817_v10 = vand.u32 %v2253_v6, %v227_v5  ;;  %s2702_s22 = smul.u32 160, %s3359_s13  ;;  %s2370_s30 = sshll.u32 %s3359_s13, 5 }
   0xf   : > { %v2845_v16 = vand.u32 %v2262_v11, %v227_v5  ;;  %s170_s6 = scalar_lea.vmem %s3286_s3, %s2370_s30 }
  0x10   : > { %2502 = vmatprep.subr.bf16.mxu0 %v2811_v7  ;;  %2512 = vmatprep.subr.bf16.mxu1 %v2813_v8  ;;  %s2827_s25 = scalar_lea.vmem %s3283_s0, %s2702_s22 }
  0x11   : > { %2503 = vmatpush3.bf16.msra.mxu0 %v2811_v7  ;;  %2513 = vmatpush3.bf16.msra.mxu1 %v2813_v8  ;;  %v2833_v12 = vld [vmem:[%s2827_s25 + $0x50] sm:$0xff]   ;;  %v2713_v13 = vld [vmem:[%s2827_s25] sm:$0xff]   ;;  %v2841_v14 = vld [vmem:[%s2827_s25 + $0x58] sm:$0xff]  }
  0x12   : > { %2522 = vmatprep.subr.bf16.mxu0 %v2815_v9  ;;  %2532 = vmatprep.subr.bf16.mxu1 %v2817_v10  ;;  %v2715_v15 = vld [vmem:[%s2827_s25 + $0x8] sm:$0xff]   ;;  %v2850_v17 = vld [vmem:[%s2827_s25 + $0x60] sm:$0xff]   ;;  %v2717_v18 = vld [vmem:[%s2827_s25 + $0x10] sm:$0xff]  }
  0x13   : > { %2504 = vmatprep.mubr.msk.bf16.mxu0 %vm211_vm2, %v2833_v12  ;;  %2514 = vmatprep.mubr.msk.bf16.mxu1 %vm211_vm2, %v2713_v13  ;;  %v2860_v19 = vld [vmem:[%s2827_s25 + $0x68] sm:$0xff]   ;;  %v2719_v20 = vld [vmem:[%s2827_s25 + $0x18] sm:$0xff]   ;;  %v2923_v31 = vld [vmem:[%s2827_s25 + $0x10] sm:$0xff]  }
  0x14   : > { %2505 = vmatmul.mubr.msk.bf16.vlgmr.msra.gmra.mxu0 %vm211_vm2, %v2841_v14  ;;  %2515 = vmatmul.mubr.msk.bf16.vlgmr.msra.gmra.mxu1 %vm211_vm2, %v2715_v15  ;;  %v2866_v21 = vld [vmem:[%s2827_s25 + $0x4] sm:$0xff]   ;;  %v2869_v22 = vld [vmem:[%s2827_s25 + $0x54] sm:$0xff]   ;;  %v2879_v23 = vld [vmem:[%s2827_s25 + $0xc] sm:$0xff]  }
  0x15   : > { %2523 = vmatpush3.bf16.msra.mxu0 %v2815_v9  ;;  %2533 = vmatpush3.bf16.msra.mxu1 %v2817_v10  ;;  %v2882_v24 = vld [vmem:[%s2827_s25 + $0x5c] sm:$0xff]   ;;  %v2885_v25 = vld [vmem:[%s2827_s25 + $0x14] sm:$0xff]   ;;  %v2888_v26 = vld [vmem:[%s2827_s25 + $0x64] sm:$0xff]  }
  0x16   : > { %2508 = vmatprep.mubr.msk.bf16.mxu0 %vm211_vm2, %v2850_v17  ;;  %2518 = vmatprep.mubr.msk.bf16.mxu1 %vm211_vm2, %v2717_v18  ;;  %v2901_v27 = vld [vmem:[%s2827_s25 + $0x1c] sm:$0xff]   ;;  %v2905_v28 = vld [vmem:[%s2827_s25 + $0x6c] sm:$0xff]   ;;  %v2965_v40 = vld [vmem:[%s2827_s25 + $0x34] sm:$0xff]  }
  0x17   : > { %2542 = vmatprep.subr.bf16.mxu0 %v2845_v16  ;;  %2552 = vmatprep.subr.bf16.mxu1 %v2811_v7  ;;  %v2909_v29 = vld [vmem:[%s2827_s25 + $0x8] sm:$0xff]   ;;  %v2912_v30 = vld [vmem:[%s2827_s25 + $0x78] sm:$0xff]   ;;  %v2926_v32 = vld [vmem:[%s2827_s25 + $0x80] sm:$0xff]  }
  0x18   : > { %v2929_v33 = vld [vmem:[%s2827_s25 + $0x18] sm:$0xff]   ;;  %v2932_v34 = vld [vmem:[%s2827_s25 + $0x88] sm:$0xff]   ;;  %v2945_v35 = vld [vmem:[%s2827_s25 + $0x20] sm:$0xff]  }
  0x19   : > { %v2949_v36 = vld [vmem:[%s2827_s25 + $0x90] sm:$0xff]   ;;  %v2736_v37 = vld [vmem:[%s2827_s25 + $0x28] sm:$0xff]   ;;  %v2740_v41 = vld [vmem:[%s2827_s25 + $0x38] sm:$0xff]  }
  0x1a   : > { %v2954_v38 = vld [vmem:[%s2827_s25 + $0x2c] sm:$0xff]   ;;  %v2969_v42 = vld [vmem:[%s2827_s25 + $0x3c] sm:$0xff]   ;;  %v2743_v44 = vld [vmem:[%s2827_s25 + $0x44] sm:$0xff]  }
  0x1b   : > { %v2738_v39 = vld [vmem:[%s2827_s25 + $0x30] sm:$0xff]   ;;  %v2742_v43 = vld [vmem:[%s2827_s25 + $0x40] sm:$0xff]   ;;  %v2997_v48 = vld [vmem:[%s2827_s25 + $0x38] sm:$0xff]  }
  0x1c   : > { %2509 = vmatmul.mubr.msk.bf16.gmra.mxu0 %vm211_vm2, %v2860_v19  ;;  %2519 = vmatmul.mubr.msk.bf16.gmra.mxu1 %vm211_vm2, %v2719_v20  ;;  %v2984_v45 = vld [vmem:[%s2827_s25 + $0x7c] sm:$0xff]   ;;  %v2987_v46 = vld [vmem:[%s2827_s25 + $0x30] sm:$0xff]   ;;  %v2746_v47 = vld [vmem:[%s2827_s25 + $0x84] sm:$0xff]  }
  0x1d   : > { %2524 = vmatprep.mubr.msk.bf16.mxu0 %vm211_vm2, %v2866_v21  ;;  %2534 = vmatprep.mubr.msk.bf16.mxu1 %vm211_vm2, %v2869_v22  ;;  %v2748_v49 = vld [vmem:[%s2827_s25 + $0x8c] sm:$0xff]   ;;  %v3001_v50 = vld [vmem:[%s2827_s25 + $0x40] sm:$0xff]   ;;  %v2750_v51 = vld [vmem:[%s2827_s25 + $0x94] sm:$0xff]  }
  0x1e   : > { %v3015_v52 = vld [vmem:[%s2827_s25 + $0x48] sm:$0xff]   ;;  %v2752_v53 = vld [vmem:[%s2827_s25 + $0x58] sm:$0xff]   ;;  %v2753_v54 = vld [vmem:[%s2827_s25 + $0x60] sm:$0xff]  }
  0x1f   : > { %v2754_v55 = vld [vmem:[%s2827_s25 + $0x68] sm:$0xff]   ;;  %v2755_v56 = vld [vmem:[%s2827_s25 + $0x70] sm:$0xff]   ;;  %v2756_v57 = vld [vmem:[%s2827_s25 + $0x80] sm:$0xff]  }
  0x20   : > { %v2757_v58 = vld [vmem:[%s2827_s25 + $0x88] sm:$0xff]   ;;  %v2758_v59 = vld [vmem:[%s2827_s25 + $0x90] sm:$0xff]   ;;  %v2759_v60 = vld [vmem:[%s2827_s25 + $0x98] sm:$0xff]  }
  0x24   : > { %2525 = vmatmul.mubr.msk.bf16.vlgmr.msra.gmra.mxu0 %vm211_vm2, %v2879_v23  ;;  %2535 = vmatmul.mubr.msk.bf16.vlgmr.msra.gmra.mxu1 %vm211_vm2, %v2882_v24 }
  0x25   : > { %2543 = vmatpush3.bf16.msra.mxu0 %v2845_v16  ;;  %2553 = vmatpush3.bf16.msra.mxu1 %v2811_v7 }
  0x26   : > { %2528 = vmatprep.mubr.msk.bf16.mxu0 %vm211_vm2, %v2885_v25  ;;  %2538 = vmatprep.mubr.msk.bf16.mxu1 %vm211_vm2, %v2888_v26 }
  0x27   : > { %2562 = vmatprep.subr.bf16.mxu0 %v2813_v8  ;;  %2572 = vmatprep.subr.bf16.mxu1 %v2815_v9 }
  0x2c   : > { %2529 = vmatmul.mubr.msk.bf16.gmra.mxu0 %vm211_vm2, %v2901_v27  ;;  %2539 = vmatmul.mubr.msk.bf16.gmra.mxu1 %vm211_vm2, %v2905_v28 }
  0x2d   : > { %2544 = vmatprep.mubr.msk.bf16.mxu0 %vm211_vm2, %v2909_v29  ;;  %2554 = vmatprep.mubr.msk.bf16.mxu1 %vm211_vm2, %v2912_v30 }
  0x34   : > { %2545 = vmatmul.mubr.msk.bf16.vlgmr.msra.gmra.mxu0 %vm211_vm2, %v2923_v31  ;;  %2555 = vmatmul.mubr.msk.bf16.vlgmr.msra.gmra.mxu1 %vm211_vm2, %v2926_v32 }
  0x35   : > { %2563 = vmatpush3.bf16.msra.mxu0 %v2813_v8  ;;  %2573 = vmatpush3.bf16.msra.mxu1 %v2815_v9 }
  0x36   : > { %2548 = vmatprep.mubr.msk.bf16.mxu0 %vm211_vm2, %v2929_v33  ;;  %2558 = vmatprep.mubr.msk.bf16.mxu1 %vm211_vm2, %v2932_v34 }
  0x37   : > { %2582 = vmatprep.subr.bf16.mxu0 %v2817_v10  ;;  %2592 = vmatprep.subr.bf16.mxu1 %v2845_v16 }
  0x3c   : > { %2549 = vmatmul.mubr.msk.bf16.gmra.mxu0 %vm211_vm2, %v2945_v35  ;;  %2559 = vmatmul.mubr.msk.bf16.gmra.mxu1 %vm211_vm2, %v2949_v36 }
  0x3d   : > { %2564 = vmatprep.mubr.msk.bf16.mxu0 %vm211_vm2, %v2736_v37  ;;  %2574 = vmatprep.mubr.msk.bf16.mxu1 %vm211_vm2, %v2954_v38 }
  0x44   : > { %2565 = vmatmul.mubr.msk.bf16.vlgmr.msra.gmra.mxu0 %vm211_vm2, %v2738_v39  ;;  %2575 = vmatmul.mubr.msk.bf16.vlgmr.msra.gmra.mxu1 %vm211_vm2, %v2965_v40 }
  0x45   : > { %2583 = vmatpush3.bf16.msra.mxu0 %v2817_v10  ;;  %2593 = vmatpush3.bf16.msra.mxu1 %v2845_v16 }
  0x46   : > { %2568 = vmatprep.mubr.msk.bf16.mxu0 %vm211_vm2, %v2740_v41  ;;  %2578 = vmatprep.mubr.msk.bf16.mxu1 %vm211_vm2, %v2969_v42 }
  0x47   : > { %2602 = vmatprep.subr.bf16.mxu0 %v2811_v7  ;;  %2612 = vmatprep.subr.bf16.mxu1 %v2813_v8 }
  0x4c   : > { %2569 = vmatmul.mubr.msk.bf16.gmra.mxu0 %vm211_vm2, %v2742_v43  ;;  %2579 = vmatmul.mubr.msk.bf16.gmra.mxu1 %vm211_vm2, %v2743_v44 }
  0x4d   : > { %2584 = vmatprep.mubr.msk.bf16.mxu0 %vm211_vm2, %v2984_v45  ;;  %2594 = vmatprep.mubr.msk.bf16.mxu1 %vm211_vm2, %v2987_v46 }
  0x54   : > { %2585 = vmatmul.mubr.msk.bf16.vlgmr.msra.gmra.mxu0 %vm211_vm2, %v2746_v47  ;;  %2595 = vmatmul.mubr.msk.bf16.vlgmr.msra.gmra.mxu1 %vm211_vm2, %v2997_v48 }
  0x55   : > { %2603 = vmatpush3.bf16.msra.mxu0 %v2811_v7  ;;  %2613 = vmatpush3.bf16.msra.mxu1 %v2813_v8 }
  0x56   : > { %2588 = vmatprep.mubr.msk.bf16.mxu0 %vm211_vm2, %v2748_v49  ;;  %2598 = vmatprep.mubr.msk.bf16.mxu1 %vm211_vm2, %v3001_v50 }
  0x57   : > { %2622 = vmatprep.subr.bf16.mxu0 %v2815_v9  ;;  %2632 = vmatprep.subr.bf16.mxu1 %v2817_v10 }
  0x5c   : > { %2589 = vmatmul.mubr.msk.bf16.gmra.mxu0 %vm211_vm2, %v2750_v51  ;;  %2599 = vmatmul.mubr.msk.bf16.gmra.mxu1 %vm211_vm2, %v3015_v52 }
  0x5d   : > { %2604 = vmatprep.mubr.msk.bf16.mxu0 %vm211_vm2, %v2866_v21  ;;  %2614 = vmatprep.mubr.msk.bf16.mxu1 %vm211_vm2, %v2833_v12 }
  0x64   : > { %2605 = vmatmul.mubr.msk.bf16.vlgmr.msra.gmra.mxu0 %vm211_vm2, %v2879_v23  ;;  %2615 = vmatmul.mubr.msk.bf16.vlgmr.msra.gmra.mxu1 %vm211_vm2, %v2841_v14 }
  0x65   : > { %2623 = vmatpush3.bf16.msra.mxu0 %v2815_v9  ;;  %2633 = vmatpush3.bf16.msra.mxu1 %v2817_v10 }
  0x66   : > { %2608 = vmatprep.mubr.msk.bf16.mxu0 %vm211_vm2, %v2885_v25  ;;  %2618 = vmatprep.mubr.msk.bf16.mxu1 %vm211_vm2, %v2850_v17 }
  0x67   : > { %2642 = vmatprep.subr.bf16.mxu0 %v2845_v16  ;;  %2652 = vmatprep.subr.bf16.mxu1 %v2811_v7 }
  0x6c   : > { %2609 = vmatmul.mubr.msk.bf16.gmra.mxu0 %vm211_vm2, %v2901_v27  ;;  %2619 = vmatmul.mubr.msk.bf16.gmra.mxu1 %vm211_vm2, %v2860_v19 }
  0x6d   : > { %2624 = vmatprep.mubr.msk.bf16.mxu0 %vm211_vm2, %v2869_v22  ;;  %2634 = vmatprep.mubr.msk.bf16.mxu1 %vm211_vm2, %v2909_v29 }
  0x74   : > { %2625 = vmatmul.mubr.msk.bf16.vlgmr.msra.gmra.mxu0 %vm211_vm2, %v2882_v24  ;;  %2635 = vmatmul.mubr.msk.bf16.vlgmr.msra.gmra.mxu1 %vm211_vm2, %v2923_v31 }
  0x75   : > { %2643 = vmatpush3.bf16.msra.mxu0 %v2845_v16  ;;  %2653 = vmatpush3.bf16.msra.mxu1 %v2811_v7 }
  0x76   : > { %2628 = vmatprep.mubr.msk.bf16.mxu0 %vm211_vm2, %v2888_v26  ;;  %2638 = vmatprep.mubr.msk.bf16.mxu1 %vm211_vm2, %v2929_v33 }
  0x77   : > { %2662 = vmatprep.subr.bf16.mxu0 %v2813_v8  ;;  %2672 = vmatprep.subr.bf16.mxu1 %v2815_v9 }
  0x7c   : > { %2629 = vmatmul.mubr.msk.bf16.gmra.mxu0 %vm211_vm2, %v2905_v28  ;;  %2639 = vmatmul.mubr.msk.bf16.gmra.mxu1 %vm211_vm2, %v2945_v35 }
  0x7d   : > { %2644 = vmatprep.mubr.msk.bf16.mxu0 %vm211_vm2, %v2752_v53  ;;  %2654 = vmatprep.mubr.msk.bf16.mxu1 %vm211_vm2, %v2954_v38 }
  0x84   : > { %2645 = vmatmul.mubr.msk.bf16.vlgmr.msra.gmra.mxu0 %vm211_vm2, %v2753_v54  ;;  %2655 = vmatmul.mubr.msk.bf16.vlgmr.msra.gmra.mxu1 %vm211_vm2, %v2965_v40 }
  0x85   : > { %2663 = vmatpush3.bf16.msra.mxu0 %v2813_v8  ;;  %2673 = vmatpush3.bf16.msra.mxu1 %v2815_v9 }
  0x86   : > { %2648 = vmatprep.mubr.msk.bf16.mxu0 %vm211_vm2, %v2754_v55  ;;  %2658 = vmatprep.mubr.msk.bf16.mxu1 %vm211_vm2, %v2969_v42 }
  0x87   : > { %2682 = vmatprep.subr.bf16.mxu0 %v2817_v10  ;;  %2692 = vmatprep.subr.bf16.mxu1 %v2845_v16 }
  0x8c   : > { %2649 = vmatmul.mubr.msk.bf16.gmra.mxu0 %vm211_vm2, %v2755_v56  ;;  %2659 = vmatmul.mubr.msk.bf16.gmra.mxu1 %vm211_vm2, %v2743_v44 }
  0x8d   : > { %2664 = vmatprep.mubr.msk.bf16.mxu0 %vm211_vm2, %v2912_v30  ;;  %2674 = vmatprep.mubr.msk.bf16.mxu1 %vm211_vm2, %v2984_v45 }
  0x94   : > { %2665 = vmatmul.mubr.msk.bf16.vlgmr.msra.gmra.mxu0 %vm211_vm2, %v2926_v32  ;;  %2675 = vmatmul.mubr.msk.bf16.vlgmr.msra.gmra.mxu1 %vm211_vm2, %v2746_v47 }
  0x95   : > { %2683 = vmatpush3.bf16.msra.mxu0 %v2817_v10  ;;  %2693 = vmatpush3.bf16.msra.mxu1 %v2845_v16 }
  0x96   : > { %2668 = vmatprep.mubr.msk.bf16.mxu0 %vm211_vm2, %v2932_v34  ;;  %2678 = vmatprep.mubr.msk.bf16.mxu1 %vm211_vm2, %v2748_v49 }
  0x9c   : > { %2669 = vmatmul.mubr.msk.bf16.gmra.mxu0 %vm211_vm2, %v2949_v36  ;;  %2679 = vmatmul.mubr.msk.bf16.gmra.mxu1 %vm211_vm2, %v2750_v51 }
  0x9d   : > { %2684 = vmatprep.mubr.msk.bf16.mxu0 %vm211_vm2, %v2987_v46  ;;  %2694 = vmatprep.mubr.msk.bf16.mxu1 %vm211_vm2, %v2756_v57 }
  0xa4   : > { %2685 = vmatmul.mubr.msk.bf16.vlgmr.msra.gmra.mxu0 %vm211_vm2, %v2997_v48  ;;  %2695 = vmatmul.mubr.msk.bf16.vlgmr.msra.gmra.mxu1 %vm211_vm2, %v2757_v58 }
  0xa5   : > { %2688 = vmatprep.mubr.msk.bf16.mxu0 %vm211_vm2, %v3001_v50  ;;  %2698 = vmatprep.mubr.msk.bf16.mxu1 %vm211_vm2, %v2758_v59 }
  0xac   : > { %2689 = vmatmul.mubr.msk.bf16.gmra.mxu0 %vm211_vm2, %v3015_v52  ;;  %2699 = vmatmul.mubr.msk.bf16.gmra.mxu1 %vm211_vm2, %v2759_v60 }
  0xd4   : > { %v2506_v61 = vpop.f32.mrf.mxu0  ;;  %v2516_v62 = vpop.f32.mrf.mxu1 }
  0xd5   : > { %v374_v63 = vadd.f32 %v2516_v62, %v2506_v61 }
  0xd6   : > { %v265_v0 = vpop.f32.mrf.mxu0  ;;  %v365_v1 = vpop.f32.mrf.mxu1 }
  0xd7   : > { %v366_v2 = vadd.f32 %v365_v1, %v265_v0 }
  0xd8   : > { %v2507_v3 = vpop.f32.mrf.mxu0  ;;  %v2517_v4 = vpop.f32.mrf.mxu1 }
  0xd9   : > { %v377_v5 = vadd.f32 %v2517_v4, %v2507_v3 }
  0xda   : > { %v268_v6 = vpop.f32.mrf.mxu0  ;;  %v368_v7 = vpop.f32.mrf.mxu1 }
  0xdb   : > { %v369_v8 = vadd.f32 %v368_v7, %v268_v6 }
  0xdc   : > { %v2510_v9 = vpop.f32.mrf.mxu0  ;;  %v2520_v10 = vpop.f32.mrf.mxu1 }
  0xdd   : > { %v390_v11 = vadd.f32 %v2520_v10, %v2510_v9 }
  0xde   : > { %v281_v12 = vpop.f32.mrf.mxu0  ;;  %v381_v13 = vpop.f32.mrf.mxu1 }
  0xdf   : > { %v382_v14 = vadd.f32 %v381_v13, %v281_v12 }
  0xe0   : > { %v2511_v15 = vpop.f32.mrf.mxu0  ;;  %v2521_v16 = vpop.f32.mrf.mxu1 }
  0xe1   : > { %v393_v17 = vadd.f32 %v2521_v16, %v2511_v15 }
  0xe2   : > { %v284_v18 = vpop.f32.mrf.mxu0  ;;  %v384_v19 = vpop.f32.mrf.mxu1 }
  0xe3   : > { %v385_v20 = vadd.f32 %v384_v19, %v284_v18 }
  0xe4   : > { %v2526_v21 = vpop.f32.mrf.mxu0  ;;  %v2536_v23 = vpop.f32.mrf.mxu1 }
  0xe5   : > { %v508_v22 = vadd.f32 %v2526_v21, %v374_v63 }
  0xe6   : > { %v475_v24 = vpop.f32.mrf.mxu0  ;;  %v593_v27 = vpop.f32.mrf.mxu1 }
  0xe7   : > { %v626_v25 = vadd.f32 %v2536_v23, %v508_v22  ;;  %v506_v26 = vadd.f32 %v475_v24, %v366_v2 }
  0xe8   : > { %v2527_v28 = vpop.f32.mrf.mxu0  ;;  %v2537_v31 = vpop.f32.mrf.mxu1 }
  0xe9   : > { %v624_v29 = vadd.f32 %v593_v27, %v506_v26  ;;  %v509_v30 = vadd.f32 %v2527_v28, %v377_v5 }
  0xea   : > { %v478_v32 = vpop.f32.mrf.mxu0  ;;  %v596_v35 = vpop.f32.mrf.mxu1 }
  0xeb   : > { %v627_v33 = vadd.f32 %v2537_v31, %v509_v30  ;;  %v507_v34 = vadd.f32 %v478_v32, %v369_v8 }
  0xec   : > { %v2530_v36 = vpop.f32.mrf.mxu0  ;;  %v2540_v39 = vpop.f32.mrf.mxu1 }
  0xed   : > { %v625_v37 = vadd.f32 %v596_v35, %v507_v34  ;;  %v512_v38 = vadd.f32 %v2530_v36, %v390_v11 }
  0xee   : > { %v491_v40 = vpop.f32.mrf.mxu0  ;;  %v609_v43 = vpop.f32.mrf.mxu1 }
  0xef   : > { %v630_v41 = vadd.f32 %v2540_v39, %v512_v38  ;;  %v510_v42 = vadd.f32 %v491_v40, %v382_v14 }
  0xf0   : > { %v2531_v44 = vpop.f32.mrf.mxu0  ;;  %v2541_v47 = vpop.f32.mrf.mxu1 }
  0xf1   : > { %v628_v45 = vadd.f32 %v609_v43, %v510_v42  ;;  %v513_v46 = vadd.f32 %v2531_v44, %v393_v17 }
  0xf2   : > { %v494_v48 = vpop.f32.mrf.mxu0  ;;  %v612_v51 = vpop.f32.mrf.mxu1 }
  0xf3   : > { %v631_v49 = vadd.f32 %v2541_v47, %v513_v46  ;;  %v511_v50 = vadd.f32 %v494_v48, %v385_v20 }
  0xf4   : > { %v2546_v52 = vpop.f32.mrf.mxu0  ;;  %v2556_v55 = vpop.f32.mrf.mxu1 }
  0xf5   : > { %v629_v53 = vadd.f32 %v612_v51, %v511_v50  ;;  %v3110_v54 = vadd.f32 %v2546_v52, %v626_v25 }
  0xf6   : > { %v711_v56 = vpop.f32.mrf.mxu0  ;;  %v832_v58 = vpop.f32.mrf.mxu1 }
  0xf7   : > { %v3112_v57 = vadd.f32 %v711_v56, %v624_v29 }
  0xf8   : > { %v2547_v59 = vpop.f32.mrf.mxu0  ;;  %v2557_v61 = vpop.f32.mrf.mxu1 }
  0xf9   : > { %v3114_v60 = vadd.f32 %v2547_v59, %v627_v33 }
  0xfa   : > { %v714_v62 = vpop.f32.mrf.mxu0  ;;  %v835_v0 = vpop.f32.mrf.mxu1 }
  0xfb   : > { %3300 = vst [vmem:[#allocation2_spill] sm:$0xff] %v3114_v60  ;;  %v3116_v63 = vadd.f32 %v714_v62, %v625_v37 }
  0xfc   : > { %v2550_v1 = vpop.f32.mrf.mxu0  ;;  %v2560_v3 = vpop.f32.mrf.mxu1 }
  0xfd   : > { %3301 = vst [vmem:[#allocation3_spill] sm:$0xff] %v3116_v63  ;;  %v3118_v2 = vadd.f32 %v2550_v1, %v630_v41 }
  0xfe   : > { %v727_v4 = vpop.f32.mrf.mxu0  ;;  %v848_v6 = vpop.f32.mrf.mxu1 }
  0xff   : > { %3302 = vst [vmem:[#allocation4_spill] sm:$0xff] %v3118_v2  ;;  %v3120_v5 = vadd.f32 %v727_v4, %v628_v45 }
 0x100   : > { %v2551_v7 = vpop.f32.mrf.mxu0  ;;  %v2561_v9 = vpop.f32.mrf.mxu1 }
 0x101   : > { %3303 = vst [vmem:[#allocation5_spill] sm:$0xff] %v3120_v5  ;;  %v3122_v8 = vadd.f32 %v2551_v7, %v631_v49 }
 0x102   : > { %v730_v10 = vpop.f32.mrf.mxu0  ;;  %v851_v12 = vpop.f32.mrf.mxu1 }
 0x103   : > { %3304 = vst [vmem:[#allocation6_spill] sm:$0xff] %v3122_v8  ;;  %v3124_v11 = vadd.f32 %v730_v10, %v629_v53 }
 0x104   : > { %v2566_v13 = vpop.f32.mrf.mxu0  ;;  %v2576_v15 = vpop.f32.mrf.mxu1 }
 0x105   : > { %3305 = vst [vmem:[#allocation7_spill] sm:$0xff] %v3124_v11  ;;  %v938_v14 = vadd.f32 %v2566_v13, %v2556_v55 }
 0x106   : > { %v929_v16 = vpop.f32.mrf.mxu0  ;;  %v1034_v19 = vpop.f32.mrf.mxu1 }
 0x107   : > { %v1067_v17 = vadd.f32 %v2576_v15, %v938_v14  ;;  %v930_v18 = vadd.f32 %v929_v16, %v832_v58 }
 0x108   : > { %v2567_v20 = vpop.f32.mrf.mxu0  ;;  %v2577_v23 = vpop.f32.mrf.mxu1 }
 0x109   : > { %v1065_v21 = vadd.f32 %v1034_v19, %v930_v18  ;;  %v941_v22 = vadd.f32 %v2567_v20, %v2557_v61 }
 0x10a   : > { %v932_v24 = vpop.f32.mrf.mxu0  ;;  %v1037_v27 = vpop.f32.mrf.mxu1 }
 0x10b   : > { %v1068_v25 = vadd.f32 %v2577_v23, %v941_v22  ;;  %v933_v26 = vadd.f32 %v932_v24, %v835_v0 }
 0x10c   : > { %v2570_v28 = vpop.f32.mrf.mxu0  ;;  %v2580_v31 = vpop.f32.mrf.mxu1 }
 0x10d   : > { %v1066_v29 = vadd.f32 %v1037_v27, %v933_v26  ;;  %v954_v30 = vadd.f32 %v2570_v28, %v2560_v3 }
 0x10e   : > { %v945_v32 = vpop.f32.mrf.mxu0  ;;  %v1050_v35 = vpop.f32.mrf.mxu1 }
 0x10f   : > { %v1071_v33 = vadd.f32 %v2580_v31, %v954_v30  ;;  %v946_v34 = vadd.f32 %v945_v32, %v848_v6 }
 0x110   : > { %v2571_v36 = vpop.f32.mrf.mxu0  ;;  %v2581_v39 = vpop.f32.mrf.mxu1 }
 0x111   : > { %v1069_v37 = vadd.f32 %v1050_v35, %v946_v34  ;;  %v957_v38 = vadd.f32 %v2571_v36, %v2561_v9 }
 0x112   : > { %v948_v40 = vpop.f32.mrf.mxu0  ;;  %v1053_v43 = vpop.f32.mrf.mxu1 }
 0x113   : > { %v1072_v41 = vadd.f32 %v2581_v39, %v957_v38  ;;  %v949_v42 = vadd.f32 %v948_v40, %v851_v12 }
 0x114   : > { %v2586_v44 = vpop.f32.mrf.mxu0  ;;  %v2596_v47 = vpop.f32.mrf.mxu1 }
 0x115   : > { %v1070_v45 = vadd.f32 %v1053_v43, %v949_v42  ;;  %v1180_v46 = vadd.f32 %v2586_v44, %v1067_v17 }
 0x116   : > { %v1147_v48 = vpop.f32.mrf.mxu0  ;;  %v1260_v51 = vpop.f32.mrf.mxu1 }
 0x117   : > { %v3126_v49 = vadd.f32 %v2596_v47, %v1180_v46  ;;  %v1178_v50 = vadd.f32 %v1147_v48, %v1065_v21 }
 0x118   : > { %v2587_v52 = vpop.f32.mrf.mxu0  ;;  %v2597_v58 = vpop.f32.mrf.mxu1 }
 0x119   : > { %v3130_v55 = vadd.f32 %v1260_v51, %v1178_v50  ;;  %v1181_v56 = vadd.f32 %v2587_v52, %v1068_v25 }
 0x11a   : > { %v1150_v59 = vpop.f32.mrf.mxu0  ;;  %v1263_v1 = vpop.f32.mrf.mxu1 }
 0x11b   : > { %3306 = vst [vmem:[#allocation8_spill] sm:$0xff] %v3130_v55  ;;  %v3134_v62 = vadd.f32 %v2597_v58, %v1181_v56  ;;  %v1179_v0 = vadd.f32 %v1150_v59, %v1066_v29 }
 0x11c   : > { %v2590_v3 = vpop.f32.mrf.mxu0  ;;  %v2600_v9 = vpop.f32.mrf.mxu1 }
 0x11d   : > { %3307 = vst [vmem:[#allocation9_spill] sm:$0xff] %v3134_v62  ;;  %v3138_v6 = vadd.f32 %v1263_v1, %v1179_v0  ;;  %v1184_v7 = vadd.f32 %v2590_v3, %v1071_v33 }
 0x11e   : > { %v1163_v10 = vpop.f32.mrf.mxu0  ;;  %v1276_v15 = vpop.f32.mrf.mxu1 }
 0x11f   : > { %3308 = vst [vmem:[#allocation10_spill] sm:$0xff] %v3138_v6  ;;  %v3142_v13 = vadd.f32 %v2600_v9, %v1184_v7  ;;  %v1182_v14 = vadd.f32 %v1163_v10, %v1069_v37 }
 0x120   : > { %v2591_v16 = vpop.f32.mrf.mxu0  ;;  %v2601_v20 = vpop.f32.mrf.mxu1 }
 0x121   : > { %3309 = vst [vmem:[#allocation11_spill] sm:$0xff] %v3142_v13  ;;  %v3146_v18 = vadd.f32 %v1276_v15, %v1182_v14  ;;  %v1185_v19 = vadd.f32 %v2591_v16, %v1072_v41 }
 0x122   : > { %v1166_v21 = vpop.f32.mrf.mxu0  ;;  %v1279_v25 = vpop.f32.mrf.mxu1 }
 0x123   : > { %3310 = vst [vmem:[#allocation12_spill] sm:$0xff] %v3146_v18  ;;  %v3150_v23 = vadd.f32 %v2601_v20, %v1185_v19  ;;  %v1183_v24 = vadd.f32 %v1166_v21, %v1070_v45 }
 0x124   : > { %v2606_v26 = vpop.f32.mrf.mxu0  ;;  %v2616_v29 = vpop.f32.mrf.mxu1 }
 0x125   : > { %3311 = vst [vmem:[#allocation13_spill] sm:$0xff] %v3150_v23  ;;  %v3154_v28 = vadd.f32 %v1279_v25, %v1183_v24  ;;  %v1415_v13 = vadd.f32 %v2616_v29, %v2606_v26 }
 0x126   : > { %v1341_v30 = vpop.f32.mrf.mxu0  ;;  %v1406_v32 = vpop.f32.mrf.mxu1 }
 0x127   : > { %3312 = vst [vmem:[#allocation14_spill] sm:$0xff] %v3154_v28  ;;  %v1407_v63 = vadd.f32 %v1406_v32, %v1341_v30 }
 0x128   : > { %v2607_v33 = vpop.f32.mrf.mxu0  ;;  %v2617_v34 = vpop.f32.mrf.mxu1 }
 0x12a   : > { %v1344_v35 = vpop.f32.mrf.mxu0  ;;  %v1409_v36 = vpop.f32.mrf.mxu1 }
 0x12c   : > { %v2610_v37 = vpop.f32.mrf.mxu0  ;;  %v2620_v38 = vpop.f32.mrf.mxu1 }
 0x12e   : > { %v3158_v39 = vpop.f32.mrf.mxu0  ;;  %v3160_v40 = vpop.f32.mrf.mxu1 }
 0x130   : > { %v3162_v41 = vpop.f32.mrf.mxu0  ;;  %v3164_v42 = vpop.f32.mrf.mxu1 }
 0x132   : > { %v3166_v43 = vpop.f32.mrf.mxu0  ;;  %v3168_v44 = vpop.f32.mrf.mxu1 }
 0x134   : > { %v2626_v45 = vpop.f32.mrf.mxu0  ;;  %v2636_v46 = vpop.f32.mrf.mxu1 }
 0x136   : > { %v1471_v47 = vpop.f32.mrf.mxu0  ;;  %v1544_v48 = vpop.f32.mrf.mxu1 }
 0x137   : > { %v1502_v60 = vadd.f32 %v1471_v47, %v1407_v63  ;;  %v1434_v63 = vadd.f32 %v3164_v42, %v3162_v41  ;;  %v3325_v41 = vmax.f32 %v3110_v54, %v3126_v49 }
 0x138   : > { %v2627_v50 = vpop.f32.mrf.mxu0  ;;  %v3170_v51 = vpop.f32.mrf.mxu1 }
 0x139   : > { %v1575_v30 = vadd.f32 %v1544_v48, %v1502_v60 }
 0x13a   : > { %v1474_v52 = vpop.f32.mrf.mxu0  ;;  %v3172_v56 = vpop.f32.mrf.mxu1 }
 0x13c   : > { %v2630_v58 = vpop.f32.mrf.mxu0  ;;  %v3174_v59 = vpop.f32.mrf.mxu1 }
 0x13e   : > { %v3176_v0 = vpop.f32.mrf.mxu0  ;;  %v3178_v1 = vpop.f32.mrf.mxu1 }
 0x13f   : > { %3313 = vst [vmem:[#allocation15_spill] sm:$0xff] %v3178_v1 }
 0x140   : > { %v3180_v3 = vpop.f32.mrf.mxu0  ;;  %v3182_v7 = vpop.f32.mrf.mxu1 }
 0x141   : > { %3314 = vst [vmem:[#allocation16_spill] sm:$0xff] %v3182_v7 }
 0x142   : > { %v3184_v9 = vpop.f32.mrf.mxu0  ;;  %v3186_v10 = vpop.f32.mrf.mxu1 }
 0x143   : > { %3315 = vst [vmem:[#allocation17_spill] sm:$0xff] %v3186_v10  ;;  %v1431_v10 = vadd.f32 %v2620_v38, %v2610_v37 }
 0x144   : > { %v2646_v14 = vpop.f32.mrf.mxu0  ;;  %v2656_v15 = vpop.f32.mrf.mxu1 }
 0x145   : > { %v1508_v26 = vadd.f32 %v2630_v58, %v1431_v10 }
 0x146   : > { %v1657_v16 = vpop.f32.mrf.mxu0  ;;  %v1738_v19 = vpop.f32.mrf.mxu1  ;;  %v3331_v10 = vld [vmem:[#allocation15_spill] sm:$0xff] }
 0x147   : > { %v1581_v37 = vadd.f32 %v3174_v59, %v1508_v26 }
 0x148   : > { %v2647_v20 = vpop.f32.mrf.mxu0  ;;  %v2657_v21 = vpop.f32.mrf.mxu1 }
 0x14a   : > { %v3188_v24 = vpop.f32.mrf.mxu0  ;;  %v1741_v25 = vpop.f32.mrf.mxu1 }
 0x14b   : > { %3316 = vst [vmem:[#allocation18_spill] sm:$0xff] %v3188_v24 }
 0x14c   : > { %v3190_v31 = vpop.f32.mrf.mxu0  ;;  %v3192_v27 = vpop.f32.mrf.mxu1 }
 0x14d   : > { %3317 = vst [vmem:[#allocation19_spill] sm:$0xff] %v3190_v31  ;;  %3318 = vst [vmem:[#allocation20_spill] sm:$0xff] %v3192_v27 }
 0x14e   : > { %v3194_v22 = vpop.f32.mrf.mxu0  ;;  %v3196_v17 = vpop.f32.mrf.mxu1 }
 0x14f   : > { %3319 = vst [vmem:[#allocation21_spill] sm:$0xff] %v3194_v22  ;;  %3320 = vst [vmem:[#allocation22_spill] sm:$0xff] %v3196_v17  ;;  %v1504_v22 = vadd.f32 %v2626_v45, %v1415_v13 }
 0x150   : > { %v3198_v12 = vpop.f32.mrf.mxu0  ;;  %v3200_v4 = vpop.f32.mrf.mxu1 }
 0x151   : > { %3321 = vst [vmem:[#allocation23_spill] sm:$0xff] %v3198_v12  ;;  %3322 = vst [vmem:[#allocation24_spill] sm:$0xff] %v3200_v4  ;;  %v1418_v12 = vadd.f32 %v2617_v34, %v2607_v33  ;;  %v1577_v1 = vadd.f32 %v2636_v46, %v1504_v22  ;;  %v1423_v33 = vadd.f32 %v3160_v40, %v3158_v39 }
 0x152   : > { %v3202_v61 = vpop.f32.mrf.mxu0  ;;  %v3204_v53 = vpop.f32.mrf.mxu1  ;;  %v1688_v22 = vadd.f32 %v1657_v16, %v1575_v30  ;;  %v3333_v16 = vld [vmem:[#allocation17_spill] sm:$0xff] }
 0x153   : > { %3323 = vst [vmem:[#allocation25_spill] sm:$0xff] %v3202_v61  ;;  %3324 = vst [vmem:[#allocation26_spill] sm:$0xff] %v3204_v53  ;;  %v1410_v61 = vadd.f32 %v1409_v36, %v1344_v35  ;;  %v1505_v17 = vadd.f32 %v2627_v50, %v1418_v12  ;;  %v1690_v13 = vadd.f32 %v2646_v14, %v1577_v1  ;;  %v3328_v50 = vld [vmem:[#allocation18_spill] sm:$0xff]  ;;  %v3332_v14 = vld [vmem:[#allocation16_spill] sm:$0xff] }
 0x154   : > { %v2666_v28 = vpop.f32.mrf.mxu0  ;;  %v2676_v11 = vpop.f32.mrf.mxu1  ;;  %v1426_v12 = vadd.f32 %v3168_v44, %v3166_v43 }
 0x155   : > { %v1812_v53 = vadd.f32 %v2666_v28, %v2656_v15  ;;  %v1503_v24 = vadd.f32 %v1474_v52, %v1410_v61  ;;  %v1578_v61 = vadd.f32 %v3170_v51, %v1505_v17  ;;  %v1698_v17 = vmax.f32 %v3325_v41, %v1690_v13 }
 0x156   : > { %v1803_v23 = vpop.f32.mrf.mxu0  ;;  %v1868_v8 = vpop.f32.mrf.mxu1 }
 0x157   : > { %v1804_v29 = vadd.f32 %v1803_v23, %v1738_v19  ;;  %v1901_v34 = vadd.f32 %v2676_v11, %v1812_v53  ;;  %v1576_v36 = vadd.f32 %v3172_v56, %v1503_v24  ;;  %v1506_v11 = vadd.f32 %v3176_v0, %v1423_v33  ;;  %v3329_v56 = vld [vmem:[#allocation20_spill] sm:$0xff]  ;;  %v3330_v0 = vld [vmem:[#allocation22_spill] sm:$0xff]  ;;  %v3338_v33 = vld [vmem:[#allocation19_spill] sm:$0xff] }
 0x158   : > { %v2667_v18 = vpop.f32.mrf.mxu0  ;;  %v2677_v5 = vpop.f32.mrf.mxu1  ;;  %v1509_v53 = vadd.f32 %v3180_v3, %v1434_v63  ;;  %v3334_v19 = vld [vmem:[#allocation24_spill] sm:$0xff]  ;;  %v1694_v63 = vadd.f32 %v3338_v33, %v1581_v37  ;;  %v3355_v33 = vld [vmem:[#allocation7_spill] sm:$0xff] }
 0x159   : > { %v1815_v28 = vadd.f32 %v2667_v18, %v2657_v21  ;;  %v1899_v38 = vadd.f32 %v1868_v8, %v1804_v29  ;;  %v1507_v18 = vadd.f32 %v3184_v9, %v1426_v12  ;;  %v3326_v8 = vld [vmem:[#allocation8_spill] sm:$0xff]  ;;  %v1689_v51 = vadd.f32 %v3328_v50, %v1576_v36  ;;  %v3335_v21 = vld [vmem:[#allocation2_spill] sm:$0xff]  ;;  %v3348_v50 = vld [vmem:[#allocation5_spill] sm:$0xff] }
 0x15a   : > { %v1806_v2 = vpop.f32.mrf.mxu0  ;;  %v1871_v6 = vpop.f32.mrf.mxu1  ;;  %v3327_v47 = vmax.f32 %v3112_v57, %v3326_v8  ;;  %v1579_v57 = vadd.f32 %v3331_v10, %v1506_v11  ;;  %v1582_v15 = vadd.f32 %v3332_v14, %v1509_v53  ;;  %v3343_v53 = vld [vmem:[#allocation23_spill] sm:$0xff]  ;;  %v3344_v41 = vld [vmem:[#allocation26_spill] sm:$0xff]  ;;  %v3345_v8 = vld [vmem:[#allocation4_spill] sm:$0xff] }
 0x15b   : > { %v1807_v23 = vadd.f32 %v1806_v2, %v1741_v25  ;;  %v1691_v2 = vadd.f32 %v2647_v20, %v1578_v61  ;;  %v1902_v43 = vadd.f32 %v2677_v5, %v1815_v28  ;;  %v3236_v5 = vld [vmem:[%s3285_s2] ss:$0 sm:$0xff]  ;;  %v3354_v14 = vld [vmem:[#allocation25_spill] sm:$0xff] }
 0x15c   : > { %v2670_v31 = vpop.f32.mrf.mxu0  ;;  %v3206_v62 = vpop.f32.mrf.mxu1  ;;  %v1696_v48 = vmax.f32 %v3327_v47, %v1688_v22 }
 0x15d   : > { %v1900_v52 = vadd.f32 %v1871_v6, %v1807_v23  ;;  %v1828_v58 = vadd.f32 %v2670_v31, %v3329_v56  ;;  %v1580_v6 = vadd.f32 %v3333_v16, %v1507_v18  ;;  %v3341_v23 = vld [vmem:[#allocation10_spill] sm:$0xff]  ;;  %v1695_v18 = vadd.f32 %v3343_v53, %v1582_v15 }
 0x15e   : > { %v1819_v4 = vpop.f32.mrf.mxu0  ;;  %v3208_v7 = vpop.f32.mrf.mxu1 }
 0x15f   : > { %v1820_v1 = vadd.f32 %v1819_v4, %v3330_v0  ;;  %v3336_v4 = vld [vmem:[#allocation9_spill] sm:$0xff]  ;;  %v1905_v12 = vadd.f32 %v3206_v62, %v1828_v58  ;;  %v1693_v15 = vadd.f32 %v3354_v14, %v1580_v6 }
 0x160   : > { %v2671_v27 = vpop.f32.mrf.mxu0  ;;  %v2681_v55 = vpop.f32.mrf.mxu1  ;;  %v3337_v24 = vmax.f32 %v3335_v21, %v3336_v4 }
 0x161   : > { %v1831_v31 = vadd.f32 %v2671_v27, %v3334_v19  ;;  %v3340_v27 = vld [vmem:[#allocation3_spill] sm:$0xff] }
 0x162   : > { %v1822_v32 = vpop.f32.mrf.mxu0  ;;  %v3214_v35 = vpop.f32.mrf.mxu1  ;;  %v1699_v25 = vmax.f32 %v3337_v24, %v1691_v2 }
 0x163   : > { %v1906_v37 = vadd.f32 %v2681_v55, %v1831_v31 }
 0x164   : > { %v2686_v60 = vpop.f32.mrf.mxu0  ;;  %v2696_v40 = vpop.f32.mrf.mxu1 }
 0x165   : > { %v1974_v39 = vadd.f32 %v2686_v60, %v1901_v34  ;;  %v3339_v34 = vld [vmem:[#allocation21_spill] sm:$0xff]  ;;  %v3342_v60 = vmax.f32 %v3340_v27, %v3341_v23 }
 0x166   : > { %v1941_v42 = vpop.f32.mrf.mxu0  ;;  %v2054_v46 = vpop.f32.mrf.mxu1  ;;  %v1692_v28 = vadd.f32 %v3339_v34, %v1579_v57 }
 0x167   : > { %v2087_v44 = vadd.f32 %v2696_v40, %v1974_v39  ;;  %v1972_v45 = vadd.f32 %v1941_v42, %v1899_v38  ;;  %v1697_v36 = vmax.f32 %v3342_v60, %v1689_v51  ;;  %v1903_v38 = vadd.f32 %v3208_v7, %v1820_v1  ;;  %v3346_v7 = vld [vmem:[#allocation11_spill] sm:$0xff]  ;;  %v3349_v51 = vld [vmem:[#allocation12_spill] sm:$0xff] }
 0x168   : > { %v2687_v59 = vpop.f32.mrf.mxu0  ;;  %v2697_v9 = vpop.f32.mrf.mxu1  ;;  %v3347_v47 = vmax.f32 %v3345_v8, %v3346_v7 }
 0x169   : > { %v2095_v54 = vmax.f32 %v1698_v17, %v2087_v44  ;;  %v2085_v49 = vadd.f32 %v2054_v46, %v1972_v45  ;;  %v1975_v3 = vadd.f32 %v2687_v59, %v1902_v43  ;;  %v1823_v17 = vadd.f32 %v1822_v32, %v3344_v41 }
 0x16a   : > { %v1944_v20 = vpop.f32.mrf.mxu0  ;;  %v2057_v13 = vpop.f32.mrf.mxu1 }
 0x16b   : > { %v2093_v26 = vmax.f32 %v1696_v48, %v2085_v49  ;;  %v2088_v29 = vadd.f32 %v2697_v9, %v1975_v3  ;;  %v1973_v30 = vadd.f32 %v1944_v20, %v1900_v52  ;;  %v2110_v61 = vadd.f32 %v3236_v5, %v2095_v54  ;;  %v3351_v3 = vld [vmem:[#allocation6_spill] sm:$0xff]  ;;  %v3352_v9 = vld [vmem:[#allocation13_spill] sm:$0xff] }
 0x16c   : > { %v2690_v22 = vpop.f32.mrf.mxu0  ;;  %v2700_v11 = vpop.f32.mrf.mxu1  ;;  %v1702_v48 = vmax.f32 %v3347_v47, %v1694_v63  ;;  %v3350_v52 = vmax.f32 %v3348_v50, %v3349_v51  ;;  %v3353_v10 = vmax.f32 %v3351_v3, %v3352_v9  ;;  %v1904_v16 = vadd.f32 %v3214_v35, %v1823_v17  ;;  %v3356_v35 = vld [vmem:[#allocation14_spill] sm:$0xff] }
 0x16d   : > { %v2096_v39 = vmax.f32 %v1699_v25, %v2088_v29  ;;  %v2086_v40 = vadd.f32 %v2057_v13, %v1973_v30  ;;  %v1978_v42 = vadd.f32 %v2690_v22, %v1905_v12  ;;  %v2108_v62 = vadd.f32 %v3236_v5, %v2093_v26 }
 0x16e   : > { %v1957_v2 = vpop.f32.mrf.mxu0  ;;  %v2070_v46 = vpop.f32.mrf.mxu1  ;;  %v1700_v55 = vmax.f32 %v3350_v52, %v1692_v28  ;;  %v2118_v56 = vmax.f32 %v2110_v61, 0.0  ;;  %v1703_v57 = vmax.f32 %v3353_v10, %v1695_v18  ;;  %v3357_v63 = vmax.f32 %v3355_v33, %v3356_v35 }
 0x16f   : > { %v2111_v43 = vadd.f32 %v3236_v5, %v2096_v39  ;;  %v2094_v44 = vmax.f32 %v1697_v36, %v2086_v40  ;;  %v1976_v45 = vadd.f32 %v1957_v2, %v1903_v38  ;;  %v2091_v32 = vadd.f32 %v2700_v11, %v1978_v42 }
 0x170   : > { %v2691_v58 = vpop.f32.mrf.mxu0  ;;  %v2701_v49 = vpop.f32.mrf.mxu1  ;;  %v2116_v20 = vmax.f32 %v2108_v62, 0.0  ;;  %v1701_v34 = vmax.f32 %v3357_v63, %v1693_v15 }
 0x171   : > { %v2119_v59 = vmax.f32 %v2111_v43, 0.0  ;;  %v2109_v0 = vadd.f32 %v3236_v5, %v2094_v44  ;;  %v2089_v1 = vadd.f32 %v2070_v46, %v1976_v45  ;;  %v1979_v54 = vadd.f32 %v2691_v58, %v1906_v37 }
 0x172   : > { %v2099_v19 = vmax.f32 %v1702_v48, %v2091_v32  ;;  %v1960_v31 = vpop.f32.mrf.mxu0  ;;  %v2073_v6 = vpop.f32.mrf.mxu1 }
 0x173   : > { %v2387_v21 = vpack.c.bf16 %v2119_v59, %v2118_v56  ;;  %v2117_v4 = vmax.f32 %v2109_v0, 0.0  ;;  %v2092_v24 = vadd.f32 %v2701_v49, %v1979_v54  ;;  %v2097_v25 = vmax.f32 %v1700_v55, %v2089_v1 }
 0x174   : > { %v1977_v26 = vadd.f32 %v1960_v31, %v1904_v16  ;;  %v2114_v30 = vadd.f32 %v3236_v5, %v2099_v19 }
 0x175   : > { %2399 = vst [vmem:[%s170_s6 + $0x8] sm:$0xff] %v2387_v21   ;;  %v2382_v29 = vpack.c.bf16 %v2117_v4, %v2116_v20  ;;  %v2100_v13 = vmax.f32 %v1703_v57, %v2092_v24  ;;  %v2112_v61 = vadd.f32 %v3236_v5, %v2097_v25 }
 0x176   : > { %v2090_v28 = vadd.f32 %v2073_v6, %v1977_v26  ;;  %v2122_v27 = vmax.f32 %v2114_v30, 0.0 }
 0x177   : > { %2383 = vst [vmem:[%s170_s6] sm:$0xff] %v2382_v29   ;;  %v2115_v12 = vadd.f32 %v3236_v5, %v2100_v13  ;;  %v2120_v38 = vmax.f32 %v2112_v61, 0.0 }
 0x178   : > { %v2098_v22 = vmax.f32 %v1701_v34, %v2090_v28 }
 0x179   : > { %v2123_v23 = vmax.f32 %v2115_v12, 0.0 }
 0x17a   : > { %v2113_v60 = vadd.f32 %v3236_v5, %v2098_v22 }
 0x17b   : > { %v2397_v36 = vpack.c.bf16 %v2123_v23, %v2122_v27 }
 0x17c   : > { %v2121_v39 = vmax.f32 %v2113_v60, 0.0 }
 0x17d   : > { %2401 = vst [vmem:[%s170_s6 + $0x18] sm:$0xff] %v2397_v36  }
 0x17e   : > { %v2392_v40 = vpack.c.bf16 %v2121_v39, %v2120_v38 }
 0x180   : > { %2400 = vst [vmem:[%s170_s6 + $0x10] sm:$0xff] %v2392_v40  }
 0x181 PF: > { %s13_s12 = sadd.s32 1, %s2766_s12  }
 0x182   : > { %p10_p4 = scmp.ge.s32.totalorder %s13_s12, 4  }
 0x184   :  { %12 = sbr.rel (!%p10_p4) target bundleno = 1 (0x1), region = 66 }

// kernel: cnn_forward.4
= control target key start
LH: loop header
LB: loop body
LE: loop exit
PB: predicated region body
PF: predicated region fallthrough
CT: control target
= control target key end

     0   :  { %s2044_s12 = smov 0   ;;  %s2534_s0 = inlined_call_operand.vmem [shape: bf16[2,96,80], index: 0, kind: input, shape index: {}]   ;;  %s2535_s1 = inlined_call_operand.vmem [shape: bf16[5,80,128], index: 1, kind: input, shape index: {}]   ;;  %s2536_s2 = inlined_call_operand.vmem [shape: f32[1,128], index: 2, kind: input, shape index: {}]   ;;  %s2537_s3 = inlined_call_operand.vmem [shape: bf16[2,16,128], index: 3, kind: output, shape index: {}]  }
   0x1 LB: > { %s1440_s13 = sadd.s32 4294967295, %s2020_s12   ;;  %p1444_p0 = scmp.ge.s32.totalorder %s2020_s12, 1  ;;  %s2020_s12 = sphi %s2044_s12, %s13_s12  }
   0x2   : > { %p137_p1 = scmp.lt.s32.totalorder %s2020_s12, 3 }
   0x4   : > { %p138_p2 = pnand %p1444_p0, %p137_p1 }
   0x5   : > { %p161_p3 = scmp.lt.s32.totalorder (!%p138_p2), %s1440_s13, 1 }
   0x6   : > { %141 = sbr.rel (%p138_p2) target bundleno = 422 (0x1a6), region = 32 }
   0xb   : > { %v2055_v0 = vld [vmem:[%s2535_s1 + $0x48] sm:$0xff]   ;;  %v2022_v1 = vmov 0.0   ;;  %v2062_v2 = vld [vmem:[%s2535_s1 + $0x20] sm:$0xff]   ;;  %vm2023_vm0 = vmmov 0   ;;  %v2077_v4 = vld [vmem:[%s2535_s1 + $0x18] sm:$0xff]   ;;  %s2539_s13 = smov (!%p161_p3, %s1440_s13), 1 }
   0xc   : > { %1682 = vmatprep.subr.bf16.mxu0 %v2022_v1  ;;  %1696 = vmatprep.subr.bf16.mxu1 %v2022_v1  ;;  %v2068_v3 = vld [vmem:[%s2535_s1 + $0x40] sm:$0xff]   ;;  %v2088_v5 = vld [vmem:[%s2535_s1 + $0x38] sm:$0xff]   ;;  %s1962_s24 = smul.u32 48, %s2539_s13  ;;  %v2096_v6 = vld [vmem:[%s2535_s1 + $0x10] sm:$0xff]   ;;  %vm232_vm1 = vcmask 654336   ;;  %vm378_vm2 = vcmask 1045504  }
   0xd   : > { %1683 = vmatpush3.bf16.msra.mxu0 %v2055_v0  ;;  %1692 = vmatprep.mubr.msk.bf16.mxu0 %vm2023_vm0, %v2022_v1  ;;  %v2108_v7 = vld [vmem:[%s2535_s1 + $0x30] sm:$0xff]   ;;  %v2115_v8 = vld [vmem:[%s2535_s1 + $0x8] sm:$0xff]   ;;  %v2129_v10 = vld [vmem:[%s2535_s1] sm:$0xff]   ;;  %s1554_s20 = sshll.u32 %s2539_s13, 3 }
   0xe   : > { %1697 = vmatpush3.bf16.msra.mxu1 %v2062_v2  ;;  %1684 = vmatprep.subr.bf16.mxu0 %v2022_v1  ;;  %s2102_s29 = scalar_lea.vmem %s2534_s0, %s1962_s24  ;;  %v2122_v9 = vld [vmem:[%s2535_s1 + $0x28] sm:$0xff]   ;;  %v2140_v13 = vld [vmem:[%s2535_s1 + $0x70] sm:$0xff]   ;;  %v2147_v14 = vld [vmem:[%s2535_s1 + $0x98] sm:$0xff]   ;;  %s170_s23 = scalar_lea.vmem %s2537_s3, %s1554_s20 }
   0xf   : > { %1698 = vmatprep.subr.bf16.mxu1 %v2022_v1  ;;  %1706 = vmatprep.mubr.msk.bf16.mxu1 %vm2023_vm0, %v2022_v1  ;;  %v2133_v11 = vld [vmem:[%s2102_s29 + $0x18] sm:$0xff]   ;;  %v1984_v12 = vld [vmem:[%s2102_s29] sm:$0xff]   ;;  %v2157_v15 = vld [vmem:[%s2535_s1 + $0x68] sm:$0xff]  }
  0x10   : > { %v2164_v16 = vld [vmem:[%s2535_s1 + $0x90] sm:$0xff]   ;;  %v2170_v17 = vld [vmem:[%s2535_s1 + $0x60] sm:$0xff]   ;;  %v2177_v18 = vld [vmem:[%s2535_s1 + $0x88] sm:$0xff]  }
  0x11   : > { %1685 = vmatpush3.bf16.msra.mxu0 %v2068_v3  ;;  %v356_v19 = vld [vmem:[%s2102_s29] sm:$0xc]  ;;  %v357_v20 = vld [vmem:[%s2102_s29 + $0x4] sm:$0xf]  ;;  %v458_v21 = vld [vmem:[%s2102_s29 + $0x18] sm:$0xc] }
  0x12   : > { %1699 = vmatpush3.bf16.msra.mxu1 %v2077_v4  ;;  %1686 = vmatprep.subr.bf16.mxu0 %v2022_v1  ;;  %v1996_v22 = vld [vmem:[%s2102_s29 + $0x8] ss:$0 sps:$4 sm:$0x33]   ;;  %v2190_v23 = vld [vmem:[%s2102_s29 + $0x1c] sm:$0xf]  ;;  %v1482_v25 = vcombine.low %v356_v19, %v357_v20  ;;  %v2204_v27 = vld [vmem:[%s2535_s1 + $0x80] sm:$0xff]  }
  0x13   : > { %1700 = vmatprep.subr.bf16.mxu1 %v2022_v1  ;;  %v2196_v24 = vld [vmem:[%s2535_s1 + $0x58] sm:$0xff]   ;;  %v1998_v26 = vld [vmem:[%s2102_s29 + $0x20] ss:$0 sps:$4 sm:$0x33]   ;;  %v1500_v28 = vcombine.low %v458_v21, %v2190_v23  ;;  %v2212_v29 = vld [vmem:[%s2535_s1 + $0x50] sm:$0xff]   ;;  %v380_v31 = vrot.slane %v1996_v22, 2 }
  0x14   : > { %v379_v30 = vrot.slane %v1482_v25, 2  ;;  %v2219_v32 = vld [vmem:[%s2535_s1 + $0x78] sm:$0xff]   ;;  %v481_v34 = vrot.slane %v1998_v26, 2  ;;  %v2223_v35 = vld [vmem:[%s2102_s29 + $0x20] sm:$0xf]  ;;  %v2263_v41 = vld [vmem:[%s2535_s1 + $0xb0] sm:$0xff]  }
  0x15   : > { %1687 = vmatpush3.bf16.msra.mxu0 %v2088_v5  ;;  %v480_v33 = vrot.slane %v1500_v28, 2  ;;  %v1541_v36 = vcombine.low %v2190_v23, %v2223_v35  ;;  %v2234_v38 = vld [vmem:[%s2535_s1 + $0xc0] sm:$0xff]   ;;  %v2250_v40 = vld [vmem:[%s2535_s1 + $0xb8] sm:$0xff]   ;;  %v2272_v42 = vld [vmem:[%s2535_s1 + $0xa8] sm:$0xff]  }
  0x16   : > { %1701 = vmatpush3.bf16.msra.mxu1 %v2096_v6  ;;  %1688 = vmatprep.subr.bf16.mxu0 %v2022_v1  ;;  %v2229_v37 = vsel %vm378_vm2, %v379_v30, %v380_v31  ;;  %v2281_v43 = vld [vmem:[%s2535_s1 + $0xa0] sm:$0xff]   ;;  %v559_v44 = vld [vmem:[%s2102_s29 + $0x8] sm:$0xf]  ;;  %v752_v47 = vld [vmem:[%s2102_s29 + $0xc] sm:$0xc] }
  0x17   : > { %1702 = vmatprep.subr.bf16.mxu1 %v2022_v1  ;;  %v2238_v39 = vsel %vm378_vm2, %v480_v33, %v481_v34  ;;  %v2287_v45 = vcombine.low %v357_v20, %v559_v44  ;;  %v2291_v46 = vld [vmem:[%s2102_s29 + $0x24] sm:$0xff]   ;;  %v753_v48 = vld [vmem:[%s2102_s29 + $0x10] sm:$0xf]  ;;  %v2008_v49 = vld [vmem:[%s2102_s29 + $0x14] ss:$0 sps:$4 sm:$0x33]  }
  0x18   : > { %v1529_v50 = vcombine.low %v752_v47, %v753_v48  ;;  %v2319_v51 = vld [vmem:[%s2102_s29 + $0x28] sm:$0xf]  ;;  %v2322_v52 = vld [vmem:[%s2102_s29 + $0x2c] sm:$0xf]  ;;  %v764_v55 = vrot.slane %v2008_v49, 2 }
  0x19   : > { %1689 = vmatpush3.bf16.msra.mxu0 %v2108_v7  ;;  %v1547_v53 = vcombine.low %v2319_v51, %v2322_v52  ;;  %v2006_v56 = vld [vmem:[%s2102_s29 + $0xc] sm:$0xff]   ;;  %v812_v58 = vld [vmem:[%s2102_s29 + $0x24] sm:$0xc]  ;;  %v872_v63 = vld [vmem:[%s2102_s29 + $0x14] sm:$0xf] }
  0x1a   : > { %1703 = vmatpush3.bf16.msra.mxu1 %v2115_v8  ;;  %1690 = vmatprep.subr.bf16.mxu0 %v2022_v1  ;;  %v763_v54 = vrot.slane %v1529_v50, 2  ;;  %v1532_v59 = vcombine.low %v812_v58, %v2319_v51  ;;  %v2010_v60 = vld [vmem:[%s2102_s29 + $0x2c] ss:$0 sps:$4 sm:$0x33]   ;;  %v2370_v19 = vcombine.low %v753_v48, %v872_v63 }
  0x1b   : > { %1704 = vmatprep.subr.bf16.mxu1 %v2022_v1  ;;  %v824_v62 = vrot.slane %v2010_v60, 2 }
  0x1c   : > { %v2335_v57 = vsel %vm378_vm2, %v763_v54, %v764_v55  ;;  %v823_v61 = vrot.slane %v1532_v59, 2 }
  0x1d   : > { %1691 = vmatpush3.bf16.msra.mxu0 %v2122_v9 }
  0x1e   : > { %1705 = vmatpush3.bf16.msra.mxu1 %v2129_v10  ;;  %1710 = vmatprep.subr.bf16.mxu0 %v2022_v1 }
  0x1f   : > { %1724 = vmatprep.subr.bf16.mxu1 %v2022_v1 }
  0x20   : > { %1693 = vmatmul.mubr.msk.bf16.vlgmr.msra.gmra.mxu0 %vm232_vm1, %v2133_v11 }
  0x21   : > { %1707 = vmatmul.mubr.msk.bf16.vlgmr.msra.gmra.mxu1 %vm232_vm1, %v1984_v12  ;;  %1711 = vmatpush3.bf16.msra.mxu0 %v2140_v13  ;;  %v2368_v12 = vsel %vm378_vm2, %v823_v61, %v824_v62 }
  0x22   : > { %1725 = vmatpush3.bf16.msra.mxu1 %v2147_v14  ;;  %1712 = vmatprep.subr.bf16.mxu0 %v2022_v1 }
  0x23   : > { %1726 = vmatprep.subr.bf16.mxu1 %v2022_v1  ;;  %1720 = vmatprep.mubr.msk.bf16.mxu0 %vm2023_vm0, %v2022_v1 }
  0x24   : > { %1734 = vmatprep.mubr.msk.bf16.mxu1 %vm2023_vm0, %v2022_v1 }
  0x25   : > { %1713 = vmatpush3.bf16.msra.mxu0 %v2157_v15 }
  0x26   : > { %1727 = vmatpush3.bf16.msra.mxu1 %v2164_v16  ;;  %1714 = vmatprep.subr.bf16.mxu0 %v2022_v1 }
  0x27   : > { %1728 = vmatprep.subr.bf16.mxu1 %v2022_v1 }
  0x29   : > { %1715 = vmatpush3.bf16.msra.mxu0 %v2170_v17 }
  0x2a   : > { %1729 = vmatpush3.bf16.msra.mxu1 %v2177_v18  ;;  %1716 = vmatprep.subr.bf16.mxu0 %v2022_v1 }
  0x2b   : > { %1730 = vmatprep.subr.bf16.mxu1 %v2022_v1 }
  0x2d   : > { %1717 = vmatpush3.bf16.msra.mxu0 %v2196_v24 }
  0x2e   : > { %1731 = vmatpush3.bf16.msra.mxu1 %v2204_v27  ;;  %1718 = vmatprep.subr.bf16.mxu0 %v2022_v1 }
  0x2f   : > { %1732 = vmatprep.subr.bf16.mxu1 %v2022_v1 }
  0x31   : > { %1719 = vmatpush3.bf16.msra.mxu0 %v2212_v29 }
  0x32   : > { %1733 = vmatpush3.bf16.msra.mxu1 %v2219_v32  ;;  %1738 = vmatprep.subr.bf16.mxu0 %v2022_v1 }
  0x33   : > { %1752 = vmatprep.subr.bf16.mxu1 %v2022_v1 }
  0x34   : > { %1721 = vmatmul.mubr.msk.bf16.vlgmr.msra.gmra.mxu0 %vm232_vm1, %v2229_v37 }
  0x35   : > { %1735 = vmatmul.mubr.msk.bf16.vlgmr.msra.gmra.mxu1 %vm232_vm1, %v2238_v39  ;;  %1739 = vmatpush3.bf16.msra.mxu0 %v2234_v38 }
  0x36   : > { %1753 = vmatpush3.bf16.msra.mxu1 %v2055_v0  ;;  %1740 = vmatprep.subr.bf16.mxu0 %v2022_v1 }
  0x37   : > { %1754 = vmatprep.subr.bf16.mxu1 %v2022_v1  ;;  %1748 = vmatprep.mubr.msk.bf16.mxu0 %vm2023_vm0, %v2022_v1 }
  0x38   : > { %1762 = vmatprep.mubr.msk.bf16.mxu1 %vm2023_vm0, %v2022_v1 }
  0x39   : > { %1741 = vmatpush3.bf16.msra.mxu0 %v2250_v40 }
  0x3a   : > { %1755 = vmatpush3.bf16.msra.mxu1 %v2068_v3  ;;  %1742 = vmatprep.subr.bf16.mxu0 %v2022_v1 }
  0x3b   : > { %1756 = vmatprep.subr.bf16.mxu1 %v2022_v1 }
  0x3d   : > { %1743 = vmatpush3.bf16.msra.mxu0 %v2263_v41 }
  0x3e   : > { %1757 = vmatpush3.bf16.msra.mxu1 %v2088_v5  ;;  %1744 = vmatprep.subr.bf16.mxu0 %v2022_v1 }
  0x3f   : > { %1758 = vmatprep.subr.bf16.mxu1 %v2022_v1 }
  0x41   : > { %1745 = vmatpush3.bf16.msra.mxu0 %v2272_v42 }
  0x42   : > { %1759 = vmatpush3.bf16.msra.mxu1 %v2108_v7  ;;  %1746 = vmatprep.subr.bf16.mxu0 %v2022_v1 }
  0x43   : > { %1760 = vmatprep.subr.bf16.mxu1 %v2022_v1 }
  0x45   : > { %1747 = vmatpush3.bf16.msra.mxu0 %v2281_v43 }
  0x46   : > { %1761 = vmatpush3.bf16.msra.mxu1 %v2122_v9  ;;  %1766 = vmatprep.subr.bf16.mxu0 %v2022_v1 }
  0x47   : > { %1780 = vmatprep.subr.bf16.mxu1 %v2022_v1 }
  0x48   : > { %1749 = vmatmul.mubr.msk.bf16.vlgmr.msra.gmra.mxu0 %vm232_vm1, %v2287_v45 }
  0x49   : > { %1763 = vmatmul.mubr.msk.bf16.vlgmr.msra.gmra.mxu1 %vm232_vm1, %v2291_v46  ;;  %1767 = vmatpush3.bf16.msra.mxu0 %v2062_v2 }
  0x4a   : > { %1781 = vmatpush3.bf16.msra.mxu1 %v2140_v13  ;;  %1768 = vmatprep.subr.bf16.mxu0 %v2022_v1 }
  0x4b   : > { %1782 = vmatprep.subr.bf16.mxu1 %v2022_v1  ;;  %1776 = vmatprep.mubr.msk.bf16.mxu0 %vm2023_vm0, %v2022_v1 }
  0x4c   : > { %1790 = vmatprep.mubr.msk.bf16.mxu1 %vm2023_vm0, %v2022_v1 }
  0x4d   : > { %1769 = vmatpush3.bf16.msra.mxu0 %v2077_v4 }
  0x4e   : > { %1783 = vmatpush3.bf16.msra.mxu1 %v2157_v15  ;;  %1770 = vmatprep.subr.bf16.mxu0 %v2022_v1 }
  0x4f   : > { %1784 = vmatprep.subr.bf16.mxu1 %v2022_v1 }
  0x51   : > { %1771 = vmatpush3.bf16.msra.mxu0 %v2096_v6 }
  0x52   : > { %1785 = vmatpush3.bf16.msra.mxu1 %v2170_v17  ;;  %1772 = vmatprep.subr.bf16.mxu0 %v2022_v1 }
  0x53   : > { %1786 = vmatprep.subr.bf16.mxu1 %v2022_v1 }
  0x55   : > { %1773 = vmatpush3.bf16.msra.mxu0 %v2115_v8 }
  0x56   : > { %1787 = vmatpush3.bf16.msra.mxu1 %v2196_v24  ;;  %1774 = vmatprep.subr.bf16.mxu0 %v2022_v1 }
  0x57   : > { %1788 = vmatprep.subr.bf16.mxu1 %v2022_v1 }
  0x59   : > { %1775 = vmatpush3.bf16.msra.mxu0 %v2129_v10 }
  0x5a   : > { %1789 = vmatpush3.bf16.msra.mxu1 %v2212_v29  ;;  %1794 = vmatprep.subr.bf16.mxu0 %v2022_v1 }
  0x5b   : > { %1808 = vmatprep.subr.bf16.mxu1 %v2022_v1 }
  0x5c   : > { %1777 = vmatmul.mubr.msk.bf16.vlgmr.msra.gmra.mxu0 %vm232_vm1, %v2006_v56 }
  0x5d   : > { %1791 = vmatmul.mubr.msk.bf16.vlgmr.msra.gmra.mxu1 %vm232_vm1, %v2335_v57  ;;  %1795 = vmatpush3.bf16.msra.mxu0 %v2147_v14 }
  0x5e   : > { %1809 = vmatpush3.bf16.msra.mxu1 %v2234_v38  ;;  %1796 = vmatprep.subr.bf16.mxu0 %v2022_v1 }
  0x5f   : > { %1810 = vmatprep.subr.bf16.mxu1 %v2022_v1  ;;  %1804 = vmatprep.mubr.msk.bf16.mxu0 %vm2023_vm0, %v2022_v1 }
  0x60   : > { %1818 = vmatprep.mubr.msk.bf16.mxu1 %vm2023_vm0, %v2022_v1 }
  0x61   : > { %1797 = vmatpush3.bf16.msra.mxu0 %v2164_v16 }
  0x62   : > { %1811 = vmatpush3.bf16.msra.mxu1 %v2250_v40  ;;  %1798 = vmatprep.subr.bf16.mxu0 %v2022_v1 }
  0x63   : > { %1812 = vmatprep.subr.bf16.mxu1 %v2022_v1 }
  0x65   : > { %1799 = vmatpush3.bf16.msra.mxu0 %v2177_v18 }
  0x66   : > { %1813 = vmatpush3.bf16.msra.mxu1 %v2263_v41  ;;  %1800 = vmatprep.subr.bf16.mxu0 %v2022_v1 }
  0x67   : > { %1814 = vmatprep.subr.bf16.mxu1 %v2022_v1 }
  0x69   : > { %1801 = vmatpush3.bf16.msra.mxu0 %v2204_v27 }
  0x6a   : > { %1815 = vmatpush3.bf16.msra.mxu1 %v2272_v42  ;;  %1802 = vmatprep.subr.bf16.mxu0 %v2022_v1 }
  0x6b   : > { %1816 = vmatprep.subr.bf16.mxu1 %v2022_v1 }
  0x6d   : > { %1803 = vmatpush3.bf16.msra.mxu0 %v2219_v32 }
  0x6e   : > { %1817 = vmatpush3.bf16.msra.mxu1 %v2281_v43  ;;  %1822 = vmatprep.subr.bf16.mxu0 %v2022_v1 }
  0x6f   : > { %1836 = vmatprep.subr.bf16.mxu1 %v2022_v1 }
  0x70   : > { %1805 = vmatmul.mubr.msk.bf16.vlgmr.msra.gmra.mxu0 %vm232_vm1, %v2368_v12 }
  0x71   : > { %1819 = vmatmul.mubr.msk.bf16.vlgmr.msra.gmra.mxu1 %vm232_vm1, %v2370_v19  ;;  %1823 = vmatpush3.bf16.msra.mxu0 %v2055_v0 }
  0x72   : > { %1837 = vmatpush3.bf16.msra.mxu1 %v2062_v2  ;;  %1824 = vmatprep.subr.bf16.mxu0 %v2022_v1 }
  0x73   : > { %1838 = vmatprep.subr.bf16.mxu1 %v2022_v1  ;;  %1832 = vmatprep.mubr.msk.bf16.mxu0 %vm2023_vm0, %v2022_v1 }
  0x74   : > { %1846 = vmatprep.mubr.msk.bf16.mxu1 %vm2023_vm0, %v2022_v1 }
  0x75   : > { %1825 = vmatpush3.bf16.msra.mxu0 %v2068_v3 }
  0x76   : > { %1839 = vmatpush3.bf16.msra.mxu1 %v2077_v4  ;;  %1826 = vmatprep.subr.bf16.mxu0 %v2022_v1 }
  0x77   : > { %1840 = vmatprep.subr.bf16.mxu1 %v2022_v1 }
  0x79   : > { %1827 = vmatpush3.bf16.msra.mxu0 %v2088_v5 }
  0x7a   : > { %1841 = vmatpush3.bf16.msra.mxu1 %v2096_v6  ;;  %1828 = vmatprep.subr.bf16.mxu0 %v2022_v1 }
  0x7b   : > { %1842 = vmatprep.subr.bf16.mxu1 %v2022_v1 }
  0x7d   : > { %1829 = vmatpush3.bf16.msra.mxu0 %v2108_v7 }
  0x7e   : > { %1843 = vmatpush3.bf16.msra.mxu1 %v2115_v8  ;;  %1830 = vmatprep.subr.bf16.mxu0 %v2022_v1 }
  0x7f   : > { %1844 = vmatprep.subr.bf16.mxu1 %v2022_v1 }
  0x81   : > { %1831 = vmatpush3.bf16.msra.mxu0 %v2122_v9 }
  0x82   : > { %1845 = vmatpush3.bf16.msra.mxu1 %v2129_v10  ;;  %1850 = vmatprep.subr.bf16.mxu0 %v2022_v1 }
  0x83   : > { %1864 = vmatprep.subr.bf16.mxu1 %v2022_v1 }
  0x84   : > { %1833 = vmatmul.mubr.msk.bf16.vlgmr.msra.gmra.mxu0 %vm232_vm1, %v2229_v37 }
  0x85   : > { %1847 = vmatmul.mubr.msk.bf16.vlgmr.msra.gmra.mxu1 %vm232_vm1, %v2133_v11  ;;  %1851 = vmatpush3.bf16.msra.mxu0 %v2140_v13 }
  0x86   : > { %1865 = vmatpush3.bf16.msra.mxu1 %v2147_v14  ;;  %1852 = vmatprep.subr.bf16.mxu0 %v2022_v1 }
  0x87   : > { %1866 = vmatprep.subr.bf16.mxu1 %v2022_v1  ;;  %1860 = vmatprep.mubr.msk.bf16.mxu0 %vm2023_vm0, %v2022_v1 }
  0x88   : > { %1874 = vmatprep.mubr.msk.bf16.mxu1 %vm2023_vm0, %v2022_v1 }
  0x89   : > { %1853 = vmatpush3.bf16.msra.mxu0 %v2157_v15 }
  0x8a   : > { %1867 = vmatpush3.bf16.msra.mxu1 %v2164_v16  ;;  %1854 = vmatprep.subr.bf16.mxu0 %v2022_v1 }
  0x8b   : > { %1868 = vmatprep.subr.bf16.mxu1 %v2022_v1 }
  0x8d   : > { %1855 = vmatpush3.bf16.msra.mxu0 %v2170_v17 }
  0x8e   : > { %1869 = vmatpush3.bf16.msra.mxu1 %v2177_v18  ;;  %1856 = vmatprep.subr.bf16.mxu0 %v2022_v1 }
  0x8f   : > { %1870 = vmatprep.subr.bf16.mxu1 %v2022_v1 }
  0x91   : > { %1857 = vmatpush3.bf16.msra.mxu0 %v2196_v24 }
  0x92   : > { %1871 = vmatpush3.bf16.msra.mxu1 %v2204_v27  ;;  %1858 = vmatprep.subr.bf16.mxu0 %v2022_v1 }
  0x93   : > { %1872 = vmatprep.subr.bf16.mxu1 %v2022_v1 }
  0x95   : > { %1859 = vmatpush3.bf16.msra.mxu0 %v2212_v29 }
  0x96   : > { %1873 = vmatpush3.bf16.msra.mxu1 %v2219_v32  ;;  %1878 = vmatprep.subr.bf16.mxu0 %v2022_v1 }
  0x97   : > { %1892 = vmatprep.subr.bf16.mxu1 %v2022_v1 }
  0x98   : > { %1861 = vmatmul.mubr.msk.bf16.vlgmr.msra.gmra.mxu0 %vm232_vm1, %v2238_v39 }
  0x99   : > { %1875 = vmatmul.mubr.msk.bf16.vlgmr.msra.gmra.mxu1 %vm232_vm1, %v2287_v45  ;;  %1879 = vmatpush3.bf16.msra.mxu0 %v2234_v38 }
  0x9a   : > { %1893 = vmatpush3.bf16.msra.mxu1 %v2055_v0  ;;  %1880 = vmatprep.subr.bf16.mxu0 %v2022_v1 }
  0x9b   : > { %1894 = vmatprep.subr.bf16.mxu1 %v2022_v1  ;;  %1888 = vmatprep.mubr.msk.bf16.mxu0 %vm2023_vm0, %v2022_v1 }
  0x9c   : > { %1902 = vmatprep.mubr.msk.bf16.mxu1 %vm2023_vm0, %v2022_v1 }
  0x9d   : > { %1881 = vmatpush3.bf16.msra.mxu0 %v2250_v40 }
  0x9e   : > { %1895 = vmatpush3.bf16.msra.mxu1 %v2068_v3  ;;  %1882 = vmatprep.subr.bf16.mxu0 %v2022_v1 }
  0x9f   : > { %1896 = vmatprep.subr.bf16.mxu1 %v2022_v1 }
  0xa1   : > { %1883 = vmatpush3.bf16.msra.mxu0 %v2263_v41 }
  0xa2   : > { %1897 = vmatpush3.bf16.msra.mxu1 %v2088_v5  ;;  %1884 = vmatprep.subr.bf16.mxu0 %v2022_v1 }
  0xa3   : > { %1898 = vmatprep.subr.bf16.mxu1 %v2022_v1 }
  0xa5   : > { %1885 = vmatpush3.bf16.msra.mxu0 %v2272_v42 }
  0xa6   : > { %1899 = vmatpush3.bf16.msra.mxu1 %v2108_v7  ;;  %1886 = vmatprep.subr.bf16.mxu0 %v2022_v1 }
  0xa7   : > { %1900 = vmatprep.subr.bf16.mxu1 %v2022_v1 }
  0xa9   : > { %1887 = vmatpush3.bf16.msra.mxu0 %v2281_v43 }
  0xaa   : > { %1901 = vmatpush3.bf16.msra.mxu1 %v2122_v9  ;;  %1906 = vmatprep.subr.bf16.mxu0 %v2022_v1 }
  0xab   : > { %1920 = vmatprep.subr.bf16.mxu1 %v2022_v1 }
  0xac   : > { %1889 = vmatmul.mubr.msk.bf16.vlgmr.msra.gmra.mxu0 %vm232_vm1, %v1541_v36 }
  0xad   : > { %1903 = vmatmul.mubr.msk.bf16.vlgmr.msra.gmra.mxu1 %vm232_vm1, %v2335_v57  ;;  %1907 = vmatpush3.bf16.msra.mxu0 %v2062_v2 }
  0xae   : > { %1921 = vmatpush3.bf16.msra.mxu1 %v2140_v13  ;;  %1908 = vmatprep.subr.bf16.mxu0 %v2022_v1 }
  0xaf   : > { %1922 = vmatprep.subr.bf16.mxu1 %v2022_v1  ;;  %1916 = vmatprep.mubr.msk.bf16.mxu0 %vm2023_vm0, %v2022_v1 }
  0xb0   : > { %1930 = vmatprep.mubr.msk.bf16.mxu1 %vm2023_vm0, %v2022_v1 }
  0xb1   : > { %1909 = vmatpush3.bf16.msra.mxu0 %v2077_v4 }
  0xb2   : > { %1923 = vmatpush3.bf16.msra.mxu1 %v2157_v15  ;;  %1910 = vmatprep.subr.bf16.mxu0 %v2022_v1 }
  0xb3   : > { %1924 = vmatprep.subr.bf16.mxu1 %v2022_v1 }
  0xb5   : > { %1911 = vmatpush3.bf16.msra.mxu0 %v2096_v6 }
  0xb6   : > { %1925 = vmatpush3.bf16.msra.mxu1 %v2170_v17  ;;  %1912 = vmatprep.subr.bf16.mxu0 %v2022_v1 }
  0xb7   : > { %1926 = vmatprep.subr.bf16.mxu1 %v2022_v1 }
  0xb9   : > { %1913 = vmatpush3.bf16.msra.mxu0 %v2115_v8 }
  0xba   : > { %1927 = vmatpush3.bf16.msra.mxu1 %v2196_v24  ;;  %1914 = vmatprep.subr.bf16.mxu0 %v2022_v1 }
  0xbb   : > { %1928 = vmatprep.subr.bf16.mxu1 %v2022_v1 }
  0xbd   : > { %1915 = vmatpush3.bf16.msra.mxu0 %v2129_v10 }
  0xbe   : > { %1929 = vmatpush3.bf16.msra.mxu1 %v2212_v29  ;;  %1934 = vmatprep.subr.bf16.mxu0 %v2022_v1 }
  0xbf   : > { %1948 = vmatprep.subr.bf16.mxu1 %v2022_v1 }
  0xc0   : > { %1917 = vmatmul.mubr.msk.bf16.vlgmr.msra.gmra.mxu0 %vm232_vm1, %v2291_v46 }
  0xc1   : > { %1931 = vmatmul.mubr.msk.bf16.vlgmr.msra.gmra.mxu1 %vm232_vm1, %v2368_v12  ;;  %1935 = vmatpush3.bf16.msra.mxu0 %v2147_v14 }
  0xc2   : > { %1949 = vmatpush3.bf16.msra.mxu1 %v2234_v38  ;;  %1936 = vmatprep.subr.bf16.mxu0 %v2022_v1 }
  0xc3   : > { %1950 = vmatprep.subr.bf16.mxu1 %v2022_v1  ;;  %1944 = vmatprep.mubr.msk.bf16.mxu0 %vm2023_vm0, %v2022_v1 }
  0xc4   : > { %1958 = vmatprep.mubr.msk.bf16.mxu1 %vm2023_vm0, %v2022_v1 }
  0xc5   : > { %1937 = vmatpush3.bf16.msra.mxu0 %v2164_v16 }
  0xc6   : > { %1951 = vmatpush3.bf16.msra.mxu1 %v2250_v40  ;;  %1938 = vmatprep.subr.bf16.mxu0 %v2022_v1 }
  0xc7   : > { %1952 = vmatprep.subr.bf16.mxu1 %v2022_v1 }
  0xc9   : > { %1939 = vmatpush3.bf16.msra.mxu0 %v2177_v18 }
  0xca   : > { %1953 = vmatpush3.bf16.msra.mxu1 %v2263_v41  ;;  %1940 = vmatprep.subr.bf16.mxu0 %v2022_v1 }
  0xcb   : > { %1954 = vmatprep.subr.bf16.mxu1 %v2022_v1 }
  0xcd   : > { %1941 = vmatpush3.bf16.msra.mxu0 %v2204_v27 }
  0xce   : > { %1955 = vmatpush3.bf16.msra.mxu1 %v2272_v42  ;;  %1942 = vmatprep.subr.bf16.mxu0 %v2022_v1 }
  0xcf   : > { %1956 = vmatprep.subr.bf16.mxu1 %v2022_v1 }
  0xd1   : > { %1943 = vmatpush3.bf16.msra.mxu0 %v2219_v32 }
  0xd2   : > { %1957 = vmatpush3.bf16.msra.mxu1 %v2281_v43 }
  0xd4   : > { %1945 = vmatmul.mubr.msk.bf16.vlgmr.msra.gmra.mxu0 %vm232_vm1, %v2370_v19 }
  0xd5   : > { %1959 = vmatmul.mubr.msk.bf16.vlgmr.msra.gmra.mxu1 %vm232_vm1, %v1547_v53 }
  0xe0   : > { %v270_v0 = vpop.f32.mrf.mxu0 }
  0xe1   : > { %v349_v2 = vpop.f32.mrf.mxu1 }
  0xe2   : > { %v350_v3 = vadd.f32 %v349_v2, %v270_v0  ;;  %v1694_v4 = vpop.f32.mrf.mxu0 }
  0xe3   : > { %v1708_v5 = vpop.f32.mrf.mxu1 }
  0xe4   : > { %v273_v6 = vpop.f32.mrf.mxu0 }
  0xe5   : > { %v352_v7 = vpop.f32.mrf.mxu1 }
  0xe6   : > { %v353_v1 = vadd.f32 %v352_v7, %v273_v6  ;;  %v1695_v8 = vpop.f32.mrf.mxu0 }
  0xe7   : > { %v1709_v9 = vpop.f32.mrf.mxu1 }
  0xf4   : > { %v449_v10 = vpop.f32.mrf.mxu0 }
  0xf5   : > { %v456_v11 = vadd.f32 %v449_v10, %v350_v3  ;;  %v550_v13 = vpop.f32.mrf.mxu1 }
  0xf6   : > { %v1722_v14 = vpop.f32.mrf.mxu0 }
  0xf7   : > { %v557_v15 = vadd.f32 %v550_v13, %v456_v11  ;;  %v1736_v16 = vpop.f32.mrf.mxu1 }
  0xf8   : > { %v452_v17 = vpop.f32.mrf.mxu0 }
  0xf9   : > { %v457_v18 = vadd.f32 %v452_v17, %v353_v1  ;;  %v553_v20 = vpop.f32.mrf.mxu1 }
  0xfa   : > { %v1723_v21 = vpop.f32.mrf.mxu0 }
  0xfb   : > { %v558_v22 = vadd.f32 %v553_v20, %v457_v18  ;;  %v1737_v23 = vpop.f32.mrf.mxu1 }
 0x108   : > { %v641_v24 = vpop.f32.mrf.mxu0 }
 0x109   : > { %v648_v25 = vadd.f32 %v641_v24, %v557_v15  ;;  %v696_v26 = vpop.f32.mrf.mxu1 }
 0x10a   : > { %v1750_v27 = vpop.f32.mrf.mxu0 }
 0x10b   : > { %v1764_v28 = vpop.f32.mrf.mxu1 }
 0x10c   : > { %v644_v29 = vpop.f32.mrf.mxu0 }
 0x10d   : > { %v2521_v30 = vadd.f32 %v644_v29, %v558_v22  ;;  %v699_v31 = vpop.f32.mrf.mxu1 }
 0x10e   : > { %v1751_v32 = vpop.f32.mrf.mxu0 }
 0x10f   : > { %v1765_v33 = vpop.f32.mrf.mxu1 }
 0x11c   : > { %v745_v34 = vpop.f32.mrf.mxu0 }
 0x11d   : > { %v746_v35 = vadd.f32 %v745_v34, %v696_v26  ;;  %v803_v36 = vpop.f32.mrf.mxu1 }
 0x11e   : > { %v1778_v37 = vpop.f32.mrf.mxu0 }
 0x11f   : > { %v810_v38 = vadd.f32 %v803_v36, %v746_v35  ;;  %v1792_v39 = vpop.f32.mrf.mxu1 }
 0x120   : > { %v748_v40 = vpop.f32.mrf.mxu0 }
 0x121   : > { %v749_v41 = vadd.f32 %v748_v40, %v699_v31  ;;  %v806_v42 = vpop.f32.mrf.mxu1 }
 0x122   : > { %v1779_v43 = vpop.f32.mrf.mxu0 }
 0x123   : > { %v811_v44 = vadd.f32 %v806_v42, %v749_v41  ;;  %v1793_v45 = vpop.f32.mrf.mxu1 }
 0x130   : > { %v863_v46 = vpop.f32.mrf.mxu0 }
 0x131   : > { %v870_v47 = vadd.f32 %v863_v46, %v810_v38  ;;  %v913_v48 = vpop.f32.mrf.mxu1 }
 0x132   : > { %v1806_v49 = vpop.f32.mrf.mxu0 }
 0x133   : > { %v920_v50 = vadd.f32 %v913_v48, %v870_v47  ;;  %v1820_v51 = vpop.f32.mrf.mxu1 }
 0x134   : > { %v866_v52 = vpop.f32.mrf.mxu0 }
 0x135   : > { %v922_v53 = vmax.f32 %v648_v25, %v920_v50  ;;  %v871_v54 = vadd.f32 %v866_v52, %v811_v44  ;;  %v916_v55 = vpop.f32.mrf.mxu1  ;;  %v1549_v52 = vld [vmem:[%s2536_s2] ss:$0 sm:$0xff] }
 0x136   : > { %v1807_v56 = vpop.f32.mrf.mxu0 }
 0x137   : > { %v921_v57 = vadd.f32 %v916_v55, %v871_v54  ;;  %v1821_v58 = vpop.f32.mrf.mxu1 }
 0x139   : > { %v923_v59 = vmax.f32 %v2521_v30, %v921_v57 }
 0x144   : > { %v958_v60 = vpop.f32.mrf.mxu0 }
 0x145   : > { %v999_v61 = vpop.f32.mrf.mxu1 }
 0x146   : > { %v1000_v62 = vadd.f32 %v999_v61, %v958_v60  ;;  %v1834_v63 = vpop.f32.mrf.mxu0 }
 0x147   : > { %v1848_v12 = vpop.f32.mrf.mxu1 }
 0x148   : > { %v961_v19 = vpop.f32.mrf.mxu0 }
 0x149   : > { %v1002_v0 = vpop.f32.mrf.mxu1 }
 0x14a   : > { %v1003_v2 = vadd.f32 %v1002_v0, %v961_v19  ;;  %v1835_v3 = vpop.f32.mrf.mxu0 }
 0x14b   : > { %v1849_v4 = vpop.f32.mrf.mxu1 }
 0x158   : > { %v1040_v5 = vpop.f32.mrf.mxu0 }
 0x159   : > { %v1083_v6 = vpop.f32.mrf.mxu1  ;;  %v1047_v13 = vadd.f32 %v1040_v5, %v1000_v62 }
 0x15a   : > { %v1862_v7 = vpop.f32.mrf.mxu0 }
 0x15b   : > { %v1876_v1 = vpop.f32.mrf.mxu1  ;;  %v1090_v14 = vadd.f32 %v1083_v6, %v1047_v13 }
 0x15c   : > { %v1043_v8 = vpop.f32.mrf.mxu0 }
 0x15d   : > { %v1086_v9 = vpop.f32.mrf.mxu1  ;;  %v1048_v15 = vadd.f32 %v1043_v8, %v1003_v2 }
 0x15e   : > { %v1863_v10 = vpop.f32.mrf.mxu0 }
 0x15f   : > { %v1877_v11 = vpop.f32.mrf.mxu1  ;;  %v1091_v21 = vadd.f32 %v1086_v9, %v1048_v15 }
 0x16c   : > { %v1133_v16 = vpop.f32.mrf.mxu0 }
 0x16d   : > { %v1140_v17 = vadd.f32 %v1133_v16, %v1090_v14  ;;  %v1178_v18 = vpop.f32.mrf.mxu1 }
 0x16e   : > { %v1890_v20 = vpop.f32.mrf.mxu0 }
 0x16f   : > { %v1142_v22 = vmax.f32 %v922_v53, %v1140_v17  ;;  %v1904_v23 = vpop.f32.mrf.mxu1 }
 0x170   : > { %v1136_v24 = vpop.f32.mrf.mxu0 }
 0x171   : > { %v1141_v25 = vadd.f32 %v1136_v24, %v1091_v21  ;;  %v1181_v26 = vpop.f32.mrf.mxu1 }
 0x172   : > { %v1891_v27 = vpop.f32.mrf.mxu0 }
 0x173   : > { %v1143_v28 = vmax.f32 %v923_v59, %v1141_v25  ;;  %v1905_v29 = vpop.f32.mrf.mxu1 }
 0x180   : > { %v1219_v30 = vpop.f32.mrf.mxu0 }
 0x181   : > { %v1260_v31 = vpop.f32.mrf.mxu1  ;;  %v1220_v38 = vadd.f32 %v1219_v30, %v1178_v18 }
 0x182   : > { %v1918_v32 = vpop.f32.mrf.mxu0 }
 0x183   : > { %v1932_v33 = vpop.f32.mrf.mxu1  ;;  %v1267_v39 = vadd.f32 %v1260_v31, %v1220_v38 }
 0x184   : > { %v1222_v34 = vpop.f32.mrf.mxu0 }
 0x185   : > { %v1263_v35 = vpop.f32.mrf.mxu1  ;;  %v1223_v40 = vadd.f32 %v1222_v34, %v1181_v26 }
 0x186   : > { %v1919_v36 = vpop.f32.mrf.mxu0 }
 0x187   : > { %v1933_v37 = vpop.f32.mrf.mxu1  ;;  %v1268_v45 = vadd.f32 %v1263_v35, %v1223_v40 }
 0x194   : > { %v1303_v41 = vpop.f32.mrf.mxu0 }
 0x195   : > { %v1310_v42 = vadd.f32 %v1303_v41, %v1267_v39  ;;  %v1353_v43 = vpop.f32.mrf.mxu1 }
 0x196   : > { %v1946_v44 = vpop.f32.mrf.mxu0 }
 0x197   : > { %v1360_v46 = vadd.f32 %v1353_v43, %v1310_v42  ;;  %v1960_v47 = vpop.f32.mrf.mxu1 }
 0x198   : > { %v1306_v48 = vpop.f32.mrf.mxu0 }
 0x199   : > { %v1362_v49 = vmax.f32 %v1142_v22, %v1360_v46  ;;  %v1311_v50 = vadd.f32 %v1306_v48, %v1268_v45  ;;  %v1356_v51 = vpop.f32.mrf.mxu1 }
 0x19a   : > { %v1947_v53 = vpop.f32.mrf.mxu0 }
 0x19b   : > { %v1361_v54 = vadd.f32 %v1356_v51, %v1311_v50  ;;  %v1961_v55 = vpop.f32.mrf.mxu1  ;;  %v1371_v56 = vadd.f32 %v1549_v52, %v1362_v49 }
 0x19d   : > { %v1363_v57 = vmax.f32 %v1143_v28, %v1361_v54  ;;  %v1373_v59 = vmax.f32 %v1371_v56, 0.0 }
 0x19f   : > { %v1372_v58 = vadd.f32 %v1549_v52, %v1363_v57 }
 0x1a1   : > { %v1374_v60 = vmax.f32 %v1372_v58, 0.0 }
 0x1a3   : > { %v1560_v61 = vpack.c.bf16 %v1374_v60, %v1373_v59 }
 0x1a5   : > { %1561 = vst [vmem:[%s170_s23] sm:$0xff] %v1560_v61  }
 0x1a6 PF: > { %s13_s12 = sadd.s32 1, %s2020_s12  }
 0x1a7   : > { %p10_p4 = scmp.ge.s32.totalorder %s13_s12, 4  }
 0x1a9   :  { %12 = sbr.rel (!%p10_p4) target bundleno = 1 (0x1), region = 66 }

// kernel: cnn_forward.5
= control target key start
LH: loop header
LB: loop body
LE: loop exit
PB: predicated region body
PF: predicated region fallthrough
CT: control target
= control target key end

     0   :  { %8 = vsyncpa [#allocation5], 0  ;;  %s1722_s0 = inlined_call_operand.vmem [shape: bf16[2,2048], index: 0, kind: input, shape index: {}]   ;;  %s1723_s1 = inlined_call_operand.vmem [shape: bf16[2048,256], index: 1, kind: input, shape index: {}]   ;;  %s1724_s2 = inlined_call_operand.vmem [shape: f32[1,256], index: 2, kind: input, shape index: {}]   ;;  %s1725_s3 = inlined_call_operand.hbm [shape: f32[2,256], index: 3, kind: output, shape index: {}]  }
   0x1   :  { %10 = vsyncpa [#allocation5 + $0x1], 0  ;;  %s1365_s12 = smov 0   ;;  %s1367_s13 = smov 0  }
   0x2   :  { %s1369_s14 = smov 0   ;;  %s1371_s15 = smov 0  }
   0x3   :  { %s1373_s16 = smov 0   ;;  %s1375_s17 = smov 0  }
   0x4   :  { %s1377_s18 = smov 0   ;;  %s1379_s19 = smov 0  }
   0x5   :  { %s1381_s20 = smov 0   ;;  %s1383_s21 = smov 0  }
   0x6 LB: > { %s1014_s22 = sadd.s32 4294967295, %s1340_s21   ;;  %s1015_s23 = sadd.s32 4294967294, %s1340_s21   ;;  %s1340_s21 = sphi %s1383_s21, %s16_s21   ;;  %s1336_s20 = sphi %s1381_s20, %s1739_s20   ;;  %s1332_s19 = sphi %s1379_s19, %s1738_s19   ;;  %s1328_s18 = sphi %s1377_s18, %s1737_s18   ;;  %s1324_s17 = sphi %s1375_s17, %s1736_s17   ;;  %s1320_s16 = sphi %s1373_s16, %s1735_s16   ;;  %s1316_s15 = sphi %s1371_s15, %s1734_s15   ;;  %s1312_s14 = sphi %s1369_s14, %s1733_s14   ;;  %s1308_s13 = sphi %s1367_s13, %s1732_s13   ;;  %s1304_s12 = sphi %s1365_s12, %s1731_s12  }
   0x7   : > { %s25_s24 = sadd.s32 1, %s1332_s19  ;;  %s28_s25 = sadd.s32 1, %s1336_s20 }
   0x8   : > { %p26_p0 = scmp.ge.s32.totalorder %s25_s24, 4  ;;  %s63_s26 = sadd.s32 1, %s1320_s16 }
   0x9   : > { %p70_p1 = scmp.ne.s32.totalorder %s1320_s16, %s1316_s15  ;;  %p71_p2 = scmp.eq.s32.totalorder %s1340_s21, 0 }
   0xa   : > { %s1741_s24 = smov (%p26_p0, %s25_s24), 0  ;;  %s1743_s25 = smov (!%p26_p0, %s28_s25), %s1336_s20 }
   0xb   : > { %s58_s27 = ssub.s32 %s1332_s19, %s1741_s24  ;;  %p1428_p3 = por %p71_p2, %p70_p1 }
   0xc   : > { %p30_p4 = scmp.ge.s32.totalorder %s1743_s25, 2  ;;  %s115_s29 = sadd.s32 1, %s1312_s14 }
   0xd   : > { %p125_p5 = scmp.ne.s32.totalorder %s1312_s14, %s1308_s13  ;;  %p126_p6 = scmp.eq.s32.totalorder %s1014_s22, 7 }
   0xe   : > { %s1745_s25 = smov (%p30_p4, %s1743_s25), 0  ;;  %p131_p8 = scmp.ne.s32.totalorder %s1308_s13, %s1304_s12 }
   0xf   : > { %p1437_p7 = por %p126_p6, %p125_p5  ;;  %s59_s4 = ssub.s32 %s1336_s20, %s1745_s25 }
  0x10   : > { %p132_p9 = scmp.eq.s32.totalorder %s1015_s23, 7  ;;  %s60_s5 = sor.u32 %s59_s4, %s58_s27 }
  0x11   : > { %p113_p10 = scmp.eq.s32.totalorder %s59_s4, 0  ;;  %p61_p11 = scmp.eq.s32.totalorder %s60_s5, 0 }
  0x12   : > { %p1445_p12 = por %p132_p9, %p131_p8  ;;  %p1017_p13 = scmp.ge.s32.totalorder %s1340_s21, 8 }
  0x13   : > { %s1450_s7 = scalar_select %p113_p10, %s1312_s14, %s115_s29  }
  0x14   : > { %s1453_s8 = scalar_select %p61_p11, %s1320_s16, %s63_s26  }
  0x15   : > { %148 = sbr.rel (%p1017_p13) target bundleno = 74 (0x4a), region = 16 }
  0x1a   : > { %159 = sbr.rel (!%p1428_p3) target bundleno = 74 (0x4a), region = 24  ;;  %s161_s9 = sand.u32 (%p1428_p3), 1, %s1320_s16  }
  0x1b   : > { %s1066_s10 = sshll.u32 (%p1428_p3), %s1332_s19, 7  ;;  %s1018_s11 = sshll.u32 (%p1428_p3), %s161_s9, 8 }
  0x1c   : > { %s166_s22 = sadd.s32 (%p1428_p3), %s1336_s20, %s1066_s10  ;;  %s1469_s26 = scalar_lea.vmem (%p1428_p3), [#allocation3], %s1018_s11 }
  0x1d   : > { %s1021_s23 = sshll.u32 (%p1428_p3), %s166_s22, 2 }
  0x1e   : > { %s1464_s29 = scalar_lea.vmem (%p1428_p3), %s1723_s1, %s1021_s23 }
  0x1f   : > { %v185_v0 = vld [vmem:[%s1464_s29] sm:$0xf]  ;;  %v187_v1 = vld [vmem:[%s1464_s29 + $0x8] sm:$0xf]  ;;  %v189_v2 = vld [vmem:[%s1464_s29 + $0x10] sm:$0xf] }
  0x20   : > { %186 = vst [vmem:[%s1469_s26] sm:$0xf] %v185_v0  ;;  %188 = vst [vmem:[%s1469_s26 + $0x4] sm:$0xf] %v187_v1  ;;  %v191_v3 = vld [vmem:[%s1464_s29 + $0x18] sm:$0xf] }
  0x21   : > { %190 = vst [vmem:[%s1469_s26 + $0x8] sm:$0xf] %v189_v2  ;;  %v193_v4 = vld [vmem:[%s1464_s29 + $0x20] sm:$0xf]  ;;  %v195_v5 = vld [vmem:[%s1464_s29 + $0x28] sm:$0xf] }
  0x22   : > { %192 = vst [vmem:[%s1469_s26 + $0xc] sm:$0xf] %v191_v3  ;;  %194 = vst [vmem:[%s1469_s26 + $0x10] sm:$0xf] %v193_v4  ;;  %v197_v6 = vld [vmem:[%s1464_s29 + $0x30] sm:$0xf] }
  0x23   : > { %196 = vst [vmem:[%s1469_s26 + $0x14] sm:$0xf] %v195_v5  ;;  %v199_v7 = vld [vmem:[%s1464_s29 + $0x38] sm:$0xf]  ;;  %v201_v8 = vld [vmem:[%s1464_s29 + $0x40] sm:$0xf] }
  0x24   : > { %198 = vst [vmem:[%s1469_s26 + $0x18] sm:$0xf] %v197_v6  ;;  %200 = vst [vmem:[%s1469_s26 + $0x1c] sm:$0xf] %v199_v7  ;;  %v203_v9 = vld [vmem:[%s1464_s29 + $0x48] sm:$0xf] }
  0x25   : > { %202 = vst [vmem:[%s1469_s26 + $0x20] sm:$0xf] %v201_v8  ;;  %v205_v10 = vld [vmem:[%s1464_s29 + $0x50] sm:$0xf]  ;;  %v207_v11 = vld [vmem:[%s1464_s29 + $0x58] sm:$0xf] }
  0x26   : > { %204 = vst [vmem:[%s1469_s26 + $0x24] sm:$0xf] %v203_v9  ;;  %206 = vst [vmem:[%s1469_s26 + $0x28] sm:$0xf] %v205_v10  ;;  %v209_v12 = vld [vmem:[%s1464_s29 + $0x60] sm:$0xf] }
  0x27   : > { %208 = vst [vmem:[%s1469_s26 + $0x2c] sm:$0xf] %v207_v11  ;;  %v211_v13 = vld [vmem:[%s1464_s29 + $0x68] sm:$0xf]  ;;  %v213_v14 = vld [vmem:[%s1464_s29 + $0x70] sm:$0xf] }
  0x28   : > { %210 = vst [vmem:[%s1469_s26 + $0x30] sm:$0xf] %v209_v12  ;;  %212 = vst [vmem:[%s1469_s26 + $0x34] sm:$0xf] %v211_v13  ;;  %v215_v15 = vld [vmem:[%s1464_s29 + $0x78] sm:$0xf] }
  0x29   : > { %214 = vst [vmem:[%s1469_s26 + $0x38] sm:$0xf] %v213_v14  ;;  %v217_v16 = vld [vmem:[%s1464_s29 + $0x80] sm:$0xf]  ;;  %v219_v17 = vld [vmem:[%s1464_s29 + $0x88] sm:$0xf] }
  0x2a   : > { %216 = vst [vmem:[%s1469_s26 + $0x3c] sm:$0xf] %v215_v15  ;;  %218 = vst [vmem:[%s1469_s26 + $0x40] sm:$0xf] %v217_v16  ;;  %v221_v18 = vld [vmem:[%s1464_s29 + $0x90] sm:$0xf] }
  0x2b   : > { %220 = vst [vmem:[%s1469_s26 + $0x44] sm:$0xf] %v219_v17  ;;  %v223_v19 = vld [vmem:[%s1464_s29 + $0x98] sm:$0xf]  ;;  %v225_v20 = vld [vmem:[%s1464_s29 + $0xa0] sm:$0xf] }
  0x2c   : > { %222 = vst [vmem:[%s1469_s26 + $0x48] sm:$0xf] %v221_v18  ;;  %224 = vst [vmem:[%s1469_s26 + $0x4c] sm:$0xf] %v223_v19  ;;  %v227_v21 = vld [vmem:[%s1464_s29 + $0xa8] sm:$0xf] }
  0x2d   : > { %226 = vst [vmem:[%s1469_s26 + $0x50] sm:$0xf] %v225_v20  ;;  %v229_v22 = vld [vmem:[%s1464_s29 + $0xb0] sm:$0xf]  ;;  %v231_v23 = vld [vmem:[%s1464_s29 + $0xb8] sm:$0xf] }
  0x2e   : > { %228 = vst [vmem:[%s1469_s26 + $0x54] sm:$0xf] %v227_v21  ;;  %230 = vst [vmem:[%s1469_s26 + $0x58] sm:$0xf] %v229_v22  ;;  %v233_v24 = vld [vmem:[%s1464_s29 + $0xc0] sm:$0xf] }
  0x2f   : > { %232 = vst [vmem:[%s1469_s26 + $0x5c] sm:$0xf] %v231_v23  ;;  %v235_v25 = vld [vmem:[%s1464_s29 + $0xc8] sm:$0xf]  ;;  %v237_v26 = vld [vmem:[%s1464_s29 + $0xd0] sm:$0xf] }
  0x30   : > { %234 = vst [vmem:[%s1469_s26 + $0x60] sm:$0xf] %v233_v24  ;;  %236 = vst [vmem:[%s1469_s26 + $0x64] sm:$0xf] %v235_v25  ;;  %v239_v27 = vld [vmem:[%s1464_s29 + $0xd8] sm:$0xf] }
  0x31   : > { %238 = vst [vmem:[%s1469_s26 + $0x68] sm:$0xf] %v237_v26  ;;  %v241_v28 = vld [vmem:[%s1464_s29 + $0xe0] sm:$0xf]  ;;  %v243_v29 = vld [vmem:[%s1464_s29 + $0xe8] sm:$0xf] }
  0x32   : > { %240 = vst [vmem:[%s1469_s26 + $0x6c] sm:$0xf] %v239_v27  ;;  %242 = vst [vmem:[%s1469_s26 + $0x70] sm:$0xf] %v241_v28  ;;  %v245_v30 = vld [vmem:[%s1464_s29 + $0xf0] sm:$0xf] }
  0x33   : > { %244 = vst [vmem:[%s1469_s26 + $0x74] sm:$0xf] %v243_v29  ;;  %v247_v31 = vld [vmem:[%s1464_s29 + $0xf8] sm:$0xf]  ;;  %v249_v32 = vld [vmem:[%s1464_s29 + $0x100] sm:$0xf] }
  0x34   : > { %246 = vst [vmem:[%s1469_s26 + $0x78] sm:$0xf] %v245_v30  ;;  %248 = vst [vmem:[%s1469_s26 + $0x7c] sm:$0xf] %v247_v31  ;;  %v251_v33 = vld [vmem:[%s1464_s29 + $0x108] sm:$0xf] }
  0x35   : > { %250 = vst [vmem:[%s1469_s26 + $0x80] sm:$0xf] %v249_v32  ;;  %v253_v34 = vld [vmem:[%s1464_s29 + $0x110] sm:$0xf]  ;;  %v255_v35 = vld [vmem:[%s1464_s29 + $0x118] sm:$0xf] }
  0x36   : > { %252 = vst [vmem:[%s1469_s26 + $0x84] sm:$0xf] %v251_v33  ;;  %254 = vst [vmem:[%s1469_s26 + $0x88] sm:$0xf] %v253_v34  ;;  %v257_v36 = vld [vmem:[%s1464_s29 + $0x120] sm:$0xf] }
  0x37   : > { %256 = vst [vmem:[%s1469_s26 + $0x8c] sm:$0xf] %v255_v35  ;;  %v259_v37 = vld [vmem:[%s1464_s29 + $0x128] sm:$0xf]  ;;  %v261_v38 = vld [vmem:[%s1464_s29 + $0x130] sm:$0xf] }
  0x38   : > { %258 = vst [vmem:[%s1469_s26 + $0x90] sm:$0xf] %v257_v36  ;;  %260 = vst [vmem:[%s1469_s26 + $0x94] sm:$0xf] %v259_v37  ;;  %v263_v39 = vld [vmem:[%s1464_s29 + $0x138] sm:$0xf] }
  0x39   : > { %262 = vst [vmem:[%s1469_s26 + $0x98] sm:$0xf] %v261_v38  ;;  %v265_v40 = vld [vmem:[%s1464_s29 + $0x140] sm:$0xf]  ;;  %v267_v41 = vld [vmem:[%s1464_s29 + $0x148] sm:$0xf] }
  0x3a   : > { %264 = vst [vmem:[%s1469_s26 + $0x9c] sm:$0xf] %v263_v39  ;;  %266 = vst [vmem:[%s1469_s26 + $0xa0] sm:$0xf] %v265_v40  ;;  %v269_v42 = vld [vmem:[%s1464_s29 + $0x150] sm:$0xf] }
  0x3b   : > { %268 = vst [vmem:[%s1469_s26 + $0xa4] sm:$0xf] %v267_v41  ;;  %v271_v43 = vld [vmem:[%s1464_s29 + $0x158] sm:$0xf]  ;;  %v273_v44 = vld [vmem:[%s1464_s29 + $0x160] sm:$0xf] }
  0x3c   : > { %270 = vst [vmem:[%s1469_s26 + $0xa8] sm:$0xf] %v269_v42  ;;  %272 = vst [vmem:[%s1469_s26 + $0xac] sm:$0xf] %v271_v43  ;;  %v275_v45 = vld [vmem:[%s1464_s29 + $0x168] sm:$0xf] }
  0x3d   : > { %274 = vst [vmem:[%s1469_s26 + $0xb0] sm:$0xf] %v273_v44  ;;  %v277_v46 = vld [vmem:[%s1464_s29 + $0x170] sm:$0xf]  ;;  %v279_v47 = vld [vmem:[%s1464_s29 + $0x178] sm:$0xf] }
  0x3e   : > { %276 = vst [vmem:[%s1469_s26 + $0xb4] sm:$0xf] %v275_v45  ;;  %278 = vst [vmem:[%s1469_s26 + $0xb8] sm:$0xf] %v277_v46  ;;  %v281_v48 = vld [vmem:[%s1464_s29 + $0x180] sm:$0xf] }
  0x3f   : > { %280 = vst [vmem:[%s1469_s26 + $0xbc] sm:$0xf] %v279_v47  ;;  %v283_v49 = vld [vmem:[%s1464_s29 + $0x188] sm:$0xf]  ;;  %v285_v50 = vld [vmem:[%s1464_s29 + $0x190] sm:$0xf] }
  0x40   : > { %282 = vst [vmem:[%s1469_s26 + $0xc0] sm:$0xf] %v281_v48  ;;  %284 = vst [vmem:[%s1469_s26 + $0xc4] sm:$0xf] %v283_v49  ;;  %v287_v51 = vld [vmem:[%s1464_s29 + $0x198] sm:$0xf] }
  0x41   : > { %286 = vst [vmem:[%s1469_s26 + $0xc8] sm:$0xf] %v285_v50  ;;  %v289_v52 = vld [vmem:[%s1464_s29 + $0x1a0] sm:$0xf]  ;;  %v291_v53 = vld [vmem:[%s1464_s29 + $0x1a8] sm:$0xf] }
  0x42   : > { %288 = vst [vmem:[%s1469_s26 + $0xcc] sm:$0xf] %v287_v51  ;;  %290 = vst [vmem:[%s1469_s26 + $0xd0] sm:$0xf] %v289_v52  ;;  %v293_v54 = vld [vmem:[%s1464_s29 + $0x1b0] sm:$0xf] }
  0x43   : > { %292 = vst [vmem:[%s1469_s26 + $0xd4] sm:$0xf] %v291_v53  ;;  %v295_v55 = vld [vmem:[%s1464_s29 + $0x1b8] sm:$0xf]  ;;  %v297_v56 = vld [vmem:[%s1464_s29 + $0x1c0] sm:$0xf] }
  0x44   : > { %294 = vst [vmem:[%s1469_s26 + $0xd8] sm:$0xf] %v293_v54  ;;  %296 = vst [vmem:[%s1469_s26 + $0xdc] sm:$0xf] %v295_v55  ;;  %v299_v57 = vld [vmem:[%s1464_s29 + $0x1c8] sm:$0xf] }
  0x45   : > { %298 = vst [vmem:[%s1469_s26 + $0xe0] sm:$0xf] %v297_v56  ;;  %v301_v58 = vld [vmem:[%s1464_s29 + $0x1d0] sm:$0xf]  ;;  %v303_v59 = vld [vmem:[%s1464_s29 + $0x1d8] sm:$0xf] }
  0x46   : > { %300 = vst [vmem:[%s1469_s26 + $0xe4] sm:$0xf] %v299_v57  ;;  %302 = vst [vmem:[%s1469_s26 + $0xe8] sm:$0xf] %v301_v58  ;;  %v305_v60 = vld [vmem:[%s1464_s29 + $0x1e0] sm:$0xf] }
  0x47   : > { %304 = vst [vmem:[%s1469_s26 + $0xec] sm:$0xf] %v303_v59  ;;  %v307_v61 = vld [vmem:[%s1464_s29 + $0x1e8] sm:$0xf]  ;;  %v309_v62 = vld [vmem:[%s1464_s29 + $0x1f0] sm:$0xf] }
  0x48   : > { %306 = vst [vmem:[%s1469_s26 + $0xf0] sm:$0xf] %v305_v60  ;;  %308 = vst [vmem:[%s1469_s26 + $0xf4] sm:$0xf] %v307_v61  ;;  %v311_v63 = vld [vmem:[%s1464_s29 + $0x1f8] sm:$0xf] }
  0x49   : > { %310 = vst [vmem:[%s1469_s26 + $0xf8] sm:$0xf] %v309_v62  ;;  %312 = vst [vmem:[%s1469_s26 + $0xfc] sm:$0xf] %v311_v63 }
  0x4a PF: > { %p1022_p0 = scmp.ge.s32.totalorder %s1340_s21, 1  ;;  %p469_p1 = scmp.lt.s32.totalorder %s1340_s21, 9 }
  0x4c   : > { %p470_p2 = pnand %p1022_p0, %p469_p1 }
  0x4d   : > { %s476_s28 = sand.u32 (!%p470_p2), 1, %s1316_s15   ;;  %s1726_s5 = sand.u32 (!%p470_p2), 1, %s1308_s13  }
  0x4e   : > { %473 = sbr.rel (%p470_p2) target bundleno = 362 (0x16a), region = 69  ;;  %s1023_s9 = sshll.u32 (!%p470_p2), %s476_s28, 8 }
  0x4f   : > { %s1602_s10 = sshll.u32 (!%p470_p2), %s1726_s5, 1  ;;  %s1025_s11 = sshll.u32 (!%p470_p2), %s1324_s17, 2 }
  0x50   : > { %p512_p3 = scmp.lt.s32.totalorder (!%p470_p2), %s1328_s18, 1  ;;  %p507_p4 = scmp.lt.s32.totalorder (!%p470_p2), %s1025_s11, 15 }
  0x51   : > { %s1619_s28 = scalar_lea.vmem (!%p470_p2), [#allocation3], %s1023_s9  ;;  %s505_s5 = scalar_lea.vmem (!%p470_p2), [#allocation4], %s1602_s10 }
  0x52   : > { %p1026_p5 = scmp.ne.s32.totalorder (!%p470_p2), %s1324_s17, 0 }
  0x53   : > { %s1607_s22 = scalar_select %p512_p3, %s1328_s18, 1 }
  0x54   : > { %s1747_s11 = smov (!%p507_p4, %s1025_s11), 15  ;;  %519 = sbr.rel (%p1026_p5) target bundleno = 91 (0x5b), region = 77 }
  0x55   : > { %s514_s4 = scalar_lea.vmem %s1724_s2, %s1607_s22  ;;  %s509_s26 = scalar_lea.vmem %s1722_s0, %s1747_s11 }
  0x59   : > { %v1342_v0 = vmov 0.0  }
  0x5a   : > { %520 = vst [vmem:[#allocation2] sm:$0x3] %v1342_v0 }
  0x5b PF: > { %v1200_v1 = vld [vmem:[%s1619_s28 + $0x78] sm:$0xff]   ;;  %v1204_v5 = vld [vmem:[%s1619_s28 + $0x70] sm:$0xff]   ;;  %v1208_v9 = vld [vmem:[%s1619_s28 + $0x68] sm:$0xff]   ;;  %v599_v31 = vlaneseq  ;;  %v1343_v35 = vmov 1966171168   ;;  %p1060_p6 = scmp.ne.s32.totalorder %s1324_s17, 3 }
  0x5c   : > { %v1201_v2 = vld [vmem:[%s1619_s28 + $0xf8] sm:$0xff]   ;;  %1067 = vmatprep.subr.bf16.mxu0 %v1200_v1  ;;  %v1205_v6 = vld [vmem:[%s1619_s28 + $0xf0] sm:$0xff]   ;;  %v1209_v10 = vld [vmem:[%s1619_s28 + $0xe8] sm:$0xff]   ;;  %v597_v36 = vunpack.c.l.s4 %v1343_v35 }
  0x5d   : > { %v1202_v3 = vld [vmem:[%s1619_s28 + $0x38] sm:$0xff]   ;;  %1089 = vmatprep.subr.bf16.mxu1 %v1201_v2  ;;  %v1206_v7 = vld [vmem:[%s1619_s28 + $0x30] sm:$0xff]   ;;  %v1210_v11 = vld [vmem:[%s1619_s28 + $0x28] sm:$0xff]   ;;  %v600_v37 = vshrl.u32 %v599_v31, 7 }
  0x5e   : > { %v1203_v4 = vld [vmem:[%s1619_s28 + $0xb8] sm:$0xff]   ;;  %1068 = vmatpush3.bf16.msra.mxu0 %v1202_v3  ;;  %v1207_v8 = vld [vmem:[%s1619_s28 + $0xb0] sm:$0xff]   ;;  %v1211_v12 = vld [vmem:[%s1619_s28 + $0xa8] sm:$0xff]   ;;  %v598_v39 = vunpack.c.0.s8 %v597_v36 }
  0x5f   : > { %1090 = vmatpush3.bf16.msra.mxu1 %v1203_v4  ;;  %1069 = vmatprep.subr.bf16.mxu0 %v1204_v5  ;;  %v1212_v13 = vld [vmem:[%s1619_s28 + $0x60] sm:$0xff]   ;;  %v1216_v17 = vld [vmem:[%s1619_s28 + $0x58] sm:$0xff]   ;;  %v1220_v21 = vld [vmem:[%s1619_s28 + $0x50] sm:$0xff]  }
  0x60   : > { %1091 = vmatprep.subr.bf16.mxu1 %v1205_v6  ;;  %v1213_v14 = vld [vmem:[%s1619_s28 + $0xe0] sm:$0xff]   ;;  %v1217_v18 = vld [vmem:[%s1619_s28 + $0xd8] sm:$0xff]   ;;  %v1221_v22 = vld [vmem:[%s1619_s28 + $0xd0] sm:$0xff]   ;;  %v601_v40 = vsub.s32 %v598_v39, %v600_v37 }
  0x61   : > { %v1214_v15 = vld [vmem:[%s1619_s28 + $0x20] sm:$0xff]   ;;  %v1218_v19 = vld [vmem:[%s1619_s28 + $0x18] sm:$0xff]   ;;  %v1222_v23 = vld [vmem:[%s1619_s28 + $0x10] sm:$0xff]  }
  0x62   : > { %1070 = vmatpush3.bf16.msra.mxu0 %v1206_v7  ;;  %v1215_v16 = vld [vmem:[%s1619_s28 + $0xa0] sm:$0xff]   ;;  %v1219_v20 = vld [vmem:[%s1619_s28 + $0x98] sm:$0xff]   ;;  %v1223_v24 = vld [vmem:[%s1619_s28 + $0x90] sm:$0xff]  }
  0x63   : > { %1092 = vmatpush3.bf16.msra.mxu1 %v1207_v8  ;;  %1071 = vmatprep.subr.bf16.mxu0 %v1208_v9  ;;  %v1224_v25 = vld [vmem:[%s1619_s28 + $0x48] sm:$0xff]   ;;  %v1228_v29 = vld [vmem:[%s1619_s28 + $0x40] sm:$0xff]   ;;  %v521_v52 = vld [vmem:[#allocation2] sm:$0x3] }
  0x64   : > { %1093 = vmatprep.subr.bf16.mxu1 %v1209_v10  ;;  %v1225_v26 = vld [vmem:[%s1619_s28 + $0xc8] sm:$0xff]   ;;  %v1229_v30 = vld [vmem:[%s1619_s28 + $0xc0] sm:$0xff]  }
  0x65   : > { %v1226_v27 = vld [vmem:[%s1619_s28 + $0x8] sm:$0xff]   ;;  %v1230_v32 = vld [vmem:[%s1619_s28] sm:$0xff]  }
  0x66   : > { %1072 = vmatpush3.bf16.msra.mxu0 %v1210_v11  ;;  %v1227_v28 = vld [vmem:[%s1619_s28 + $0x88] sm:$0xff]   ;;  %v1231_v33 = vld [vmem:[%s1619_s28 + $0x80] sm:$0xff]  }
  0x67   : > { %1094 = vmatpush3.bf16.msra.mxu1 %v1211_v12  ;;  %1073 = vmatprep.subr.bf16.mxu0 %v1212_v13  ;;  %v1027_v34 = vld.sshfl [vmem:[%s509_s26] sm:$0x33 pattern:$0x75316420] }
  0x68   : > { %1095 = vmatprep.subr.bf16.mxu1 %v1213_v14  ;;  %v595_v38 = vcombine.high %v1027_v34, %v1027_v34  ;;  %v602_v42 = vrot.slane %v1027_v34, %v601_v40 }
  0x6a   : > { %1074 = vmatpush3.bf16.msra.mxu0 %v1214_v15  ;;  %v609_v41 = vrot.slane %v595_v38, %v601_v40  ;;  %v610_v44 = vcombine.high %v602_v42, %v602_v42 }
  0x6b   : > { %1096 = vmatpush3.bf16.msra.mxu1 %v1215_v16  ;;  %1075 = vmatprep.subr.bf16.mxu0 %v1216_v17 }
  0x6c   : > { %1097 = vmatprep.subr.bf16.mxu1 %v1217_v18  ;;  %840 = vmatprep.mubr.bf16.mxu0 %v609_v41  ;;  %v611_v43 = vcombine.high %v609_v41, %v609_v41 }
  0x6e   : > { %1076 = vmatpush3.bf16.msra.mxu0 %v1218_v19  ;;  %880 = vmatprep.mubr.bf16.mxu1 %v611_v43 }
  0x6f   : > { %1098 = vmatpush3.bf16.msra.mxu1 %v1219_v20  ;;  %1077 = vmatprep.subr.bf16.mxu0 %v1220_v21 }
  0x70   : > { %1099 = vmatprep.subr.bf16.mxu1 %v1221_v22 }
  0x72   : > { %1078 = vmatpush3.bf16.msra.mxu0 %v1222_v23 }
  0x73   : > { %1100 = vmatpush3.bf16.msra.mxu1 %v1223_v24  ;;  %1079 = vmatprep.subr.bf16.mxu0 %v1224_v25 }
  0x74   : > { %1101 = vmatprep.subr.bf16.mxu1 %v1225_v26 }
  0x76   : > { %1080 = vmatpush3.bf16.msra.mxu0 %v1226_v27 }
  0x77   : > { %1102 = vmatpush3.bf16.msra.mxu1 %v1227_v28  ;;  %1081 = vmatprep.subr.bf16.mxu0 %v1228_v29 }
  0x78   : > { %1103 = vmatprep.subr.bf16.mxu1 %v1229_v30 }
  0x7a   : > { %1082 = vmatpush3.bf16.msra.mxu0 %v1230_v32 }
  0x7b   : > { %1104 = vmatpush3.bf16.msra.mxu1 %v1231_v33 }
  0x7d   : > { %841 = vmatmul.mubr.bf16.vlgmr.msra.gmra.mxu0 %v602_v42 }
  0x7e   : > { %881 = vmatmul.mubr.bf16.vlgmr.msra.gmra.mxu1 %v610_v44 }
 0x13d   : > { %v1083_v45 = vpop.f32.mrf.mxu0 }
 0x13e   : > { %v1105_v46 = vpop.f32.mrf.mxu1 }
 0x13f   : > { %v1084_v47 = vpop.f32.mrf.mxu0 }
 0x140   : > { %v1085_v48 = vadd.f32 %v1084_v47, %v1083_v45  ;;  %v1106_v49 = vpop.f32.mrf.mxu1 }
 0x141   : > { %v1086_v50 = vpop.f32.mrf.mxu0  ;;  %v1107_v51 = vadd.f32 %v1106_v49, %v1105_v46 }
 0x142   : > { %v1108_v53 = vpop.f32.mrf.mxu1 }
 0x143   : > { %v1087_v54 = vpop.f32.mrf.mxu0  ;;  %v883_v55 = vadd.f32 %v1107_v51, %v1085_v48  ;;  %893 = sbr.rel (%p1060_p6) target bundleno = 338 (0x152), region = 81 }
 0x144   : > { %v1109_v56 = vpop.f32.mrf.mxu1 }
 0x145   : > { %v888_v57 = vadd.f32 %v883_v55, %v521_v52 }
 0x147   : > { %889 = vst [vmem:[#allocation2] sm:$0x3] %v888_v57 }
 0x148   : > { %v1061_v59 = vld [vmem:[%s514_s4] ss:$0 sm:$0xff] }
 0x14e   : > { %v894_v58 = vld [vmem:[#allocation2] sm:$0x3] }
 0x14f   : > { %v902_v60 = vadd.f32 %v1061_v59, %v894_v58 }
 0x151   : > { %903 = vst [vmem:[%s505_s5] sm:$0x3] %v902_v60 }
 0x152 PF: > { %s1063_s15 = sshll.u32 %s1328_s18, 5  ;;  %s918_s28 = sshll.u32 %s505_s5, 4  ;;  %s919_s28 = int_to_ptr.vmem [resolvable:$true] %s918_s28 }
 0x153   : > { %s916_s26 = scalar_lea.hbm %s1725_s3, %s1063_s15  ;;  %s1730_s9 = sand.u32 1, %s1308_s13  }
 0x154   : > { %s905_s22 = scalar_lea.sflag [#allocation5], %s1730_s9  ;;  %s1232_s23 = scalar_lea.vmem %s919_s28, 32 }
 0x155   : > { %p1233_p8 = scmp.ne.s32.totalorder %s919_s28, %s1232_s23  ;;  %s1344_s4 = smov [#allocation4]  }
 0x156   : > { %s1236_s11 = sshll.u32 %s1344_s4, 4  ;;  %s1237_s11 = int_to_ptr.vmem [resolvable:$false] %s1236_s11 }
 0x157   : > { %p1234_p9 = pnand %p1233_p8, %p1437_p7  ;;  %s1238_s27 = scalar_lea.vmem %s1237_s11, 64 }
 0x158   : > { %p1239_p11 = scmp.lt.s32.totalorder %s919_s28, %s1237_s11  ;;  %p1240_p13 = scmp.lt.s32.totalorder %s1238_s27, %s1232_s23 }
 0x159   : > { %p1235_p10 = pneg %p1234_p9 }
 0x15a   : > { %p1241_p0 = por %p1240_p13, %p1239_p11 }
 0x15c   : > { %p1242_p1 = pnand %p1241_p0, %p1235_p10 }
 0x15e   : > { %1245 = shalt.err (!%p1242_p1)
}
 0x15f   : > { %s1246_s18 = scalar_lea.hbm %s916_s26, 32  ;;  %s1250_s15 = scalar_lea.hbm %s1725_s3, 64 }
 0x160   : > { %p1247_p2 = scmp.ne.s32.totalorder %s916_s26, %s1246_s18  ;;  %p1251_p5 = scmp.lt.s32.totalorder %s916_s26, %s1725_s3 }
 0x161   : > { %p1252_p6 = scmp.lt.s32.totalorder %s1250_s15, %s1246_s18 }
 0x162   : > { %p1248_p3 = pnand %p1247_p2, %p1437_p7 }
 0x163   : > { %p1253_p8 = por %p1252_p6, %p1251_p5 }
 0x164   : > { %p1249_p4 = pneg %p1248_p3 }
 0x166   : > { %p1254_p9 = pnand %p1253_p8, %p1249_p4 }
 0x168   : > { %1257 = shalt.err (!%p1254_p9)
}
 0x169   : > { %1111 = dma.vmem_to_hbm [thread:$0]  (%p1437_p7), %s919_s28, 32, %s916_s26, %s905_s22  }
 0x16a PF: > { %p1117_p10 = scmp.ge.s32.totalorder %s1340_s21, 2  ;;  %s930_s9 = sand.u32 1, %s1304_s12  }
 0x16b   : > { %s931_s23 = scalar_lea.sflag [#allocation5], %s930_s9 }
 0x16c   : > { %p1114_p11 = pnand %p1117_p10, %p1445_p12 }
 0x16e   : > { %p1115_p13 = pneg %p1114_p11 }
 0x170   : > { %1299 = dma.done.wait (%p1115_p13), %s931_s23, 32  }
 0x171   : > { %1301 = vsyncadd (%p1115_p13), %s931_s23, 4294967264  ;;  %s16_s21 = sadd.s32 1, %s1340_s21   ;;  %s1731_s12 = smov %s1308_s13 }
 0x172   : > { %p13_p0 = scmp.ge.s32.totalorder %s16_s21, 10   ;;  %s1732_s13 = smov %s1312_s14 }
 0x173   : > { %s1733_s14 = smov %s1450_s7  ;;  %s1734_s15 = smov %s1320_s16 }
 0x174   : > { %s1735_s16 = smov %s1453_s8  ;;  %s1736_s17 = smov %s1332_s19 }
 0x175   : > { %s1737_s18 = smov %s1336_s20  ;;  %s1738_s19 = smov %s1741_s24 }
 0x176   : > { %s1739_s20 = smov %s1745_s25  ;;  %15 = sbr.rel (!%p13_p0) target bundleno = 6 (0x6), region = 127 }
 0x17b   :  { %936 = vsyncpa [#allocation5], 1 }
 0x17c   :  { %938 = vsyncpa [#allocation5 + $0x1], 1 }

</bundles_post_ra>
